<compile_context>
chip_gen: v5e
topology: v5e:2x2
jax: 0.10.0
libtpu: 0.0.40
codegen_flags: <defaults>
</compile_context>

<pallas_src>
import functools

import jax
import jax.numpy as jnp
from jax.experimental import pallas as pl
from jax.experimental.pallas import tpu as pltpu

K_SA = 7          # SpatialAttention kernel size
PAD_SA = 3        # padding for kernel_size == 7
BN_EPS = 1e-5


# --------------------------------------------------------------------------- helpers
def _const_spec(shape):
    zeros = (0,) * len(shape)
    return pl.BlockSpec(shape, lambda *_: zeros)


def _tap_masks(H, W, bn, pad):
    """(ks*ks, bn*H*W) 0/1 float masks reproducing zero padding, tiled per sample."""
    HW = H * W
    ks = 2 * pad + 1
    pos = jnp.arange(HW, dtype=jnp.int32)
    r = pos // W
    c = pos % W
    rows = []
    for ki in range(ks):
        for kj in range(ks):
            di, dj = ki - pad, kj - pad
            ok = ((r + di >= 0) & (r + di <= H - 1) &
                  (c + dj >= 0) & (c + dj <= W - 1)).astype(jnp.float32)
            rows.append(jnp.tile(ok, bn))
    return jnp.stack(rows, axis=0)


# --------------------------------------------------------------------------- fused kernel
def _fused_bottleneck_kernel(
        w1_ref, b1_ref,
        w2dw_ref, b2dw_ref, dwmask_ref,
        w2pw_ref, b2pw_ref,
        w3_ref, b3_ref,
        fc1t_ref, fc2_ref,
        sa_wm_ref,
        x_ref, o_ref,
        *, H, W, bn_block):
    HW = H * W
    L = bn_block * HW

    x = x_ref[...].astype(jnp.float32)                       # (Cin, L) input == identity

    # ---- conv1 (1x1) + folded bn1 + ReLU   (bf16 MXU, f32 accumulate)
    out = jnp.dot(w1_ref[...], x.astype(jnp.bfloat16),
                  preferred_element_type=jnp.float32) + b1_ref[...]
    out = jnp.maximum(out, 0.0)                               # (width, L)

    # ---- depthwise 3x3 (stride 1, pad 1) + folded bn + ReLU6
    acc = jnp.zeros_like(out)
    for t in range(9):
        di, dj = t // 3 - 1, t % 3 - 1
        shift = (-(di * W + dj)) % L                          # shifted[p] == out[p + off]
        xs = pltpu.roll(out, shift, axis=1) if shift else out
        acc = acc + w2dw_ref[t] * (dwmask_ref[t] * xs)        # (width,1)*( (1,L)*(width,L) )
    out = jnp.clip(acc + b2dw_ref[...], 0.0, 6.0)

    # ---- conv2 tail: 1x1 conv + folded bn, then the Bottleneck's outer ReLU
    out = jnp.dot(w2pw_ref[...], out.astype(jnp.bfloat16),
                  preferred_element_type=jnp.float32) + b2pw_ref[...]
    out = jnp.maximum(out, 0.0)

    # ---- conv3 (1x1) + folded bn3
    out = jnp.dot(w3_ref[...], out.astype(jnp.bfloat16),
                  preferred_element_type=jnp.float32) + b3_ref[...]    # (Cout, L)

    # ---- channel attention (per-sample adaptive avg/max pool + 2-layer MLP), gating
    fc1t = fc1t_ref[...]                                      # (Cout, Ch) == fc1.weight.T
    fc2 = fc2_ref[...]                                        # (Cout, Ch) == fc2.weight
    gate_cols = []
    for s in range(bn_block):                                 # tiny per-sample MLP only
        xs = out[:, s * HW:(s + 1) * HW]                      # lane-aligned static slice
        avg = jnp.mean(xs, axis=1, keepdims=True)             # (Cout, 1)
        mx = jnp.max(xs, axis=1, keepdims=True)
        h_avg = jnp.maximum(jnp.sum(fc1t * avg, axis=0, keepdims=True), 0.0)   # (1, Ch)
        h_max = jnp.maximum(jnp.sum(fc1t * mx, axis=0, keepdims=True), 0.0)
        a_avg = jnp.sum(fc2 * h_avg, axis=1, keepdims=True)                    # (Cout, 1)
        a_max = jnp.sum(fc2 * h_max, axis=1, keepdims=True)
        gate_cols.append(jax.nn.sigmoid(a_avg + a_max))       # (Cout, 1)
    if bn_block == 1:
        out = out * gate_cols[0]
    else:
        lane_sample = jax.lax.broadcasted_iota(jnp.int32, out.shape, 1) // HW
        gate_full = jnp.broadcast_to(gate_cols[0], out.shape)
        for s in range(1, bn_block):
            gate_full = jnp.where(lane_sample == s,
                                  jnp.broadcast_to(gate_cols[s], out.shape), gate_full)
        out = out * gate_full

    # ---- spatial attention (7x7 conv on [channel-mean; channel-max]) + gating
    #      fused with the residual add and the final ReLU.
    s_avg = jnp.mean(out, axis=0, keepdims=True)              # (1, L)
    s_max = jnp.max(out, axis=0, keepdims=True)               # (1, L)
    row_id = jax.lax.broadcasted_iota(jnp.int32, (2, L), 0)
    sm = jnp.where(row_id == 0,
                   jnp.broadcast_to(s_avg, (2, L)),
                   jnp.broadcast_to(s_max, (2, L)))           # (2, L) stacked [avg; max]
    acc_sa = jnp.zeros((2, L), jnp.float32)
    for t in range(K_SA * K_SA):
        di, dj = t // K_SA - PAD_SA, t % K_SA - PAD_SA
        shift = (-(di * W + dj)) % L
        sm_s = pltpu.roll(sm, shift, axis=1) if shift else sm
        acc_sa = acc_sa + sa_wm_ref[t] * sm_s                 # mask pre-folded into weights
    gate_s = jax.nn.sigmoid(acc_sa[0:1, :] + acc_sa[1:2, :])  # (1, L)

    o_ref[...] = jnp.maximum(out * gate_s + x, 0.0).astype(o_ref.dtype)


# --------------------------------------------------------------------------- BN folding
def _fold_bn_1x1(w, bn):
    gamma, beta, mean, var = bn
    scale = gamma / jnp.sqrt(var + BN_EPS)
    w_f = (w * scale[:, None]).astype(jnp.bfloat16)            # bf16 MXU operand
    b = ((beta - scale * mean)[:, None]).astype(jnp.float32)   # f32 bias
    return w_f, b


def _fold_bn_dw(w, bn):
    gamma, beta, mean, var = bn
    scale = gamma / jnp.sqrt(var + BN_EPS)
    wf = w * scale[:, None, None]                                          # (C, 3, 3)
    w9 = jnp.transpose(wf, (1, 2, 0)).reshape(9, w.shape[0])[:, :, None]   # (9, C, 1)
    b = (beta - scale * mean)[:, None]                                     # (C, 1)
    return w9.astype(jnp.float32), b.astype(jnp.float32)


# --------------------------------------------------------------------------- forward
def bottleneck_forward(x, p, bn_block=None):
    """Pallas forward of Bottleneck (stride=1, downsample=None, inference BN)."""
    N, C, H, W = x.shape
    HW = H * W
    if bn_block is None:
        # >= 2 grid steps when N >= 2 (v7x has 2 TensorCores; also enables overlap).
        cap = max(1, min(8, N // 2))
        bn_block = max(d for d in range(1, cap + 1) if N % d == 0)
    assert N % bn_block == 0
    L = bn_block * HW

    # Lane-dense, batch-in-lanes layout: (C, N*HW); sample s owns lanes [s*HW,(s+1)*HW).
    xf = jnp.transpose(x.reshape(N, C, HW), (1, 0, 2)).reshape(C, N * HW)
    xf = xf.astype(jnp.float32)

    w1, b1 = _fold_bn_1x1(p["conv1_w"], p["bn1"])
    w2dw, b2dw = _fold_bn_dw(p["conv2_dw_w"], p["bn2a"])
    w2pw, b2pw = _fold_bn_1x1(p["conv2_pw_w"], p["bn2b"])
    w3, b3 = _fold_bn_1x1(p["conv3_w"], p["bn3"])
    width, cin = w1.shape
    cout = w3.shape[0]
    assert cin == cout, "identity residual requires in_channel == out_channel"

    fc1t = jnp.transpose(p["ca_fc1_w"]).astype(jnp.float32)    # (Cout, Ch)
    fc2 = p["ca_fc2_w"].astype(jnp.float32)                    # (Cout, Ch)
    ch = fc1t.shape[1]

    dwmask = _tap_masks(H, W, bn_block, 1)[:, None, :]          # (9, 1, L)
    sa_masks = _tap_masks(H, W, bn_block, PAD_SA)               # (49, L)
    sa_taps = p["sa_conv_w"].reshape(2, K_SA * K_SA).astype(jnp.float32)   # (2, 49)
    sa_wm = jnp.transpose(sa_taps[:, :, None] * sa_masks[None, :, :], (1, 0, 2))  # (49,2,L)

    kernel = functools.partial(_fused_bottleneck_kernel, H=H, W=W, bn_block=bn_block)
    out = pl.pallas_call(
        kernel,
        out_shape=jax.ShapeDtypeStruct((cout, N * HW), jnp.float32),
        grid=(N // bn_block,),
        in_specs=[
            _const_spec((width, C)),              # w1 (bf16)
            _const_spec((width, 1)),              # b1
            _const_spec((9, width, 1)),           # depthwise taps
            _const_spec((width, 1)),              # depthwise bias
            _const_spec((9, 1, L)),               # depthwise boundary masks
            _const_spec((width, width)),          # conv2 1x1 (bf16)
            _const_spec((width, 1)),              # conv2 1x1 bias
            _const_spec((cout, width)),           # conv3 (bf16)
            _const_spec((cout, 1)),               # conv3 bias
            _const_spec((cout, ch)),              # fc1.T
            _const_spec((cout, ch)),              # fc2
            _const_spec((K_SA * K_SA, 2, L)),     # premasked 7x7 spatial-attn weights
            pl.BlockSpec((C, L), lambda n: (0, n)),            # x (input + identity)
        ],
        out_specs=pl.BlockSpec((cout, L), lambda n: (0, n)),
        compiler_params=pltpu.CompilerParams(dimension_semantics=("parallel",)),
    )(w1, b1, w2dw, b2dw, dwmask, w2pw, b2pw, w3, b3, fc1t, fc2, sa_wm, xf)

    return jnp.transpose(out.reshape(cout, N, HW), (1, 0, 2)).reshape(N, cout, H, W)


# --------------------------------------------------------------------------- pure-JAX reference
def _bn_ref(x, bn):
    gamma, beta, mean, var = bn
    inv = gamma / jnp.sqrt(var + BN_EPS)
    return (x - mean[None, :, None, None]) * inv[None, :, None, None] + beta[None, :, None, None]


def _conv1x1_ref(x, w):
    return jnp.einsum("oi,nihw->nohw", w, x, precision=jax.lax.Precision.HIGHEST)


def bottleneck_ref(x, p):
    identity = x
    out = jnp.maximum(_bn_ref(_conv1x1_ref(x, p["conv1_w"]), p["bn1"]), 0.0)
    dw = jax.lax.conv_general_dilated(
        out, p["conv2_dw_w"][:, None, :, :], (1, 1), ((1, 1), (1, 1)),
        dimension_numbers=("NCHW", "OIHW", "NCHW"),
        feature_group_count=out.shape[1], precision=jax.lax.Precision.HIGHEST)
    out = jnp.clip(_bn_ref(dw, p["bn2a"]), 0.0, 6.0)
    out = jnp.maximum(_bn_ref(_conv1x1_ref(out, p["conv2_pw_w"]), p["bn2b"]), 0.0)
    out = _bn_ref(_conv1x1_ref(out, p["conv3_w"]), p["bn3"])

    avg = jnp.mean(out, axis=(2, 3))
    mx = jnp.max(out, axis=(2, 3))

    def mlp(v):
        h = jnp.maximum(jnp.einsum("hc,nc->nh", p["ca_fc1_w"], v,
                                   precision=jax.lax.Precision.HIGHEST), 0.0)
        return jnp.einsum("ch,nh->nc", p["ca_fc2_w"], h,
                          precision=jax.lax.Precision.HIGHEST)

    out = jax.nn.sigmoid(mlp(avg) + mlp(mx))[:, :, None, None] * out

    s_avg = jnp.mean(out, axis=1, keepdims=True)
    s_max = jnp.max(out, axis=1, keepdims=True)
    cat = jnp.concatenate([s_avg, s_max], axis=1)
    sa = jax.lax.conv_general_dilated(
        cat, p["sa_conv_w"], (1, 1), ((PAD_SA, PAD_SA), (PAD_SA, PAD_SA)),
        dimension_numbers=("NCHW", "OIHW", "NCHW"),
        precision=jax.lax.Precision.HIGHEST)
    out = jax.nn.sigmoid(sa) * out
    return jnp.maximum(out + identity, 0.0)


if __name__ == "__main__":
    key = jax.random.PRNGKey(0)
    ks = jax.random.split(key, 12)

    # Shapes consistent with Bottleneck defaults (in_channel == out_channel, stride=1,
    # no downsample).  ChannelAttention hard-codes a //16 reduction, so C >= 16.
    N, C, H, W = 2, 32, 16, 16
    width = C
    hidden = C // 16

    def bn_params(k, c):
        k1, k2, k3, k4 = jax.random.split(k, 4)
        gamma = 1.0 + 0.1 * jax.random.normal(k1, (c,), jnp.float32)
        beta = 0.1 * jax.random.normal(k2, (c,), jnp.float32)
        mean = 0.1 * jax.random.normal(k3, (c,), jnp.float32)
        var = jnp.abs(jax.random.normal(k4, (c,), jnp.float32)) + 0.5
        return (gamma, beta, mean, var)

    x = jax.random.normal(ks[0], (N, C, H, W), jnp.float32)
    p = {
        "conv1_w": 0.2 * jax.random.normal(ks[1], (width, C), jnp.float32),
        "bn1": bn_params(ks[2], width),
        "conv2_dw_w": 0.2 * jax.random.normal(ks[3], (width, 3, 3), jnp.float32),
        "bn2a": bn_params(ks[4], width),
        "conv2_pw_w": 0.2 * jax.random.normal(ks[5], (width, width), jnp.float32),
        "bn2b": bn_params(ks[6], width),
        "conv3_w": 0.2 * jax.random.normal(ks[7], (C, width), jnp.float32),
        "bn3": bn_params(ks[8], C),
        "ca_fc1_w": 0.2 * jax.random.normal(ks[9], (hidden, C), jnp.float32),
        "ca_fc2_w": 0.2 * jax.random.normal(ks[10], (C, hidden), jnp.float32),
        "sa_conv_w": 0.2 * jax.random.normal(ks[11], (1, 2, K_SA, K_SA), jnp.float32),
    }

    expected = bottleneck_ref(x, p)

    fwd = jax.jit(bottleneck_forward, static_argnames=("bn_block",))

    # Default: bn_block=1 -> 2 "parallel" grid steps (feeds both v7x TensorCores).
    out = jax.block_until_ready(fwd(x, p))
    assert out.shape == (N, C, H, W)
    err = float(jnp.max(jnp.abs(out - expected)))
    # bf16 MXU weights/activations with f32 accumulation vs HIGHEST-precision reference.
    assert jnp.allclose(out, expected, atol=5e-2, rtol=5e-2), f"max abs err {err}"

    # Also validate the multi-sample-per-block (batch folded into lanes) path.
    out2 = jax.block_until_ready(fwd(x, p, bn_block=2))
    err2 = float(jnp.max(jnp.abs(out2 - expected)))
    assert jnp.allclose(out2, expected, atol=5e-2, rtol=5e-2), f"max abs err {err2}"

    print("KERNEL_OK")
</pallas_src>

<mosaic_0001>
module attributes {stable_mosaic.version = 11 : i64} {
  func.func @_fused_bottleneck_kernel(%arg0: i32, %arg1: memref<32x32xbf16, #tpu.memory_space<vmem>>, %arg2: memref<32x1xf32, #tpu.memory_space<vmem>>, %arg3: memref<9x32x1xf32, #tpu.memory_space<vmem>>, %arg4: memref<32x1xf32, #tpu.memory_space<vmem>>, %arg5: memref<9x1x256xf32, #tpu.memory_space<vmem>>, %arg6: memref<32x32xbf16, #tpu.memory_space<vmem>>, %arg7: memref<32x1xf32, #tpu.memory_space<vmem>>, %arg8: memref<32x32xbf16, #tpu.memory_space<vmem>>, %arg9: memref<32x1xf32, #tpu.memory_space<vmem>>, %arg10: memref<32x2xf32, #tpu.memory_space<vmem>>, %arg11: memref<32x2xf32, #tpu.memory_space<vmem>>, %arg12: memref<49x2x256xf32, #tpu.memory_space<vmem>>, %arg13: memref<32x256xf32, #tpu.memory_space<vmem>>, %arg14: memref<32x256xf32, #tpu.memory_space<vmem>>) attributes {dimension_semantics = [#tpu.dimension_semantics<parallel>], iteration_bounds = array<i64: 2>, scalar_prefetch = 0 : i64, scratch_operands = 0 : i64, tpu.core_type = #tpu.core_type<tc>, window_params = [{pipeline_mode = #tpu.pipeline_mode<synchronous>, transform_indices = @transform_0, window_bounds = array<i64: 32, 32>}, {pipeline_mode = #tpu.pipeline_mode<synchronous>, transform_indices = @transform_1, window_bounds = array<i64: 32, 1>}, {pipeline_mode = #tpu.pipeline_mode<synchronous>, transform_indices = @transform_2, window_bounds = array<i64: 9, 32, 1>}, {pipeline_mode = #tpu.pipeline_mode<synchronous>, transform_indices = @transform_3, window_bounds = array<i64: 32, 1>}, {pipeline_mode = #tpu.pipeline_mode<synchronous>, transform_indices = @transform_4, window_bounds = array<i64: 9, 1, 256>}, {pipeline_mode = #tpu.pipeline_mode<synchronous>, transform_indices = @transform_5, window_bounds = array<i64: 32, 32>}, {pipeline_mode = #tpu.pipeline_mode<synchronous>, transform_indices = @transform_6, window_bounds = array<i64: 32, 1>}, {pipeline_mode = #tpu.pipeline_mode<synchronous>, transform_indices = @transform_7, window_bounds = array<i64: 32, 32>}, {pipeline_mode = #tpu.pipeline_mode<synchronous>, transform_indices = @transform_8, window_bounds = array<i64: 32, 1>}, {pipeline_mode = #tpu.pipeline_mode<synchronous>, transform_indices = @transform_9, window_bounds = array<i64: 32, 2>}, {pipeline_mode = #tpu.pipeline_mode<synchronous>, transform_indices = @transform_10, window_bounds = array<i64: 32, 2>}, {pipeline_mode = #tpu.pipeline_mode<synchronous>, transform_indices = @transform_11, window_bounds = array<i64: 49, 2, 256>}, {transform_indices = @transform_12, window_bounds = array<i64: 32, 256>}, {transform_indices = @transform_13, window_bounds = array<i64: 32, 256>}]} {
    %c0 = arith.constant 0 : index
    %c0_0 = arith.constant 0 : index
    %0 = vector.load %arg13[%c0, %c0_0] : memref<32x256xf32, #tpu.memory_space<vmem>>, vector<32x256xf32>
    %c0_1 = arith.constant 0 : index
    %c0_2 = arith.constant 0 : index
    %1 = vector.load %arg1[%c0_1, %c0_2] : memref<32x32xbf16, #tpu.memory_space<vmem>>, vector<32x32xbf16>
    %2 = arith.truncf %0 : vector<32x256xf32> to vector<32x256xbf16>
    %cst = arith.constant dense<0.000000e+00> : vector<32x256xf32>
    %3 = tpu.matmul %1, %2, %cst {dimension_numbers = #tpu.dot_dimension_numbers<[1], [0], [0], [1], [0, 0, 1, 1], [], []>} : vector<32x32xbf16>, vector<32x256xbf16>, vector<32x256xf32> -> vector<32x256xf32>
    %c0_3 = arith.constant 0 : index
    %c0_4 = arith.constant 0 : index
    %4 = vector.load %arg2[%c0_3, %c0_4] : memref<32x1xf32, #tpu.memory_space<vmem>>, vector<32x1xf32>
    %5 = vector.broadcast %4 : vector<32x1xf32> to vector<32x256xf32>
    %6 = arith.addf %3, %5 : vector<32x256xf32>
    %cst_5 = arith.constant 0.000000e+00 : f32
    %7 = vector.broadcast %cst_5 : f32 to vector<32x256xf32>
    %8 = arith.maximumf %6, %7 : vector<32x256xf32>
    %cst_6 = arith.constant 0.000000e+00 : f32
    %9 = vector.broadcast %cst_6 : f32 to vector<32x256xf32>
    %c17_i32 = arith.constant 17 : i32
    %10 = tpu.dynamic_rotate %8 by %c17_i32 dim 1 : vector<32x256xf32>, i32 -> vector<32x256xf32>
    %c0_7 = arith.constant 0 : index
    %c0_8 = arith.constant 0 : index
    %c0_9 = arith.constant 0 : index
    %11 = vector.load %arg3[%c0_7, %c0_8, %c0_9] : memref<9x32x1xf32, #tpu.memory_space<vmem>>, vector<1x32x1xf32>
    %12 = vector.shape_cast %11 : vector<1x32x1xf32> to vector<32x1xf32>
    %c0_10 = arith.constant 0 : index
    %c0_11 = arith.constant 0 : index
    %c0_12 = arith.constant 0 : index
    %13 = vector.load %arg5[%c0_10, %c0_11, %c0_12] : memref<9x1x256xf32, #tpu.memory_space<vmem>>, vector<1x1x256xf32>
    %14 = vector.shape_cast %13 : vector<1x1x256xf32> to vector<1x256xf32>
    %15 = vector.broadcast %14 : vector<1x256xf32> to vector<32x256xf32>
    %16 = arith.mulf %15, %10 : vector<32x256xf32>
    %17 = vector.broadcast %12 : vector<32x1xf32> to vector<32x256xf32>
    %18 = arith.mulf %17, %16 : vector<32x256xf32>
    %19 = arith.addf %9, %18 : vector<32x256xf32>
    %c16_i32 = arith.constant 16 : i32
    %20 = tpu.dynamic_rotate %8 by %c16_i32 dim 1 : vector<32x256xf32>, i32 -> vector<32x256xf32>
    %c1 = arith.constant 1 : index
    %c0_13 = arith.constant 0 : index
    %c0_14 = arith.constant 0 : index
    %21 = vector.load %arg3[%c1, %c0_13, %c0_14] : memref<9x32x1xf32, #tpu.memory_space<vmem>>, vector<1x32x1xf32>
    %22 = vector.shape_cast %21 : vector<1x32x1xf32> to vector<32x1xf32>
    %c1_15 = arith.constant 1 : index
    %c0_16 = arith.constant 0 : index
    %c0_17 = arith.constant 0 : index
    %23 = vector.load %arg5[%c1_15, %c0_16, %c0_17] : memref<9x1x256xf32, #tpu.memory_space<vmem>>, vector<1x1x256xf32>
    %24 = vector.shape_cast %23 : vector<1x1x256xf32> to vector<1x256xf32>
    %25 = vector.broadcast %24 : vector<1x256xf32> to vector<32x256xf32>
    %26 = arith.mulf %25, %20 : vector<32x256xf32>
    %27 = vector.broadcast %22 : vector<32x1xf32> to vector<32x256xf32>
    %28 = arith.mulf %27, %26 : vector<32x256xf32>
    %29 = arith.addf %19, %28 : vector<32x256xf32>
    %c15_i32 = arith.constant 15 : i32
    %30 = tpu.dynamic_rotate %8 by %c15_i32 dim 1 : vector<32x256xf32>, i32 -> vector<32x256xf32>
    %c2 = arith.constant 2 : index
    %c0_18 = arith.constant 0 : index
    %c0_19 = arith.constant 0 : index
    %31 = vector.load %arg3[%c2, %c0_18, %c0_19] : memref<9x32x1xf32, #tpu.memory_space<vmem>>, vector<1x32x1xf32>
    %32 = vector.shape_cast %31 : vector<1x32x1xf32> to vector<32x1xf32>
    %c2_20 = arith.constant 2 : index
    %c0_21 = arith.constant 0 : index
    %c0_22 = arith.constant 0 : index
    %33 = vector.load %arg5[%c2_20, %c0_21, %c0_22] : memref<9x1x256xf32, #tpu.memory_space<vmem>>, vector<1x1x256xf32>
    %34 = vector.shape_cast %33 : vector<1x1x256xf32> to vector<1x256xf32>
    %35 = vector.broadcast %34 : vector<1x256xf32> to vector<32x256xf32>
    %36 = arith.mulf %35, %30 : vector<32x256xf32>
    %37 = vector.broadcast %32 : vector<32x1xf32> to vector<32x256xf32>
    %38 = arith.mulf %37, %36 : vector<32x256xf32>
    %39 = arith.addf %29, %38 : vector<32x256xf32>
    %c1_i32 = arith.constant 1 : i32
    %40 = tpu.dynamic_rotate %8 by %c1_i32 dim 1 : vector<32x256xf32>, i32 -> vector<32x256xf32>
    %c3 = arith.constant 3 : index
    %c0_23 = arith.constant 0 : index
    %c0_24 = arith.constant 0 : index
    %41 = vector.load %arg3[%c3, %c0_23, %c0_24] : memref<9x32x1xf32, #tpu.memory_space<vmem>>, vector<1x32x1xf32>
    %42 = vector.shape_cast %41 : vector<1x32x1xf32> to vector<32x1xf32>
    %c3_25 = arith.constant 3 : index
    %c0_26 = arith.constant 0 : index
    %c0_27 = arith.constant 0 : index
    %43 = vector.load %arg5[%c3_25, %c0_26, %c0_27] : memref<9x1x256xf32, #tpu.memory_space<vmem>>, vector<1x1x256xf32>
    %44 = vector.shape_cast %43 : vector<1x1x256xf32> to vector<1x256xf32>
    %45 = vector.broadcast %44 : vector<1x256xf32> to vector<32x256xf32>
    %46 = arith.mulf %45, %40 : vector<32x256xf32>
    %47 = vector.broadcast %42 : vector<32x1xf32> to vector<32x256xf32>
    %48 = arith.mulf %47, %46 : vector<32x256xf32>
    %49 = arith.addf %39, %48 : vector<32x256xf32>
    %c4 = arith.constant 4 : index
    %c0_28 = arith.constant 0 : index
    %c0_29 = arith.constant 0 : index
    %50 = vector.load %arg3[%c4, %c0_28, %c0_29] : memref<9x32x1xf32, #tpu.memory_space<vmem>>, vector<1x32x1xf32>
    %51 = vector.shape_cast %50 : vector<1x32x1xf32> to vector<32x1xf32>
    %c4_30 = arith.constant 4 : index
    %c0_31 = arith.constant 0 : index
    %c0_32 = arith.constant 0 : index
    %52 = vector.load %arg5[%c4_30, %c0_31, %c0_32] : memref<9x1x256xf32, #tpu.memory_space<vmem>>, vector<1x1x256xf32>
    %53 = vector.shape_cast %52 : vector<1x1x256xf32> to vector<1x256xf32>
    %54 = vector.broadcast %53 : vector<1x256xf32> to vector<32x256xf32>
    %55 = arith.mulf %54, %8 : vector<32x256xf32>
    %56 = vector.broadcast %51 : vector<32x1xf32> to vector<32x256xf32>
    %57 = arith.mulf %56, %55 : vector<32x256xf32>
    %58 = arith.addf %49, %57 : vector<32x256xf32>
    %c255_i32 = arith.constant 255 : i32
    %59 = tpu.dynamic_rotate %8 by %c255_i32 dim 1 : vector<32x256xf32>, i32 -> vector<32x256xf32>
    %c5 = arith.constant 5 : index
    %c0_33 = arith.constant 0 : index
    %c0_34 = arith.constant 0 : index
    %60 = vector.load %arg3[%c5, %c0_33, %c0_34] : memref<9x32x1xf32, #tpu.memory_space<vmem>>, vector<1x32x1xf32>
    %61 = vector.shape_cast %60 : vector<1x32x1xf32> to vector<32x1xf32>
    %c5_35 = arith.constant 5 : index
    %c0_36 = arith.constant 0 : index
    %c0_37 = arith.constant 0 : index
    %62 = vector.load %arg5[%c5_35, %c0_36, %c0_37] : memref<9x1x256xf32, #tpu.memory_space<vmem>>, vector<1x1x256xf32>
    %63 = vector.shape_cast %62 : vector<1x1x256xf32> to vector<1x256xf32>
    %64 = vector.broadcast %63 : vector<1x256xf32> to vector<32x256xf32>
    %65 = arith.mulf %64, %59 : vector<32x256xf32>
    %66 = vector.broadcast %61 : vector<32x1xf32> to vector<32x256xf32>
    %67 = arith.mulf %66, %65 : vector<32x256xf32>
    %68 = arith.addf %58, %67 : vector<32x256xf32>
    %c241_i32 = arith.constant 241 : i32
    %69 = tpu.dynamic_rotate %8 by %c241_i32 dim 1 : vector<32x256xf32>, i32 -> vector<32x256xf32>
    %c6 = arith.constant 6 : index
    %c0_38 = arith.constant 0 : index
    %c0_39 = arith.constant 0 : index
    %70 = vector.load %arg3[%c6, %c0_38, %c0_39] : memref<9x32x1xf32, #tpu.memory_space<vmem>>, vector<1x32x1xf32>
    %71 = vector.shape_cast %70 : vector<1x32x1xf32> to vector<32x1xf32>
    %c6_40 = arith.constant 6 : index
    %c0_41 = arith.constant 0 : index
    %c0_42 = arith.constant 0 : index
    %72 = vector.load %arg5[%c6_40, %c0_41, %c0_42] : memref<9x1x256xf32, #tpu.memory_space<vmem>>, vector<1x1x256xf32>
    %73 = vector.shape_cast %72 : vector<1x1x256xf32> to vector<1x256xf32>
    %74 = vector.broadcast %73 : vector<1x256xf32> to vector<32x256xf32>
    %75 = arith.mulf %74, %69 : vector<32x256xf32>
    %76 = vector.broadcast %71 : vector<32x1xf32> to vector<32x256xf32>
    %77 = arith.mulf %76, %75 : vector<32x256xf32>
    %78 = arith.addf %68, %77 : vector<32x256xf32>
    %c240_i32 = arith.constant 240 : i32
    %79 = tpu.dynamic_rotate %8 by %c240_i32 dim 1 : vector<32x256xf32>, i32 -> vector<32x256xf32>
    %c7 = arith.constant 7 : index
    %c0_43 = arith.constant 0 : index
    %c0_44 = arith.constant 0 : index
    %80 = vector.load %arg3[%c7, %c0_43, %c0_44] : memref<9x32x1xf32, #tpu.memory_space<vmem>>, vector<1x32x1xf32>
    %81 = vector.shape_cast %80 : vector<1x32x1xf32> to vector<32x1xf32>
    %c7_45 = arith.constant 7 : index
    %c0_46 = arith.constant 0 : index
    %c0_47 = arith.constant 0 : index
    %82 = vector.load %arg5[%c7_45, %c0_46, %c0_47] : memref<9x1x256xf32, #tpu.memory_space<vmem>>, vector<1x1x256xf32>
    %83 = vector.shape_cast %82 : vector<1x1x256xf32> to vector<1x256xf32>
    %84 = vector.broadcast %83 : vector<1x256xf32> to vector<32x256xf32>
    %85 = arith.mulf %84, %79 : vector<32x256xf32>
    %86 = vector.broadcast %81 : vector<32x1xf32> to vector<32x256xf32>
    %87 = arith.mulf %86, %85 : vector<32x256xf32>
    %88 = arith.addf %78, %87 : vector<32x256xf32>
    %c239_i32 = arith.constant 239 : i32
    %89 = tpu.dynamic_rotate %8 by %c239_i32 dim 1 : vector<32x256xf32>, i32 -> vector<32x256xf32>
    %c8 = arith.constant 8 : index
    %c0_48 = arith.constant 0 : index
    %c0_49 = arith.constant 0 : index
    %90 = vector.load %arg3[%c8, %c0_48, %c0_49] : memref<9x32x1xf32, #tpu.memory_space<vmem>>, vector<1x32x1xf32>
    %91 = vector.shape_cast %90 : vector<1x32x1xf32> to vector<32x1xf32>
    %c8_50 = arith.constant 8 : index
    %c0_51 = arith.constant 0 : index
    %c0_52 = arith.constant 0 : index
    %92 = vector.load %arg5[%c8_50, %c0_51, %c0_52] : memref<9x1x256xf32, #tpu.memory_space<vmem>>, vector<1x1x256xf32>
    %93 = vector.shape_cast %92 : vector<1x1x256xf32> to vector<1x256xf32>
    %94 = vector.broadcast %93 : vector<1x256xf32> to vector<32x256xf32>
    %95 = arith.mulf %94, %89 : vector<32x256xf32>
    %96 = vector.broadcast %91 : vector<32x1xf32> to vector<32x256xf32>
    %97 = arith.mulf %96, %95 : vector<32x256xf32>
    %98 = arith.addf %88, %97 : vector<32x256xf32>
    %c0_53 = arith.constant 0 : index
    %c0_54 = arith.constant 0 : index
    %99 = vector.load %arg4[%c0_53, %c0_54] : memref<32x1xf32, #tpu.memory_space<vmem>>, vector<32x1xf32>
    %100 = vector.broadcast %99 : vector<32x1xf32> to vector<32x256xf32>
    %101 = arith.addf %98, %100 : vector<32x256xf32>
    %cst_55 = arith.constant 0.000000e+00 : f32
    %cst_56 = arith.constant 6.000000e+00 : f32
    %102 = vector.broadcast %cst_55 : f32 to vector<32x256xf32>
    %103 = arith.maximumf %102, %101 : vector<32x256xf32>
    %104 = vector.broadcast %cst_56 : f32 to vector<32x256xf32>
    %105 = arith.minimumf %104, %103 : vector<32x256xf32>
    %c0_57 = arith.constant 0 : index
    %c0_58 = arith.constant 0 : index
    %106 = vector.load %arg6[%c0_57, %c0_58] : memref<32x32xbf16, #tpu.memory_space<vmem>>, vector<32x32xbf16>
    %107 = arith.truncf %105 : vector<32x256xf32> to vector<32x256xbf16>
    %cst_59 = arith.constant dense<0.000000e+00> : vector<32x256xf32>
    %108 = tpu.matmul %106, %107, %cst_59 {dimension_numbers = #tpu.dot_dimension_numbers<[1], [0], [0], [1], [0, 0, 1, 1], [], []>} : vector<32x32xbf16>, vector<32x256xbf16>, vector<32x256xf32> -> vector<32x256xf32>
    %c0_60 = arith.constant 0 : index
    %c0_61 = arith.constant 0 : index
    %109 = vector.load %arg7[%c0_60, %c0_61] : memref<32x1xf32, #tpu.memory_space<vmem>>, vector<32x1xf32>
    %110 = vector.broadcast %109 : vector<32x1xf32> to vector<32x256xf32>
    %111 = arith.addf %108, %110 : vector<32x256xf32>
    %cst_62 = arith.constant 0.000000e+00 : f32
    %112 = vector.broadcast %cst_62 : f32 to vector<32x256xf32>
    %113 = arith.maximumf %111, %112 : vector<32x256xf32>
    %c0_63 = arith.constant 0 : index
    %c0_64 = arith.constant 0 : index
    %114 = vector.load %arg8[%c0_63, %c0_64] : memref<32x32xbf16, #tpu.memory_space<vmem>>, vector<32x32xbf16>
    %115 = arith.truncf %113 : vector<32x256xf32> to vector<32x256xbf16>
    %cst_65 = arith.constant dense<0.000000e+00> : vector<32x256xf32>
    %116 = tpu.matmul %114, %115, %cst_65 {dimension_numbers = #tpu.dot_dimension_numbers<[1], [0], [0], [1], [0, 0, 1, 1], [], []>} : vector<32x32xbf16>, vector<32x256xbf16>, vector<32x256xf32> -> vector<32x256xf32>
    %c0_66 = arith.constant 0 : index
    %c0_67 = arith.constant 0 : index
    %117 = vector.load %arg9[%c0_66, %c0_67] : memref<32x1xf32, #tpu.memory_space<vmem>>, vector<32x1xf32>
    %118 = vector.broadcast %117 : vector<32x1xf32> to vector<32x256xf32>
    %119 = arith.addf %116, %118 : vector<32x256xf32>
    %c0_68 = arith.constant 0 : index
    %c0_69 = arith.constant 0 : index
    %120 = vector.load %arg10[%c0_68, %c0_69] : memref<32x2xf32, #tpu.memory_space<vmem>>, vector<32x2xf32>
    %c0_70 = arith.constant 0 : index
    %c0_71 = arith.constant 0 : index
    %121 = vector.load %arg11[%c0_70, %c0_71] : memref<32x2xf32, #tpu.memory_space<vmem>>, vector<32x2xf32>
    %cst_72 = arith.constant dense<0.000000e+00> : vector<32xf32>
    %122 = vector.multi_reduction <add>, %119, %cst_72 [1] : vector<32x256xf32> to vector<32xf32>
    %123 = vector.shape_cast %122 : vector<32xf32> to vector<32x1xf32>
    %cst_73 = arith.constant 2.560000e+02 : f32
    %124 = vector.broadcast %cst_73 : f32 to vector<32x1xf32>
    %125 = arith.divf %123, %124 : vector<32x1xf32>
    %cst_74 = arith.constant dense<0xFF800000> : vector<32xf32>
    %126 = vector.multi_reduction <maximumf>, %119, %cst_74 [1] : vector<32x256xf32> to vector<32xf32>
    %127 = vector.shape_cast %126 : vector<32xf32> to vector<32x1xf32>
    %128 = vector.broadcast %125 : vector<32x1xf32> to vector<32x2xf32>
    %129 = arith.mulf %120, %128 : vector<32x2xf32>
    %cst_75 = arith.constant dense<0.000000e+00> : vector<2xf32>
    %130 = vector.multi_reduction <add>, %129, %cst_75 [0] : vector<32x2xf32> to vector<2xf32>
    %131 = vector.shape_cast %130 : vector<2xf32> to vector<1x2xf32>
    %cst_76 = arith.constant 0.000000e+00 : f32
    %132 = vector.broadcast %cst_76 : f32 to vector<1x2xf32>
    %133 = arith.maximumf %131, %132 : vector<1x2xf32>
    %134 = vector.broadcast %127 : vector<32x1xf32> to vector<32x2xf32>
    %135 = arith.mulf %120, %134 : vector<32x2xf32>
    %cst_77 = arith.constant dense<0.000000e+00> : vector<2xf32>
    %136 = vector.multi_reduction <add>, %135, %cst_77 [0] : vector<32x2xf32> to vector<2xf32>
    %137 = vector.shape_cast %136 : vector<2xf32> to vector<1x2xf32>
    %cst_78 = arith.constant 0.000000e+00 : f32
    %138 = vector.broadcast %cst_78 : f32 to vector<1x2xf32>
    %139 = arith.maximumf %137, %138 : vector<1x2xf32>
    %140 = vector.broadcast %133 : vector<1x2xf32> to vector<32x2xf32>
    %141 = arith.mulf %121, %140 : vector<32x2xf32>
    %cst_79 = arith.constant dense<0.000000e+00> : vector<32xf32>
    %142 = vector.multi_reduction <add>, %141, %cst_79 [1] : vector<32x2xf32> to vector<32xf32>
    %143 = vector.shape_cast %142 : vector<32xf32> to vector<32x1xf32>
    %144 = vector.broadcast %139 : vector<1x2xf32> to vector<32x2xf32>
    %145 = arith.mulf %121, %144 : vector<32x2xf32>
    %cst_80 = arith.constant dense<0.000000e+00> : vector<32xf32>
    %146 = vector.multi_reduction <add>, %145, %cst_80 [1] : vector<32x2xf32> to vector<32xf32>
    %147 = vector.shape_cast %146 : vector<32xf32> to vector<32x1xf32>
    %148 = arith.addf %143, %147 : vector<32x1xf32>
    %149 = arith.negf %148 : vector<32x1xf32>
    %150 = math.exp %149 : vector<32x1xf32>
    %cst_81 = arith.constant 1.000000e+00 : f32
    %151 = vector.broadcast %cst_81 : f32 to vector<32x1xf32>
    %152 = arith.addf %151, %150 : vector<32x1xf32>
    %153 = arith.divf %151, %152 : vector<32x1xf32>
    %154 = vector.broadcast %153 : vector<32x1xf32> to vector<32x256xf32>
    %155 = arith.mulf %119, %154 : vector<32x256xf32>
    %cst_82 = arith.constant dense<0.000000e+00> : vector<256xf32>
    %156 = vector.multi_reduction <add>, %155, %cst_82 [0] : vector<32x256xf32> to vector<256xf32>
    %157 = vector.shape_cast %156 : vector<256xf32> to vector<1x256xf32>
    %cst_83 = arith.constant 3.200000e+01 : f32
    %158 = vector.broadcast %cst_83 : f32 to vector<1x256xf32>
    %159 = arith.divf %157, %158 : vector<1x256xf32>
    %cst_84 = arith.constant dense<0xFF800000> : vector<256xf32>
    %160 = vector.multi_reduction <maximumf>, %155, %cst_84 [0] : vector<32x256xf32> to vector<256xf32>
    %161 = vector.shape_cast %160 : vector<256xf32> to vector<1x256xf32>
    %162 = tpu.iota {dimensions = array<i32: 0>} : vector<2x256xi32>
    %c0_i32 = arith.constant 0 : i32
    %163 = vector.broadcast %c0_i32 : i32 to vector<2x256xi32>
    %164 = arith.cmpi eq, %162, %163 : vector<2x256xi32>
    %165 = vector.shape_cast %159 : vector<1x256xf32> to vector<1x256xf32>
    %166 = vector.broadcast %165 : vector<1x256xf32> to vector<2x256xf32>
    %167 = vector.shape_cast %161 : vector<1x256xf32> to vector<1x256xf32>
    %168 = vector.broadcast %167 : vector<1x256xf32> to vector<2x256xf32>
    %169 = arith.select %164, %166, %168 : vector<2x256xi1>, vector<2x256xf32>
    %cst_85 = arith.constant 0.000000e+00 : f32
    %170 = vector.broadcast %cst_85 : f32 to vector<2x256xf32>
    %c51_i32 = arith.constant 51 : i32
    %171 = tpu.dynamic_rotate %169 by %c51_i32 dim 1 : vector<2x256xf32>, i32 -> vector<2x256xf32>
    %c0_86 = arith.constant 0 : index
    %c0_87 = arith.constant 0 : index
    %c0_88 = arith.constant 0 : index
    %172 = vector.load %arg12[%c0_86, %c0_87, %c0_88] : memref<49x2x256xf32, #tpu.memory_space<vmem>>, vector<1x2x256xf32>
    %173 = vector.shape_cast %172 : vector<1x2x256xf32> to vector<2x256xf32>
    %174 = arith.mulf %173, %171 : vector<2x256xf32>
    %175 = arith.addf %170, %174 : vector<2x256xf32>
    %c50_i32 = arith.constant 50 : i32
    %176 = tpu.dynamic_rotate %169 by %c50_i32 dim 1 : vector<2x256xf32>, i32 -> vector<2x256xf32>
    %c1_89 = arith.constant 1 : index
    %c0_90 = arith.constant 0 : index
    %c0_91 = arith.constant 0 : index
    %177 = vector.load %arg12[%c1_89, %c0_90, %c0_91] : memref<49x2x256xf32, #tpu.memory_space<vmem>>, vector<1x2x256xf32>
    %178 = vector.shape_cast %177 : vector<1x2x256xf32> to vector<2x256xf32>
    %179 = arith.mulf %178, %176 : vector<2x256xf32>
    %180 = arith.addf %175, %179 : vector<2x256xf32>
    %c49_i32 = arith.constant 49 : i32
    %181 = tpu.dynamic_rotate %169 by %c49_i32 dim 1 : vector<2x256xf32>, i32 -> vector<2x256xf32>
    %c2_92 = arith.constant 2 : index
    %c0_93 = arith.constant 0 : index
    %c0_94 = arith.constant 0 : index
    %182 = vector.load %arg12[%c2_92, %c0_93, %c0_94] : memref<49x2x256xf32, #tpu.memory_space<vmem>>, vector<1x2x256xf32>
    %183 = vector.shape_cast %182 : vector<1x2x256xf32> to vector<2x256xf32>
    %184 = arith.mulf %183, %181 : vector<2x256xf32>
    %185 = arith.addf %180, %184 : vector<2x256xf32>
    %c48_i32 = arith.constant 48 : i32
    %186 = tpu.dynamic_rotate %169 by %c48_i32 dim 1 : vector<2x256xf32>, i32 -> vector<2x256xf32>
    %c3_95 = arith.constant 3 : index
    %c0_96 = arith.constant 0 : index
    %c0_97 = arith.constant 0 : index
    %187 = vector.load %arg12[%c3_95, %c0_96, %c0_97] : memref<49x2x256xf32, #tpu.memory_space<vmem>>, vector<1x2x256xf32>
    %188 = vector.shape_cast %187 : vector<1x2x256xf32> to vector<2x256xf32>
    %189 = arith.mulf %188, %186 : vector<2x256xf32>
    %190 = arith.addf %185, %189 : vector<2x256xf32>
    %c47_i32 = arith.constant 47 : i32
    %191 = tpu.dynamic_rotate %169 by %c47_i32 dim 1 : vector<2x256xf32>, i32 -> vector<2x256xf32>
    %c4_98 = arith.constant 4 : index
    %c0_99 = arith.constant 0 : index
    %c0_100 = arith.constant 0 : index
    %192 = vector.load %arg12[%c4_98, %c0_99, %c0_100] : memref<49x2x256xf32, #tpu.memory_space<vmem>>, vector<1x2x256xf32>
    %193 = vector.shape_cast %192 : vector<1x2x256xf32> to vector<2x256xf32>
    %194 = arith.mulf %193, %191 : vector<2x256xf32>
    %195 = arith.addf %190, %194 : vector<2x256xf32>
    %c46_i32 = arith.constant 46 : i32
    %196 = tpu.dynamic_rotate %169 by %c46_i32 dim 1 : vector<2x256xf32>, i32 -> vector<2x256xf32>
    %c5_101 = arith.constant 5 : index
    %c0_102 = arith.constant 0 : index
    %c0_103 = arith.constant 0 : index
    %197 = vector.load %arg12[%c5_101, %c0_102, %c0_103] : memref<49x2x256xf32, #tpu.memory_space<vmem>>, vector<1x2x256xf32>
    %198 = vector.shape_cast %197 : vector<1x2x256xf32> to vector<2x256xf32>
    %199 = arith.mulf %198, %196 : vector<2x256xf32>
    %200 = arith.addf %195, %199 : vector<2x256xf32>
    %c45_i32 = arith.constant 45 : i32
    %201 = tpu.dynamic_rotate %169 by %c45_i32 dim 1 : vector<2x256xf32>, i32 -> vector<2x256xf32>
    %c6_104 = arith.constant 6 : index
    %c0_105 = arith.constant 0 : index
    %c0_106 = arith.constant 0 : index
    %202 = vector.load %arg12[%c6_104, %c0_105, %c0_106] : memref<49x2x256xf32, #tpu.memory_space<vmem>>, vector<1x2x256xf32>
    %203 = vector.shape_cast %202 : vector<1x2x256xf32> to vector<2x256xf32>
    %204 = arith.mulf %203, %201 : vector<2x256xf32>
    %205 = arith.addf %200, %204 : vector<2x256xf32>
    %c35_i32 = arith.constant 35 : i32
    %206 = tpu.dynamic_rotate %169 by %c35_i32 dim 1 : vector<2x256xf32>, i32 -> vector<2x256xf32>
    %c7_107 = arith.constant 7 : index
    %c0_108 = arith.constant 0 : index
    %c0_109 = arith.constant 0 : index
    %207 = vector.load %arg12[%c7_107, %c0_108, %c0_109] : memref<49x2x256xf32, #tpu.memory_space<vmem>>, vector<1x2x256xf32>
    %208 = vector.shape_cast %207 : vector<1x2x256xf32> to vector<2x256xf32>
    %209 = arith.mulf %208, %206 : vector<2x256xf32>
    %210 = arith.addf %205, %209 : vector<2x256xf32>
    %c34_i32 = arith.constant 34 : i32
    %211 = tpu.dynamic_rotate %169 by %c34_i32 dim 1 : vector<2x256xf32>, i32 -> vector<2x256xf32>
    %c8_110 = arith.constant 8 : index
    %c0_111 = arith.constant 0 : index
    %c0_112 = arith.constant 0 : index
    %212 = vector.load %arg12[%c8_110, %c0_111, %c0_112] : memref<49x2x256xf32, #tpu.memory_space<vmem>>, vector<1x2x256xf32>
    %213 = vector.shape_cast %212 : vector<1x2x256xf32> to vector<2x256xf32>
    %214 = arith.mulf %213, %211 : vector<2x256xf32>
    %215 = arith.addf %210, %214 : vector<2x256xf32>
    %c33_i32 = arith.constant 33 : i32
    %216 = tpu.dynamic_rotate %169 by %c33_i32 dim 1 : vector<2x256xf32>, i32 -> vector<2x256xf32>
    %c9 = arith.constant 9 : index
    %c0_113 = arith.constant 0 : index
    %c0_114 = arith.constant 0 : index
    %217 = vector.load %arg12[%c9, %c0_113, %c0_114] : memref<49x2x256xf32, #tpu.memory_space<vmem>>, vector<1x2x256xf32>
    %218 = vector.shape_cast %217 : vector<1x2x256xf32> to vector<2x256xf32>
    %219 = arith.mulf %218, %216 : vector<2x256xf32>
    %220 = arith.addf %215, %219 : vector<2x256xf32>
    %c32_i32 = arith.constant 32 : i32
    %221 = tpu.dynamic_rotate %169 by %c32_i32 dim 1 : vector<2x256xf32>, i32 -> vector<2x256xf32>
    %c10 = arith.constant 10 : index
    %c0_115 = arith.constant 0 : index
    %c0_116 = arith.constant 0 : index
    %222 = vector.load %arg12[%c10, %c0_115, %c0_116] : memref<49x2x256xf32, #tpu.memory_space<vmem>>, vector<1x2x256xf32>
    %223 = vector.shape_cast %222 : vector<1x2x256xf32> to vector<2x256xf32>
    %224 = arith.mulf %223, %221 : vector<2x256xf32>
    %225 = arith.addf %220, %224 : vector<2x256xf32>
    %c31_i32 = arith.constant 31 : i32
    %226 = tpu.dynamic_rotate %169 by %c31_i32 dim 1 : vector<2x256xf32>, i32 -> vector<2x256xf32>
    %c11 = arith.constant 11 : index
    %c0_117 = arith.constant 0 : index
    %c0_118 = arith.constant 0 : index
    %227 = vector.load %arg12[%c11, %c0_117, %c0_118] : memref<49x2x256xf32, #tpu.memory_space<vmem>>, vector<1x2x256xf32>
    %228 = vector.shape_cast %227 : vector<1x2x256xf32> to vector<2x256xf32>
    %229 = arith.mulf %228, %226 : vector<2x256xf32>
    %230 = arith.addf %225, %229 : vector<2x256xf32>
    %c30_i32 = arith.constant 30 : i32
    %231 = tpu.dynamic_rotate %169 by %c30_i32 dim 1 : vector<2x256xf32>, i32 -> vector<2x256xf32>
    %c12 = arith.constant 12 : index
    %c0_119 = arith.constant 0 : index
    %c0_120 = arith.constant 0 : index
    %232 = vector.load %arg12[%c12, %c0_119, %c0_120] : memref<49x2x256xf32, #tpu.memory_space<vmem>>, vector<1x2x256xf32>
    %233 = vector.shape_cast %232 : vector<1x2x256xf32> to vector<2x256xf32>
    %234 = arith.mulf %233, %231 : vector<2x256xf32>
    %235 = arith.addf %230, %234 : vector<2x256xf32>
    %c29_i32 = arith.constant 29 : i32
    %236 = tpu.dynamic_rotate %169 by %c29_i32 dim 1 : vector<2x256xf32>, i32 -> vector<2x256xf32>
    %c13 = arith.constant 13 : index
    %c0_121 = arith.constant 0 : index
    %c0_122 = arith.constant 0 : index
    %237 = vector.load %arg12[%c13, %c0_121, %c0_122] : memref<49x2x256xf32, #tpu.memory_space<vmem>>, vector<1x2x256xf32>
    %238 = vector.shape_cast %237 : vector<1x2x256xf32> to vector<2x256xf32>
    %239 = arith.mulf %238, %236 : vector<2x256xf32>
    %240 = arith.addf %235, %239 : vector<2x256xf32>
    %c19_i32 = arith.constant 19 : i32
    %241 = tpu.dynamic_rotate %169 by %c19_i32 dim 1 : vector<2x256xf32>, i32 -> vector<2x256xf32>
    %c14 = arith.constant 14 : index
    %c0_123 = arith.constant 0 : index
    %c0_124 = arith.constant 0 : index
    %242 = vector.load %arg12[%c14, %c0_123, %c0_124] : memref<49x2x256xf32, #tpu.memory_space<vmem>>, vector<1x2x256xf32>
    %243 = vector.shape_cast %242 : vector<1x2x256xf32> to vector<2x256xf32>
    %244 = arith.mulf %243, %241 : vector<2x256xf32>
    %245 = arith.addf %240, %244 : vector<2x256xf32>
    %c18_i32 = arith.constant 18 : i32
    %246 = tpu.dynamic_rotate %169 by %c18_i32 dim 1 : vector<2x256xf32>, i32 -> vector<2x256xf32>
    %c15 = arith.constant 15 : index
    %c0_125 = arith.constant 0 : index
    %c0_126 = arith.constant 0 : index
    %247 = vector.load %arg12[%c15, %c0_125, %c0_126] : memref<49x2x256xf32, #tpu.memory_space<vmem>>, vector<1x2x256xf32>
    %248 = vector.shape_cast %247 : vector<1x2x256xf32> to vector<2x256xf32>
    %249 = arith.mulf %248, %246 : vector<2x256xf32>
    %250 = arith.addf %245, %249 : vector<2x256xf32>
    %c17_i32_127 = arith.constant 17 : i32
    %251 = tpu.dynamic_rotate %169 by %c17_i32_127 dim 1 : vector<2x256xf32>, i32 -> vector<2x256xf32>
    %c16 = arith.constant 16 : index
    %c0_128 = arith.constant 0 : index
    %c0_129 = arith.constant 0 : index
    %252 = vector.load %arg12[%c16, %c0_128, %c0_129] : memref<49x2x256xf32, #tpu.memory_space<vmem>>, vector<1x2x256xf32>
    %253 = vector.shape_cast %252 : vector<1x2x256xf32> to vector<2x256xf32>
    %254 = arith.mulf %253, %251 : vector<2x256xf32>
    %255 = arith.addf %250, %254 : vector<2x256xf32>
    %c16_i32_130 = arith.constant 16 : i32
    %256 = tpu.dynamic_rotate %169 by %c16_i32_130 dim 1 : vector<2x256xf32>, i32 -> vector<2x256xf32>
    %c17 = arith.constant 17 : index
    %c0_131 = arith.constant 0 : index
    %c0_132 = arith.constant 0 : index
    %257 = vector.load %arg12[%c17, %c0_131, %c0_132] : memref<49x2x256xf32, #tpu.memory_space<vmem>>, vector<1x2x256xf32>
    %258 = vector.shape_cast %257 : vector<1x2x256xf32> to vector<2x256xf32>
    %259 = arith.mulf %258, %256 : vector<2x256xf32>
    %260 = arith.addf %255, %259 : vector<2x256xf32>
    %c15_i32_133 = arith.constant 15 : i32
    %261 = tpu.dynamic_rotate %169 by %c15_i32_133 dim 1 : vector<2x256xf32>, i32 -> vector<2x256xf32>
    %c18 = arith.constant 18 : index
    %c0_134 = arith.constant 0 : index
    %c0_135 = arith.constant 0 : index
    %262 = vector.load %arg12[%c18, %c0_134, %c0_135] : memref<49x2x256xf32, #tpu.memory_space<vmem>>, vector<1x2x256xf32>
    %263 = vector.shape_cast %262 : vector<1x2x256xf32> to vector<2x256xf32>
    %264 = arith.mulf %263, %261 : vector<2x256xf32>
    %265 = arith.addf %260, %264 : vector<2x256xf32>
    %c14_i32 = arith.constant 14 : i32
    %266 = tpu.dynamic_rotate %169 by %c14_i32 dim 1 : vector<2x256xf32>, i32 -> vector<2x256xf32>
    %c19 = arith.constant 19 : index
    %c0_136 = arith.constant 0 : index
    %c0_137 = arith.constant 0 : index
    %267 = vector.load %arg12[%c19, %c0_136, %c0_137] : memref<49x2x256xf32, #tpu.memory_space<vmem>>, vector<1x2x256xf32>
    %268 = vector.shape_cast %267 : vector<1x2x256xf32> to vector<2x256xf32>
    %269 = arith.mulf %268, %266 : vector<2x256xf32>
    %270 = arith.addf %265, %269 : vector<2x256xf32>
    %c13_i32 = arith.constant 13 : i32
    %271 = tpu.dynamic_rotate %169 by %c13_i32 dim 1 : vector<2x256xf32>, i32 -> vector<2x256xf32>
    %c20 = arith.constant 20 : index
    %c0_138 = arith.constant 0 : index
    %c0_139 = arith.constant 0 : index
    %272 = vector.load %arg12[%c20, %c0_138, %c0_139] : memref<49x2x256xf32, #tpu.memory_space<vmem>>, vector<1x2x256xf32>
    %273 = vector.shape_cast %272 : vector<1x2x256xf32> to vector<2x256xf32>
    %274 = arith.mulf %273, %271 : vector<2x256xf32>
    %275 = arith.addf %270, %274 : vector<2x256xf32>
    %c3_i32 = arith.constant 3 : i32
    %276 = tpu.dynamic_rotate %169 by %c3_i32 dim 1 : vector<2x256xf32>, i32 -> vector<2x256xf32>
    %c21 = arith.constant 21 : index
    %c0_140 = arith.constant 0 : index
    %c0_141 = arith.constant 0 : index
    %277 = vector.load %arg12[%c21, %c0_140, %c0_141] : memref<49x2x256xf32, #tpu.memory_space<vmem>>, vector<1x2x256xf32>
    %278 = vector.shape_cast %277 : vector<1x2x256xf32> to vector<2x256xf32>
    %279 = arith.mulf %278, %276 : vector<2x256xf32>
    %280 = arith.addf %275, %279 : vector<2x256xf32>
    %c2_i32 = arith.constant 2 : i32
    %281 = tpu.dynamic_rotate %169 by %c2_i32 dim 1 : vector<2x256xf32>, i32 -> vector<2x256xf32>
    %c22 = arith.constant 22 : index
    %c0_142 = arith.constant 0 : index
    %c0_143 = arith.constant 0 : index
    %282 = vector.load %arg12[%c22, %c0_142, %c0_143] : memref<49x2x256xf32, #tpu.memory_space<vmem>>, vector<1x2x256xf32>
    %283 = vector.shape_cast %282 : vector<1x2x256xf32> to vector<2x256xf32>
    %284 = arith.mulf %283, %281 : vector<2x256xf32>
    %285 = arith.addf %280, %284 : vector<2x256xf32>
    %c1_i32_144 = arith.constant 1 : i32
    %286 = tpu.dynamic_rotate %169 by %c1_i32_144 dim 1 : vector<2x256xf32>, i32 -> vector<2x256xf32>
    %c23 = arith.constant 23 : index
    %c0_145 = arith.constant 0 : index
    %c0_146 = arith.constant 0 : index
    %287 = vector.load %arg12[%c23, %c0_145, %c0_146] : memref<49x2x256xf32, #tpu.memory_space<vmem>>, vector<1x2x256xf32>
    %288 = vector.shape_cast %287 : vector<1x2x256xf32> to vector<2x256xf32>
    %289 = arith.mulf %288, %286 : vector<2x256xf32>
    %290 = arith.addf %285, %289 : vector<2x256xf32>
    %c24 = arith.constant 24 : index
    %c0_147 = arith.constant 0 : index
    %c0_148 = arith.constant 0 : index
    %291 = vector.load %arg12[%c24, %c0_147, %c0_148] : memref<49x2x256xf32, #tpu.memory_space<vmem>>, vector<1x2x256xf32>
    %292 = vector.shape_cast %291 : vector<1x2x256xf32> to vector<2x256xf32>
    %293 = arith.mulf %292, %169 : vector<2x256xf32>
    %294 = arith.addf %290, %293 : vector<2x256xf32>
    %c255_i32_149 = arith.constant 255 : i32
    %295 = tpu.dynamic_rotate %169 by %c255_i32_149 dim 1 : vector<2x256xf32>, i32 -> vector<2x256xf32>
    %c25 = arith.constant 25 : index
    %c0_150 = arith.constant 0 : index
    %c0_151 = arith.constant 0 : index
    %296 = vector.load %arg12[%c25, %c0_150, %c0_151] : memref<49x2x256xf32, #tpu.memory_space<vmem>>, vector<1x2x256xf32>
    %297 = vector.shape_cast %296 : vector<1x2x256xf32> to vector<2x256xf32>
    %298 = arith.mulf %297, %295 : vector<2x256xf32>
    %299 = arith.addf %294, %298 : vector<2x256xf32>
    %c254_i32 = arith.constant 254 : i32
    %300 = tpu.dynamic_rotate %169 by %c254_i32 dim 1 : vector<2x256xf32>, i32 -> vector<2x256xf32>
    %c26 = arith.constant 26 : index
    %c0_152 = arith.constant 0 : index
    %c0_153 = arith.constant 0 : index
    %301 = vector.load %arg12[%c26, %c0_152, %c0_153] : memref<49x2x256xf32, #tpu.memory_space<vmem>>, vector<1x2x256xf32>
    %302 = vector.shape_cast %301 : vector<1x2x256xf32> to vector<2x256xf32>
    %303 = arith.mulf %302, %300 : vector<2x256xf32>
    %304 = arith.addf %299, %303 : vector<2x256xf32>
    %c253_i32 = arith.constant 253 : i32
    %305 = tpu.dynamic_rotate %169 by %c253_i32 dim 1 : vector<2x256xf32>, i32 -> vector<2x256xf32>
    %c27 = arith.constant 27 : index
    %c0_154 = arith.constant 0 : index
    %c0_155 = arith.constant 0 : index
    %306 = vector.load %arg12[%c27, %c0_154, %c0_155] : memref<49x2x256xf32, #tpu.memory_space<vmem>>, vector<1x2x256xf32>
    %307 = vector.shape_cast %306 : vector<1x2x256xf32> to vector<2x256xf32>
    %308 = arith.mulf %307, %305 : vector<2x256xf32>
    %309 = arith.addf %304, %308 : vector<2x256xf32>
    %c243_i32 = arith.constant 243 : i32
    %310 = tpu.dynamic_rotate %169 by %c243_i32 dim 1 : vector<2x256xf32>, i32 -> vector<2x256xf32>
    %c28 = arith.constant 28 : index
    %c0_156 = arith.constant 0 : index
    %c0_157 = arith.constant 0 : index
    %311 = vector.load %arg12[%c28, %c0_156, %c0_157] : memref<49x2x256xf32, #tpu.memory_space<vmem>>, vector<1x2x256xf32>
    %312 = vector.shape_cast %311 : vector<1x2x256xf32> to vector<2x256xf32>
    %313 = arith.mulf %312, %310 : vector<2x256xf32>
    %314 = arith.addf %309, %313 : vector<2x256xf32>
    %c242_i32 = arith.constant 242 : i32
    %315 = tpu.dynamic_rotate %169 by %c242_i32 dim 1 : vector<2x256xf32>, i32 -> vector<2x256xf32>
    %c29 = arith.constant 29 : index
    %c0_158 = arith.constant 0 : index
    %c0_159 = arith.constant 0 : index
    %316 = vector.load %arg12[%c29, %c0_158, %c0_159] : memref<49x2x256xf32, #tpu.memory_space<vmem>>, vector<1x2x256xf32>
    %317 = vector.shape_cast %316 : vector<1x2x256xf32> to vector<2x256xf32>
    %318 = arith.mulf %317, %315 : vector<2x256xf32>
    %319 = arith.addf %314, %318 : vector<2x256xf32>
    %c241_i32_160 = arith.constant 241 : i32
    %320 = tpu.dynamic_rotate %169 by %c241_i32_160 dim 1 : vector<2x256xf32>, i32 -> vector<2x256xf32>
    %c30 = arith.constant 30 : index
    %c0_161 = arith.constant 0 : index
    %c0_162 = arith.constant 0 : index
    %321 = vector.load %arg12[%c30, %c0_161, %c0_162] : memref<49x2x256xf32, #tpu.memory_space<vmem>>, vector<1x2x256xf32>
    %322 = vector.shape_cast %321 : vector<1x2x256xf32> to vector<2x256xf32>
    %323 = arith.mulf %322, %320 : vector<2x256xf32>
    %324 = arith.addf %319, %323 : vector<2x256xf32>
    %c240_i32_163 = arith.constant 240 : i32
    %325 = tpu.dynamic_rotate %169 by %c240_i32_163 dim 1 : vector<2x256xf32>, i32 -> vector<2x256xf32>
    %c31 = arith.constant 31 : index
    %c0_164 = arith.constant 0 : index
    %c0_165 = arith.constant 0 : index
    %326 = vector.load %arg12[%c31, %c0_164, %c0_165] : memref<49x2x256xf32, #tpu.memory_space<vmem>>, vector<1x2x256xf32>
    %327 = vector.shape_cast %326 : vector<1x2x256xf32> to vector<2x256xf32>
    %328 = arith.mulf %327, %325 : vector<2x256xf32>
    %329 = arith.addf %324, %328 : vector<2x256xf32>
    %c239_i32_166 = arith.constant 239 : i32
    %330 = tpu.dynamic_rotate %169 by %c239_i32_166 dim 1 : vector<2x256xf32>, i32 -> vector<2x256xf32>
    %c32 = arith.constant 32 : index
    %c0_167 = arith.constant 0 : index
    %c0_168 = arith.constant 0 : index
    %331 = vector.load %arg12[%c32, %c0_167, %c0_168] : memref<49x2x256xf32, #tpu.memory_space<vmem>>, vector<1x2x256xf32>
    %332 = vector.shape_cast %331 : vector<1x2x256xf32> to vector<2x256xf32>
    %333 = arith.mulf %332, %330 : vector<2x256xf32>
    %334 = arith.addf %329, %333 : vector<2x256xf32>
    %c238_i32 = arith.constant 238 : i32
    %335 = tpu.dynamic_rotate %169 by %c238_i32 dim 1 : vector<2x256xf32>, i32 -> vector<2x256xf32>
    %c33 = arith.constant 33 : index
    %c0_169 = arith.constant 0 : index
    %c0_170 = arith.constant 0 : index
    %336 = vector.load %arg12[%c33, %c0_169, %c0_170] : memref<49x2x256xf32, #tpu.memory_space<vmem>>, vector<1x2x256xf32>
    %337 = vector.shape_cast %336 : vector<1x2x256xf32> to vector<2x256xf32>
    %338 = arith.mulf %337, %335 : vector<2x256xf32>
    %339 = arith.addf %334, %338 : vector<2x256xf32>
    %c237_i32 = arith.constant 237 : i32
    %340 = tpu.dynamic_rotate %169 by %c237_i32 dim 1 : vector<2x256xf32>, i32 -> vector<2x256xf32>
    %c34 = arith.constant 34 : index
    %c0_171 = arith.constant 0 : index
    %c0_172 = arith.constant 0 : index
    %341 = vector.load %arg12[%c34, %c0_171, %c0_172] : memref<49x2x256xf32, #tpu.memory_space<vmem>>, vector<1x2x256xf32>
    %342 = vector.shape_cast %341 : vector<1x2x256xf32> to vector<2x256xf32>
    %343 = arith.mulf %342, %340 : vector<2x256xf32>
    %344 = arith.addf %339, %343 : vector<2x256xf32>
    %c227_i32 = arith.constant 227 : i32
    %345 = tpu.dynamic_rotate %169 by %c227_i32 dim 1 : vector<2x256xf32>, i32 -> vector<2x256xf32>
    %c35 = arith.constant 35 : index
    %c0_173 = arith.constant 0 : index
    %c0_174 = arith.constant 0 : index
    %346 = vector.load %arg12[%c35, %c0_173, %c0_174] : memref<49x2x256xf32, #tpu.memory_space<vmem>>, vector<1x2x256xf32>
    %347 = vector.shape_cast %346 : vector<1x2x256xf32> to vector<2x256xf32>
    %348 = arith.mulf %347, %345 : vector<2x256xf32>
    %349 = arith.addf %344, %348 : vector<2x256xf32>
    %c226_i32 = arith.constant 226 : i32
    %350 = tpu.dynamic_rotate %169 by %c226_i32 dim 1 : vector<2x256xf32>, i32 -> vector<2x256xf32>
    %c36 = arith.constant 36 : index
    %c0_175 = arith.constant 0 : index
    %c0_176 = arith.constant 0 : index
    %351 = vector.load %arg12[%c36, %c0_175, %c0_176] : memref<49x2x256xf32, #tpu.memory_space<vmem>>, vector<1x2x256xf32>
    %352 = vector.shape_cast %351 : vector<1x2x256xf32> to vector<2x256xf32>
    %353 = arith.mulf %352, %350 : vector<2x256xf32>
    %354 = arith.addf %349, %353 : vector<2x256xf32>
    %c225_i32 = arith.constant 225 : i32
    %355 = tpu.dynamic_rotate %169 by %c225_i32 dim 1 : vector<2x256xf32>, i32 -> vector<2x256xf32>
    %c37 = arith.constant 37 : index
    %c0_177 = arith.constant 0 : index
    %c0_178 = arith.constant 0 : index
    %356 = vector.load %arg12[%c37, %c0_177, %c0_178] : memref<49x2x256xf32, #tpu.memory_space<vmem>>, vector<1x2x256xf32>
    %357 = vector.shape_cast %356 : vector<1x2x256xf32> to vector<2x256xf32>
    %358 = arith.mulf %357, %355 : vector<2x256xf32>
    %359 = arith.addf %354, %358 : vector<2x256xf32>
    %c224_i32 = arith.constant 224 : i32
    %360 = tpu.dynamic_rotate %169 by %c224_i32 dim 1 : vector<2x256xf32>, i32 -> vector<2x256xf32>
    %c38 = arith.constant 38 : index
    %c0_179 = arith.constant 0 : index
    %c0_180 = arith.constant 0 : index
    %361 = vector.load %arg12[%c38, %c0_179, %c0_180] : memref<49x2x256xf32, #tpu.memory_space<vmem>>, vector<1x2x256xf32>
    %362 = vector.shape_cast %361 : vector<1x2x256xf32> to vector<2x256xf32>
    %363 = arith.mulf %362, %360 : vector<2x256xf32>
    %364 = arith.addf %359, %363 : vector<2x256xf32>
    %c223_i32 = arith.constant 223 : i32
    %365 = tpu.dynamic_rotate %169 by %c223_i32 dim 1 : vector<2x256xf32>, i32 -> vector<2x256xf32>
    %c39 = arith.constant 39 : index
    %c0_181 = arith.constant 0 : index
    %c0_182 = arith.constant 0 : index
    %366 = vector.load %arg12[%c39, %c0_181, %c0_182] : memref<49x2x256xf32, #tpu.memory_space<vmem>>, vector<1x2x256xf32>
    %367 = vector.shape_cast %366 : vector<1x2x256xf32> to vector<2x256xf32>
    %368 = arith.mulf %367, %365 : vector<2x256xf32>
    %369 = arith.addf %364, %368 : vector<2x256xf32>
    %c222_i32 = arith.constant 222 : i32
    %370 = tpu.dynamic_rotate %169 by %c222_i32 dim 1 : vector<2x256xf32>, i32 -> vector<2x256xf32>
    %c40 = arith.constant 40 : index
    %c0_183 = arith.constant 0 : index
    %c0_184 = arith.constant 0 : index
    %371 = vector.load %arg12[%c40, %c0_183, %c0_184] : memref<49x2x256xf32, #tpu.memory_space<vmem>>, vector<1x2x256xf32>
    %372 = vector.shape_cast %371 : vector<1x2x256xf32> to vector<2x256xf32>
    %373 = arith.mulf %372, %370 : vector<2x256xf32>
    %374 = arith.addf %369, %373 : vector<2x256xf32>
    %c221_i32 = arith.constant 221 : i32
    %375 = tpu.dynamic_rotate %169 by %c221_i32 dim 1 : vector<2x256xf32>, i32 -> vector<2x256xf32>
    %c41 = arith.constant 41 : index
    %c0_185 = arith.constant 0 : index
    %c0_186 = arith.constant 0 : index
    %376 = vector.load %arg12[%c41, %c0_185, %c0_186] : memref<49x2x256xf32, #tpu.memory_space<vmem>>, vector<1x2x256xf32>
    %377 = vector.shape_cast %376 : vector<1x2x256xf32> to vector<2x256xf32>
    %378 = arith.mulf %377, %375 : vector<2x256xf32>
    %379 = arith.addf %374, %378 : vector<2x256xf32>
    %c211_i32 = arith.constant 211 : i32
    %380 = tpu.dynamic_rotate %169 by %c211_i32 dim 1 : vector<2x256xf32>, i32 -> vector<2x256xf32>
    %c42 = arith.constant 42 : index
    %c0_187 = arith.constant 0 : index
    %c0_188 = arith.constant 0 : index
    %381 = vector.load %arg12[%c42, %c0_187, %c0_188] : memref<49x2x256xf32, #tpu.memory_space<vmem>>, vector<1x2x256xf32>
    %382 = vector.shape_cast %381 : vector<1x2x256xf32> to vector<2x256xf32>
    %383 = arith.mulf %382, %380 : vector<2x256xf32>
    %384 = arith.addf %379, %383 : vector<2x256xf32>
    %c210_i32 = arith.constant 210 : i32
    %385 = tpu.dynamic_rotate %169 by %c210_i32 dim 1 : vector<2x256xf32>, i32 -> vector<2x256xf32>
    %c43 = arith.constant 43 : index
    %c0_189 = arith.constant 0 : index
    %c0_190 = arith.constant 0 : index
    %386 = vector.load %arg12[%c43, %c0_189, %c0_190] : memref<49x2x256xf32, #tpu.memory_space<vmem>>, vector<1x2x256xf32>
    %387 = vector.shape_cast %386 : vector<1x2x256xf32> to vector<2x256xf32>
    %388 = arith.mulf %387, %385 : vector<2x256xf32>
    %389 = arith.addf %384, %388 : vector<2x256xf32>
    %c209_i32 = arith.constant 209 : i32
    %390 = tpu.dynamic_rotate %169 by %c209_i32 dim 1 : vector<2x256xf32>, i32 -> vector<2x256xf32>
    %c44 = arith.constant 44 : index
    %c0_191 = arith.constant 0 : index
    %c0_192 = arith.constant 0 : index
    %391 = vector.load %arg12[%c44, %c0_191, %c0_192] : memref<49x2x256xf32, #tpu.memory_space<vmem>>, vector<1x2x256xf32>
    %392 = vector.shape_cast %391 : vector<1x2x256xf32> to vector<2x256xf32>
    %393 = arith.mulf %392, %390 : vector<2x256xf32>
    %394 = arith.addf %389, %393 : vector<2x256xf32>
    %c208_i32 = arith.constant 208 : i32
    %395 = tpu.dynamic_rotate %169 by %c208_i32 dim 1 : vector<2x256xf32>, i32 -> vector<2x256xf32>
    %c45 = arith.constant 45 : index
    %c0_193 = arith.constant 0 : index
    %c0_194 = arith.constant 0 : index
    %396 = vector.load %arg12[%c45, %c0_193, %c0_194] : memref<49x2x256xf32, #tpu.memory_space<vmem>>, vector<1x2x256xf32>
    %397 = vector.shape_cast %396 : vector<1x2x256xf32> to vector<2x256xf32>
    %398 = arith.mulf %397, %395 : vector<2x256xf32>
    %399 = arith.addf %394, %398 : vector<2x256xf32>
    %c207_i32 = arith.constant 207 : i32
    %400 = tpu.dynamic_rotate %169 by %c207_i32 dim 1 : vector<2x256xf32>, i32 -> vector<2x256xf32>
    %c46 = arith.constant 46 : index
    %c0_195 = arith.constant 0 : index
    %c0_196 = arith.constant 0 : index
    %401 = vector.load %arg12[%c46, %c0_195, %c0_196] : memref<49x2x256xf32, #tpu.memory_space<vmem>>, vector<1x2x256xf32>
    %402 = vector.shape_cast %401 : vector<1x2x256xf32> to vector<2x256xf32>
    %403 = arith.mulf %402, %400 : vector<2x256xf32>
    %404 = arith.addf %399, %403 : vector<2x256xf32>
    %c206_i32 = arith.constant 206 : i32
    %405 = tpu.dynamic_rotate %169 by %c206_i32 dim 1 : vector<2x256xf32>, i32 -> vector<2x256xf32>
    %c47 = arith.constant 47 : index
    %c0_197 = arith.constant 0 : index
    %c0_198 = arith.constant 0 : index
    %406 = vector.load %arg12[%c47, %c0_197, %c0_198] : memref<49x2x256xf32, #tpu.memory_space<vmem>>, vector<1x2x256xf32>
    %407 = vector.shape_cast %406 : vector<1x2x256xf32> to vector<2x256xf32>
    %408 = arith.mulf %407, %405 : vector<2x256xf32>
    %409 = arith.addf %404, %408 : vector<2x256xf32>
    %c205_i32 = arith.constant 205 : i32
    %410 = tpu.dynamic_rotate %169 by %c205_i32 dim 1 : vector<2x256xf32>, i32 -> vector<2x256xf32>
    %c48 = arith.constant 48 : index
    %c0_199 = arith.constant 0 : index
    %c0_200 = arith.constant 0 : index
    %411 = vector.load %arg12[%c48, %c0_199, %c0_200] : memref<49x2x256xf32, #tpu.memory_space<vmem>>, vector<1x2x256xf32>
    %412 = vector.shape_cast %411 : vector<1x2x256xf32> to vector<2x256xf32>
    %413 = arith.mulf %412, %410 : vector<2x256xf32>
    %414 = arith.addf %409, %413 : vector<2x256xf32>
    %415 = vector.extract_strided_slice %414 {offsets = [0, 0], sizes = [1, 256], strides = [1, 1]} : vector<2x256xf32> to vector<1x256xf32>
    %416 = vector.extract_strided_slice %414 {offsets = [1, 0], sizes = [1, 256], strides = [1, 1]} : vector<2x256xf32> to vector<1x256xf32>
    %417 = arith.addf %415, %416 : vector<1x256xf32>
    %418 = arith.negf %417 : vector<1x256xf32>
    %419 = math.exp %418 : vector<1x256xf32>
    %cst_201 = arith.constant 1.000000e+00 : f32
    %420 = vector.broadcast %cst_201 : f32 to vector<1x256xf32>
    %421 = arith.addf %420, %419 : vector<1x256xf32>
    %422 = arith.divf %420, %421 : vector<1x256xf32>
    %423 = vector.broadcast %422 : vector<1x256xf32> to vector<32x256xf32>
    %424 = arith.mulf %155, %423 : vector<32x256xf32>
    %425 = arith.addf %424, %0 : vector<32x256xf32>
    %cst_202 = arith.constant 0.000000e+00 : f32
    %426 = vector.broadcast %cst_202 : f32 to vector<32x256xf32>
    %427 = arith.maximumf %425, %426 : vector<32x256xf32>
    %c0_203 = arith.constant 0 : index
    %c0_204 = arith.constant 0 : index
    %428 = vector.load %arg14[%c0_203, %c0_204] : memref<32x256xf32, #tpu.memory_space<vmem>>, vector<32x256xf32>
    tpu.vector_store %arg14[%c0_203, %c0_204], %427 {strides = array<i32>} : memref<32x256xf32, #tpu.memory_space<vmem>>, vector<32x256xf32>,
    return
  }
  func.func @transform_0(%arg0: i32) -> (i32, i32) {
    %c0_i32 = arith.constant 0 : i32
    %c0_i32_0 = arith.constant 0 : i32
    %c0_i32_1 = arith.constant 0 : i32
    return %c0_i32, %c0_i32_0 : i32, i32
  }
  func.func @transform_1(%arg0: i32) -> (i32, i32) {
    %c0_i32 = arith.constant 0 : i32
    %c0_i32_0 = arith.constant 0 : i32
    %c0_i32_1 = arith.constant 0 : i32
    return %c0_i32, %c0_i32_0 : i32, i32
  }
  func.func @transform_2(%arg0: i32) -> (i32, i32, i32) {
    %c0_i32 = arith.constant 0 : i32
    %c0_i32_0 = arith.constant 0 : i32
    %c0_i32_1 = arith.constant 0 : i32
    %c0_i32_2 = arith.constant 0 : i32
    return %c0_i32, %c0_i32_0, %c0_i32_1 : i32, i32, i32
  }
  func.func @transform_3(%arg0: i32) -> (i32, i32) {
    %c0_i32 = arith.constant 0 : i32
    %c0_i32_0 = arith.constant 0 : i32
    %c0_i32_1 = arith.constant 0 : i32
    return %c0_i32, %c0_i32_0 : i32, i32
  }
  func.func @transform_4(%arg0: i32) -> (i32, i32, i32) {
    %c0_i32 = arith.constant 0 : i32
    %c0_i32_0 = arith.constant 0 : i32
    %c0_i32_1 = arith.constant 0 : i32
    %c0_i32_2 = arith.constant 0 : i32
    return %c0_i32, %c0_i32_0, %c0_i32_1 : i32, i32, i32
  }
  func.func @transform_5(%arg0: i32) -> (i32, i32) {
    %c0_i32 = arith.constant 0 : i32
    %c0_i32_0 = arith.constant 0 : i32
    %c0_i32_1 = arith.constant 0 : i32
    return %c0_i32, %c0_i32_0 : i32, i32
  }
  func.func @transform_6(%arg0: i32) -> (i32, i32) {
    %c0_i32 = arith.constant 0 : i32
    %c0_i32_0 = arith.constant 0 : i32
    %c0_i32_1 = arith.constant 0 : i32
    return %c0_i32, %c0_i32_0 : i32, i32
  }
  func.func @transform_7(%arg0: i32) -> (i32, i32) {
    %c0_i32 = arith.constant 0 : i32
    %c0_i32_0 = arith.constant 0 : i32
    %c0_i32_1 = arith.constant 0 : i32
    return %c0_i32, %c0_i32_0 : i32, i32
  }
  func.func @transform_8(%arg0: i32) -> (i32, i32) {
    %c0_i32 = arith.constant 0 : i32
    %c0_i32_0 = arith.constant 0 : i32
    %c0_i32_1 = arith.constant 0 : i32
    return %c0_i32, %c0_i32_0 : i32, i32
  }
  func.func @transform_9(%arg0: i32) -> (i32, i32) {
    %c0_i32 = arith.constant 0 : i32
    %c0_i32_0 = arith.constant 0 : i32
    %c0_i32_1 = arith.constant 0 : i32
    return %c0_i32, %c0_i32_0 : i32, i32
  }
  func.func @transform_10(%arg0: i32) -> (i32, i32) {
    %c0_i32 = arith.constant 0 : i32
    %c0_i32_0 = arith.constant 0 : i32
    %c0_i32_1 = arith.constant 0 : i32
    return %c0_i32, %c0_i32_0 : i32, i32
  }
  func.func @transform_11(%arg0: i32) -> (i32, i32, i32) {
    %c0_i32 = arith.constant 0 : i32
    %c0_i32_0 = arith.constant 0 : i32
    %c0_i32_1 = arith.constant 0 : i32
    %c0_i32_2 = arith.constant 0 : i32
    return %c0_i32, %c0_i32_0, %c0_i32_1 : i32, i32, i32
  }
  func.func @transform_12(%arg0: i32) -> (i32, i32) {
    %c0_i32 = arith.constant 0 : i32
    %c0_i32_0 = arith.constant 0 : i32
    return %c0_i32, %arg0 : i32, i32
  }
  func.func @transform_13(%arg0: i32) -> (i32, i32) {
    %c0_i32 = arith.constant 0 : i32
    %c0_i32_0 = arith.constant 0 : i32
    return %c0_i32, %arg0 : i32, i32
  }
}

</mosaic_0001>

<bundles_post_ra>
// kernel: mul.48
= control target key start
LH: loop header
LB: loop body
LE: loop exit
PB: predicated region body
PF: predicated region fallthrough
CT: control target
= control target key end

     0   :  { %s7_s6 = smov 3  ;;  %s21_s9 = smov 3  ;;  %vm4_vm0 = vcmask 56320   ;;  %vm11_vm1 = vcmask 400720   ;;  %vm18_vm2 = vcmask 343320   ;;  %vm25_vm3 = vcmask 285920   ;;  %s106_s0 = inlined_call_operand.vmem [shape: f32[1,2,7,7], index: 0, kind: input, shape index: {}]   ;;  %s107_s1 = inlined_call_operand.vmem [shape: f32[2,49], index: 1, kind: output, shape index: {}]  }
   0x1   :  { %v54_v0 = vld [vmem:[%s106_s0 + $0x6] ss:$8 sm:%s7_s6]   ;;  %s66_s10 = smov 42   ;;  %v56_v1 = vld [vmem:[%s106_s0 + $0x4] ss:$8 sm:%s21_s9]   ;;  %s67_s13 = smov 28  }
   0x2   :  { %9 = vrot.lane.b32.xlu0 %v54_v0, %s66_s10  ;;  %23 = vrot.lane.b32.xlu1 %v56_v1, %s67_s13  ;;  %s14_s14 = smov 3  ;;  %s35_s15 = smov 3  ;;  %vm32_vm4 = vcmask 228520   ;;  %vm39_vm5 = vcmask 171120   ;;  %vm46_vm6 = vcmask 113720  }
   0x3   :  { %s28_s16 = smov 3  ;;  %v58_v2 = vld [vmem:[%s106_s0 + $0x2] ss:$8 sm:%s35_s15]   ;;  %s68_s19 = smov 14   ;;  %v55_v3 = vld [vmem:[%s106_s0 + $0x5] ss:$8 sm:%s14_s14]  }
   0x4   :  { %37 = vrot.lane.b32.xlu2 %v58_v2, %s68_s19  ;;  %v57_v4 = vld [vmem:[%s106_s0 + $0x3] ss:$8 sm:%s28_s16]   ;;  %s42_s24 = smov 3  ;;  %s69_s25 = smov 35  }
   0x5   :  { %s70_s26 = smov 21   ;;  %v59_v5 = vld [vmem:[%s106_s0 + $0x1] ss:$8 sm:%s42_s24]   ;;  %s71_s29 = smov 7  }
   0x6   :  { %s2_s30 = smov 3 }
   0x7   :  { %v3_v6 = vld [vmem:[%s106_s0] ss:$8 sm:%s2_s30]  }
   0x8   :  { %5 = vst.msk [vmem:[#allocation0] sm:$0x3] %vm4_vm0, %v3_v6  }
   0xa   :  { %16 = vrot.lane.b32.xlu0 %v55_v3, %s69_s25  ;;  %30 = vrot.lane.b32.xlu1 %v57_v4, %s70_s26 }
   0xc   :  { %44 = vrot.lane.b32.xlu2 %v59_v5, %s71_s29 }
  0x5e   :  { %v38_v7 = vpop.permute.xlu2 %37  }
  0x66   :  { %v45_v8 = vpop.permute.xlu2 %44  }
  0x74   :  { %v10_v9 = vpop.permute.xlu0 %9   ;;  %v24_v10 = vpop.permute.xlu1 %23  }
  0x75   :  { %12 = vst.msk [vmem:[#allocation0] sm:$0x3] %vm11_vm1, %v10_v9  }
  0x7c   :  { %v17_v11 = vpop.permute.xlu0 %16   ;;  %v31_v12 = vpop.permute.xlu1 %30  }
  0x7d   :  { %19 = vst.msk [vmem:[#allocation0] sm:$0x3] %vm18_vm2, %v17_v11  }
  0x7e   :  { %26 = vst.msk [vmem:[#allocation0] sm:$0x3] %vm25_vm3, %v24_v10  }
  0x7f   :  { %33 = vst.msk [vmem:[#allocation0] sm:$0x3] %vm32_vm4, %v31_v12  }
  0x80   :  { %40 = vst.msk [vmem:[#allocation0] sm:$0x3] %vm39_vm5, %v38_v7  }
  0x81   :  { %47 = vst.msk [vmem:[#allocation0] sm:$0x3] %vm46_vm6, %v45_v8  }
  0x88   :  { %v50_v13 = vld [vmem:[#allocation0] sm:$0x3] }
  0x89   :  { %53 = vst [vmem:[%s107_s1] sm:$0x3] %v50_v13 }

// kernel: bottleneck_forward.1
= control target key start
LH: loop header
LB: loop body
LE: loop exit
PB: predicated region body
PF: predicated region fallthrough
CT: control target
= control target key end

     0   :  { %s3098_s25 = smov 0   ;;  %s3100_s26 = smov 0   ;;  %s4853_s0 = inlined_call_operand.vmem [shape: bf16[32,32], index: 0, kind: input, shape index: {}]   ;;  %s4854_s1 = inlined_call_operand.vmem [shape: f32[32,1], index: 1, kind: input, shape index: {}]   ;;  %s4855_s2 = inlined_call_operand.vmem [shape: f32[9,32,1], index: 2, kind: input, shape index: {}]   ;;  %s4856_s3 = inlined_call_operand.vmem [shape: f32[32,1], index: 3, kind: input, shape index: {}]   ;;  %s4857_s4 = inlined_call_operand.vmem [shape: f32[9,1,256], index: 4, kind: input, shape index: {}]   ;;  %s4858_s5 = inlined_call_operand.vmem [shape: bf16[32,32], index: 5, kind: input, shape index: {}]   ;;  %s4859_s6 = inlined_call_operand.vmem [shape: f32[32,1], index: 6, kind: input, shape index: {}]   ;;  %s4860_s7 = inlined_call_operand.vmem [shape: bf16[32,32], index: 7, kind: input, shape index: {}]   ;;  %s4861_s8 = inlined_call_operand.vmem [shape: f32[32,1], index: 8, kind: input, shape index: {}]   ;;  %s4862_s9 = inlined_call_operand.vmem [shape: f32[32,2], index: 9, kind: input, shape index: {}]   ;;  %s4863_s10 = inlined_call_operand.vmem [shape: f32[32,2], index: 10, kind: input, shape index: {}]   ;;  %s4864_s11 = inlined_call_operand.vmem [shape: f32[49,2,256], index: 11, kind: input, shape index: {}]   ;;  %s4865_s12 = inlined_call_operand.vmem [shape: f32[32,512], index: 12, kind: input, shape index: {}]   ;;  %s4866_s13 = inlined_call_operand.vmem [shape: f32[32,512], index: 13, kind: output, shape index: {}]  }
   0x1   :  { %s3102_s27 = smov 0  }
   0x2 LB: > { %s4867_s28 = sadd.s32 4294967295, %s2975_s27   ;;  %s3115_s29 = sadd.s32 1, %s2975_s27   ;;  %s2975_s27 = sphi %s3102_s27, %s5036_s27   ;;  %s2971_s26 = sphi %s3100_s26, %s5035_s26   ;;  %s2967_s25 = sphi %s3098_s25, %s5034_s25  }
   0x3   : > { %s279_s30 = ssub.s32 %s2975_s27, %s3115_s29  ;;  %s282_s14 = sadd.s32 1, %s2971_s26 }
   0x4   : > { %p280_p0 = scmp.eq.s32.totalorder %s279_s30, 0  ;;  %p289_p1 = scmp.ne.s32.totalorder %s2971_s26, %s2967_s25 }
   0x5   : > { %p290_p2 = scmp.eq.s32.totalorder %s2975_s27, 0  ;;  %p319_p3 = scmp.eq.s32.totalorder %s4867_s28, 1 }
   0x6   : > { %s3126_s15 = scalar_select %p280_p0, %s2971_s26, %s282_s14  }
   0x7   : > { %p291_p4 = por %p290_p2, %p289_p1  ;;  %p3128_p5 = por %p319_p3, %p289_p1 }
   0x8   : > { %p2689_p6 = scmp.ge.s32.totalorder %s2975_s27, 2 }
   0xa   : > { %377 = sbr.rel (%p2689_p6) target bundleno = 27 (0x1b), region = 64 }
   0xf   : > { %380 = sbr.rel (!%p291_p4) target bundleno = 27 (0x1b), region = 68  ;;  %s382_s17 = sand.u32 (%p291_p4), 1, %s2971_s26  }
  0x10   : > { %s2831_s18 = sshll.u32 (%p291_p4), %s2975_s27, 4  ;;  %s2690_s19 = sshll.u32 (%p291_p4), %s382_s17, 6 }
  0x11   : > { %s387_s22 = scalar_lea.vmem (%p291_p4), %s4865_s12, %s2831_s18  ;;  %s384_s23 = scalar_lea.vmem (%p291_p4), [#allocation2], %s2690_s19 }
  0x12   : > { %v400_v0 = vld [vmem:[%s387_s22] sm:$0xff] (%p291_p4)  ;;  %v402_v1 = vld [vmem:[%s387_s22 + $0x8] sm:$0xff] (%p291_p4) }
  0x13   : > { %v404_v2 = vld [vmem:[%s387_s22 + $0x20] sm:$0xff] (%p291_p4)  ;;  %401 = vst [vmem:[%s384_s23] sm:$0xff] (%p291_p4), %v400_v0  ;;  %v406_v3 = vld [vmem:[%s387_s22 + $0x28] sm:$0xff] (%p291_p4) }
  0x14   : > { %403 = vst [vmem:[%s384_s23 + $0x8] sm:$0xff] %v402_v1  ;;  %v408_v4 = vld [vmem:[%s387_s22 + $0x40] sm:$0xff]  ;;  %v410_v5 = vld [vmem:[%s387_s22 + $0x48] sm:$0xff] }
  0x15   : > { %405 = vst [vmem:[%s384_s23 + $0x10] sm:$0xff] %v404_v2  ;;  %v412_v6 = vld [vmem:[%s387_s22 + $0x60] sm:$0xff]  ;;  %v414_v7 = vld [vmem:[%s387_s22 + $0x68] sm:$0xff] }
  0x16   : > { %407 = vst [vmem:[%s384_s23 + $0x18] sm:$0xff] %v406_v3 }
  0x17   : > { %409 = vst [vmem:[%s384_s23 + $0x20] sm:$0xff] %v408_v4 }
  0x18   : > { %411 = vst [vmem:[%s384_s23 + $0x28] sm:$0xff] %v410_v5 }
  0x19   : > { %413 = vst [vmem:[%s384_s23 + $0x30] sm:$0xff] %v412_v6 }
  0x1a   : > { %415 = vst [vmem:[%s384_s23 + $0x38] sm:$0xff] %v414_v7 }
  0x1b PF: > { %p2693_p7 = scmp.ge.s32.totalorder %s2975_s27, 1  ;;  %p420_p8 = scmp.lt.s32.totalorder %s2975_s27, 3 }
  0x1d   : > { %p421_p9 = pnand %p2693_p7, %p420_p8 }
  0x1f   : > { %424 = sbr.rel (%p421_p9) target bundleno = 1620 (0x654), region = 91 }
  0x24   : > { %v490_v8 = vld [vmem:[%s4854_s1 + $0x10] sm:$0xff]  ;;  %v488_v9 = vld [vmem:[%s4854_s1] sm:$0xff]  ;;  %s427_s18 = sand.u32 1, %s2967_s25   ;;  %v2977_v10 = vmov 0   ;;  %v491_v21 = vld [vmem:[%s4854_s1 + $0x18] sm:$0xff]  ;;  %vm522_vm0 = vcmask 261120  }
  0x25   : > { %2919 = vset.pattern.permute.xlu1 %v2977_v10  ;;  %2918 = vset.pattern.permute.xlu0 %v2977_v10  ;;  %s3147_s19 = sshll.u32 %s427_s18, 6  ;;  %v489_v22 = vld [vmem:[%s4854_s1 + $0x8] sm:$0xff]  ;;  %v2832_v25 = vld [vmem:[%s4853_s0] sm:$0xff]  ;;  %v605_v30 = vld [vmem:[%s4855_s2 + $0x18] sm:$0xff]  ;;  %s4874_s28 = smov 16   ;;  %vm1554_vm10 = vcmask 15360  }
  0x26   : > { %504 = vperm.xlu1 %2919, %v490_v8   ;;  %494 = vperm.xlu0 %2918, %v488_v9   ;;  %s3150_s20 = scalar_lea.vmem [#allocation2], %s3147_s19  ;;  %v2833_v26 = vld [vmem:[%s4853_s0 + $0x8] sm:$0xff]  ;;  %v602_v28 = vld [vmem:[%s4855_s2] sm:$0xff]  ;;  %v2716_v31 = vld [vmem:[%s4855_s2 + $0x58] sm:$0xff]  ;;  %s4876_s22 = smov 17  }
  0x27   : > { %v476_v11 = vld [vmem:[%s3150_s20 + $0x20] sm:$0xff]  ;;  %v478_v12 = vld [vmem:[%s3150_s20 + $0x30] sm:$0xff]  ;;  %v477_v13 = vld [vmem:[%s3150_s20 + $0x28] sm:$0xff]  ;;  %2920 = vset.pattern.permute.xlu2 %v2977_v10  ;;  %s4872_s23 = smov 15   ;;  %s4870_s24 = smov 1  }
  0x28   : > { %v486_v14 = vpack.c.bf16 %v478_v12, %v476_v11  ;;  %v479_v15 = vld [vmem:[%s3150_s20 + $0x38] sm:$0xff]  ;;  %v472_v16 = vld [vmem:[%s3150_s20] sm:$0xff]  ;;  %v474_v17 = vld [vmem:[%s3150_s20 + $0x10] sm:$0xff]  ;;  %s4878_s30 = smov 127   ;;  %s4868_s14 = smov 113  }
  0x29   : > { %v487_v18 = vpack.c.bf16 %v479_v15, %v477_v13  ;;  %v473_v19 = vld [vmem:[%s3150_s20 + $0x8] sm:$0xff]  ;;  %v475_v20 = vld [vmem:[%s3150_s20 + $0x18] sm:$0xff]  ;;  %v484_v23 = vpack.c.bf16 %v474_v17, %v472_v16  ;;  %v2708_v32 = vld [vmem:[%s4855_s2 + $0x20] sm:$0xff]  ;;  %s2988_s18 = smov 51   ;;  %s2990_s25 = smov 49  }
  0x2a   : > { %535 = vmatpush.bf16.msra.mxu0 %v486_v14  ;;  %2839 = vmatpush.bf16.msra.mxu2 %v486_v14  ;;  %v485_v24 = vpack.c.bf16 %v475_v20, %v473_v19  ;;  %v603_v27 = vld [vmem:[%s4855_s2 + $0x8] sm:$0xff]  ;;  %v604_v33 = vld [vmem:[%s4855_s2 + $0x10] sm:$0xff]  ;;  %v2721_v34 = vld [vmem:[%s4855_s2 + $0x78] sm:$0xff]  ;;  %s2994_s21 = smov 45   ;;  %s2995_s17 = smov 35  }
  0x2b   : > { %554 = vmatpush.bf16.msra.mxu1 %v487_v18  ;;  %2841 = vmatpush.bf16.msra.mxu3 %v487_v18  ;;  %v2709_v29 = vld [vmem:[%s4855_s2 + $0x28] sm:$0xff]  ;;  %v2711_v35 = vld [vmem:[%s4855_s2 + $0x38] sm:$0xff]  ;;  %v2710_v36 = vld [vmem:[%s4855_s2 + $0x30] sm:$0xff] }
  0x2c   : > { %632 = vperm.xlu2 %2920, %v604_v33   ;;  %v2713_v37 = vld [vmem:[%s4855_s2 + $0x40] sm:$0xff]  ;;  %v2715_v38 = vld [vmem:[%s4855_s2 + $0x50] sm:$0xff]  ;;  %v2726_v39 = vld [vmem:[%s4855_s2 + $0x98] sm:$0xff] }
  0x2d   : > { %v2720_v40 = vld [vmem:[%s4855_s2 + $0x70] sm:$0xff]  ;;  %v2714_v42 = vld [vmem:[%s4855_s2 + $0x48] sm:$0xff]  ;;  %v2718_v19 = vld [vmem:[%s4855_s2 + $0x60] sm:$0xff] }
  0x2e   : > { %509 = vperm.xlu1 %2919, %v491_v21   ;;  %499 = vperm.xlu0 %2918, %v489_v22   ;;  %v2725_v41 = vld [vmem:[%s4855_s2 + $0x90] sm:$0xff]  ;;  %v2719_v21 = vld [vmem:[%s4855_s2 + $0x68] sm:$0xff] }
  0x2f   : > { %536 = vmatpush.bf16.msra.mxu0 %v484_v23  ;;  %2840 = vmatpush.bf16.msra.mxu2 %v484_v23 }
  0x30   : > { %555 = vmatpush.bf16.msra.mxu1 %v485_v24  ;;  %2842 = vmatpush.bf16.msra.mxu3 %v485_v24  ;;  %v2731_v24 = vld [vmem:[%s4855_s2 + $0xb8] sm:$0xff] }
  0x32   : > { %2704 = vmatmul.msk.bf16.vlgmr.msra.gmra.mxu0 %vm522_vm0, %v2832_v25  ;;  %2705 = vmatmul.msk.bf16.vlgmr.msra.gmra.mxu2 %vm522_vm0, %v2833_v26 }
  0x33   : > { %2706 = vmatmul.msk.bf16.vlgmr.msra.gmra.mxu1 %vm522_vm0, %v2832_v25  ;;  %2707 = vmatmul.msk.bf16.vlgmr.msra.gmra.mxu3 %vm522_vm0, %v2833_v26 }
  0x34   : > { %713 = vperm.xlu2 %2920, %v2710_v36  }
  0x36   : > { %627 = vperm.xlu1 %2919, %v603_v27   ;;  %622 = vperm.xlu0 %2918, %v602_v28  }
  0x3c   : > { %789 = vperm.xlu2 %2920, %v2714_v42  }
  0x3e   : > { %708 = vperm.xlu1 %2919, %v2709_v29   ;;  %637 = vperm.xlu0 %2918, %v605_v30  }
  0x46   : > { %799 = vperm.xlu1 %2919, %v2716_v31   ;;  %703 = vperm.xlu0 %2918, %v2708_v32  }
  0x4e   : > { %880 = vperm.xlu1 %2919, %v2721_v34   ;;  %718 = vperm.xlu0 %2918, %v2711_v35   ;;  %v2723_v34 = vld [vmem:[%s4855_s2 + $0x80] sm:$0xff]  ;;  %v2724_v35 = vld [vmem:[%s4855_s2 + $0x88] sm:$0xff] }
  0x56   : > { %784 = vperm.xlu1 %2919, %v2713_v37   ;;  %794 = vperm.xlu0 %2918, %v2715_v38  }
  0x5e   : > { %936 = vperm.xlu1 %2919, %v2726_v39   ;;  %875 = vperm.xlu0 %2918, %v2720_v40   ;;  %v2736_v39 = vld [vmem:[%s4855_s2 + $0xd8] sm:$0xff]  ;;  %v2730_v40 = vld [vmem:[%s4855_s2 + $0xb0] sm:$0xff] }
  0x66   : > { %931 = vperm.xlu0 %2918, %v2725_v41  }
  0x86   : > { %v3290_v7 = vpop.permute.xlu2 %632 }
  0x8e   : > { %v3304_v12 = vpop.permute.xlu2 %713 }
  0x96   : > { %v3322_v16 = vpop.permute.xlu2 %789 }
  0x97   : > { %4935 = vst [vmem:[#allocation9_spill] sm:$0xff] %v3322_v16  ;;  %v2744_v16 = vld [vmem:[%s4855_s2 + $0x108] sm:$0xff] }
  0x98   : > { %v495_v43 = vpop.permute.xlu0 %494  ;;  %v505_v48 = vpop.permute.xlu1 %504 }
  0xa0   : > { %v500_v58 = vpop.permute.xlu0 %499  ;;  %v510_v62 = vpop.permute.xlu1 %509 }
  0xa8   : > { %v3274_v0 = vpop.permute.xlu0 %622  ;;  %v3280_v3 = vpop.permute.xlu1 %627 }
  0xa9   : > { %4930 = vst [vmem:[#allocation4_spill] sm:$0xff] %v3280_v3 }
  0xaf   : > { %v538_v44 = vpop.f32.mrf.mxu0 }
  0xb0   : > { %v539_v45 = vadd.f32 %v538_v44, %v495_v43  ;;  %v557_v47 = vpop.f32.mrf.mxu1  ;;  %v3286_v5 = vpop.permute.xlu0 %637 }
  0xb1   : > { %v558_v50 = vadd.f32 %v557_v47, %v495_v43  ;;  %4931 = vst [vmem:[#allocation5_spill] sm:$0xff] %v3286_v5  ;;  %v3298_v8 = vpop.permute.xlu1 %708 }
  0xb2   : > { %v3224_v46 = vmax.f32 %v539_v45, 0.0  ;;  %4932 = vst [vmem:[#allocation6_spill] sm:$0xff] %v3298_v8 }
  0xb3   : > { %v3232_v53 = vmax.f32 %v558_v50, 0.0 }
  0xb4   : > { %656 = vrot.lane.b32.xlu1 %v3224_v46, %s4874_s28  ;;  %575 = vrot.lane.b32.xlu2 %v3224_v46, %s4876_s22 }
  0xb5   : > { %v543_v49 = vpop.f32.mrf.mxu2 }
  0xb6   : > { %v544_v51 = vadd.f32 %v543_v49, %v505_v48  ;;  %v562_v54 = vpop.f32.mrf.mxu3 }
  0xb7   : > { %v563_v55 = vadd.f32 %v562_v54, %v505_v48  ;;  %v540_v61 = vpop.f32.mrf.mxu0  ;;  %v2729_v54 = vld [vmem:[%s4855_s2 + $0xa8] sm:$0xff] }
  0xb8   : > { %v3230_v52 = vmax.f32 %v544_v51, 0.0  ;;  %v559_v57 = vpop.f32.mrf.mxu1  ;;  %v541_v63 = vadd.f32 %v540_v61, %v500_v58  ;;  %v3302_v10 = vpop.permute.xlu0 %703  ;;  %v2728_v51 = vld [vmem:[%s4855_s2 + $0xa0] sm:$0xff]  ;;  %v2735_v61 = vld [vmem:[%s4855_s2 + $0xd0] sm:$0xff] }
  0xb9   : > { %v3246_v56 = vmax.f32 %v563_v55, 0.0  ;;  %v560_v59 = vadd.f32 %v559_v57, %v500_v58  ;;  %v3310_v13 = vpop.permute.xlu1 %799 }
  0xba   : > { %579 = vrot.lane.b32.xlu0 %v3230_v52, %s4876_s22  ;;  %v3276_v1 = vmax.f32 %v541_v63, 0.0  ;;  %4933 = vst [vmem:[#allocation7_spill] sm:$0xff] %v3310_v13 }
  0xbb   : > { %v3260_v60 = vmax.f32 %v560_v59, 0.0  ;;  %v2741_v59 = vld [vmem:[%s4855_s2 + $0xf8] sm:$0xff] }
  0xbc   : > { %745 = vrot.lane.b32.xlu1 %v3232_v53, %s4872_s23  ;;  %583 = vrot.lane.b32.xlu2 %v3232_v53, %s4876_s22 }
  0xbd   : > { %v545_v2 = vpop.f32.mrf.mxu2 }
  0xbe   : > { %v546_v4 = vadd.f32 %v545_v2, %v510_v62  ;;  %v564_v9 = vpop.f32.mrf.mxu3 }
  0xbf   : > { %v565_v11 = vadd.f32 %v564_v9, %v510_v62 }
  0xc0   : > { %v3288_v6 = vmax.f32 %v546_v4, 0.0  ;;  %v3320_v15 = vpop.permute.xlu0 %718 }
  0xc1   : > { %v3312_v14 = vmax.f32 %v565_v11, 0.0  ;;  %4934 = vst [vmem:[#allocation8_spill] sm:$0xff] %v3320_v15  ;;  %v3324_v17 = vpop.permute.xlu1 %880 }
  0xc2   : > { %660 = vrot.lane.b32.xlu0 %v3230_v52, %s4874_s28  ;;  %4936 = vst [vmem:[#allocation10_spill] sm:$0xff] %v3324_v17  ;;  %v2746_v17 = vld [vmem:[%s4855_s2 + $0x118] sm:$0xff] }
  0xc4   : > { %826 = vrot.lane.b32.xlu1 %v3232_v53, %s4870_s24  ;;  %664 = vrot.lane.b32.xlu2 %v3232_v53, %s4874_s28 }
  0xc8   : > { %v3337_v20 = vpop.permute.xlu0 %794 }
  0xc9   : > { %v3342_v22 = vpop.permute.xlu1 %784 }
  0xca   : > { %749 = vrot.lane.b32.xlu0 %v3246_v56, %s4872_s23 }
  0xcc   : > { %587 = vrot.lane.b32.xlu1 %v3246_v56, %s4876_s22  ;;  %737 = vrot.lane.b32.xlu2 %v3224_v46, %s4872_s23 }
  0xd0   : > { %v3351_v25 = vpop.permute.xlu0 %875 }
  0xd1   : > { %4937 = vst [vmem:[#allocation11_spill] sm:$0xff] %v3351_v25  ;;  %v3357_v26 = vpop.permute.xlu1 %936 }
  0xd2   : > { %959 = vrot.lane.b32.xlu0 %v3230_v52, %s4878_s30 }
  0xd4   : > { %668 = vrot.lane.b32.xlu1 %v3246_v56, %s4874_s28  ;;  %818 = vrot.lane.b32.xlu2 %v3224_v46, %s4870_s24 }
  0xd8   : > { %v3363_v28 = vpop.permute.xlu0 %931 }
  0xda   : > { %585 = vrot.lane.b32.xlu0 %v3260_v60, %s4876_s22 }
  0xdc   : > { %741 = vrot.lane.b32.xlu1 %v3230_v52, %s4872_s23  ;;  %822 = vrot.lane.b32.xlu2 %v3230_v52, %s4870_s24 }
  0xe2   : > { %666 = vrot.lane.b32.xlu0 %v3260_v60, %s4874_s28 }
  0xe4   : > { %830 = vrot.lane.b32.xlu1 %v3246_v56, %s4870_s24  ;;  %967 = vrot.lane.b32.xlu2 %v3246_v56, %s4878_s30 }
  0xea   : > { %739 = vrot.lane.b32.xlu0 %v3276_v1, %s4872_s23 }
  0xec   : > { %1048 = vrot.lane.b32.xlu1 %v3246_v56, %s4868_s14  ;;  %1040 = vrot.lane.b32.xlu2 %v3230_v52, %s4868_s14 }
  0xf2   : > { %820 = vrot.lane.b32.xlu0 %v3276_v1, %s4870_s24 }
  0xf4   : > { %581 = vrot.lane.b32.xlu1 %v3288_v6, %s4876_s22  ;;  %577 = vrot.lane.b32.xlu2 %v3276_v1, %s4876_s22 }
  0xfa   : > { %824 = vrot.lane.b32.xlu0 %v3288_v6, %s4870_s24 }
  0xfc   : > { %662 = vrot.lane.b32.xlu1 %v3288_v6, %s4874_s28  ;;  %658 = vrot.lane.b32.xlu2 %v3276_v1, %s4874_s28 }
 0x102   : > { %969 = vrot.lane.b32.xlu0 %v3312_v14, %s4878_s30 }
 0x104   : > { %751 = vrot.lane.b32.xlu1 %v3312_v14, %s4872_s23  ;;  %747 = vrot.lane.b32.xlu2 %v3260_v60, %s4872_s23 }
 0x10a   : > { %1042 = vrot.lane.b32.xlu0 %v3288_v6, %s4868_s14  ;;  %s4938_s14 = smov 1  }
 0x10c   : > { %961 = vrot.lane.b32.xlu1 %v3288_v6, %s4878_s30  ;;  %828 = vrot.lane.b32.xlu2 %v3260_v60, %s4870_s24  ;;  %s4887_s24 = smov 112  }
 0x10e   : > { %v3332_v18 = vpop.permute.xlu2 %575 }
 0x112   : > { %865 = vperm.xlu0 %2918, %v2718_v19   ;;  %v2734_v19 = vld [vmem:[%s4855_s2 + $0xc8] sm:$0xff] }
 0x114   : > { %870 = vperm.xlu1 %2919, %v2719_v21   ;;  %589 = vrot.lane.b32.xlu2 %v3312_v14, %s4876_s22  ;;  %v2745_v21 = vld [vmem:[%s4855_s2 + $0x110] sm:$0xff]  ;;  %s2989_s22 = smov 50  }
 0x116   : > { %v3346_v23 = vpop.permute.xlu2 %583 }
 0x11a   : > { %1017 = vperm.xlu0 %2918, %v2731_v24  }
 0x11c   : > { %955 = vrot.lane.b32.xlu1 %v3224_v46, %s4878_s30  ;;  %670 = vrot.lane.b32.xlu2 %v3312_v14, %s4874_s28  ;;  %s4907_s28 = smov 111  }
 0x11e   : > { %v3359_v27 = vpop.permute.xlu2 %664 }
 0x122   : > { %963 = vrot.lane.b32.xlu0 %v3232_v53, %s4878_s30 }
 0x124   : > { %965 = vrot.lane.b32.xlu1 %v3260_v60, %s4878_s30  ;;  %743 = vrot.lane.b32.xlu2 %v3288_v6, %s4872_s23  ;;  %s4939_s23 = smov 113  }
 0x126   : > { %v3369_v29 = vpop.permute.xlu1 %656  ;;  %v3371_v30 = vpop.permute.xlu2 %737 }
 0x12a   : > { %1123 = vrot.lane.b32.xlu0 %v3288_v6, %s4887_s24 }
 0x12c   : > { %v3375_v31 = vpop.permute.xlu0 %579  ;;  %1129 = vrot.lane.b32.xlu1 %v3246_v56, %s4887_s24  ;;  %832 = vrot.lane.b32.xlu2 %v3312_v14, %s4938_s14 }
 0x12e   : > { %v3381_v32 = vpop.permute.xlu1 %745  ;;  %v3383_v33 = vpop.permute.xlu2 %818 }
 0x132   : > { %921 = vperm.xlu0 %2918, %v2723_v34  }
 0x134   : > { %v3391_v36 = vpop.permute.xlu0 %660  ;;  %926 = vperm.xlu1 %2919, %v2724_v35   ;;  %1050 = vrot.lane.b32.xlu2 %v3312_v14, %s4939_s23 }
 0x136   : > { %v3395_v37 = vpop.permute.xlu1 %826  ;;  %v3397_v38 = vpop.permute.xlu2 %822 }
 0x13a   : > { %1098 = vperm.xlu0 %2918, %v2736_v39  }
 0x13c   : > { %v3405_v41 = vpop.permute.xlu0 %749  ;;  %1036 = vrot.lane.b32.xlu1 %v3224_v46, %s4939_s23  ;;  %1012 = vperm.xlu2 %2920, %v2730_v40  }
 0x13e   : > { %v3409_v42 = vpop.permute.xlu1 %587  ;;  %v3411_v43 = vpop.permute.xlu2 %967 }
 0x142   : > { %1044 = vrot.lane.b32.xlu0 %v3232_v53, %s4939_s23 }
 0x144   : > { %v3415_v44 = vpop.permute.xlu0 %959  ;;  %1046 = vrot.lane.b32.xlu1 %v3260_v60, %s4939_s23  ;;  %957 = vrot.lane.b32.xlu2 %v3276_v1, %s4878_s30  ;;  %s2993_s30 = smov 46  }
 0x146   : > { %v3421_v45 = vpop.permute.xlu1 %668  ;;  %v3423_v47 = vpop.permute.xlu2 %1040 }
 0x147   : > { %4940 = vst [vmem:[#allocation12_spill] sm:$0xff] %v3423_v47 }
 0x14a   : > { %1204 = vrot.lane.b32.xlu0 %v3288_v6, %s4907_s28 }
 0x14c   : > { %v3427_v48 = vpop.permute.xlu0 %585  ;;  %1210 = vrot.lane.b32.xlu1 %v3246_v56, %s4907_s28  ;;  %1121 = vrot.lane.b32.xlu2 %v3230_v52, %s4887_s24 }
 0x14e   : > { %v3433_v49 = vpop.permute.xlu1 %741  ;;  %v3435_v50 = vpop.permute.xlu2 %577 }
 0x152   : > { %1002 = vperm.xlu0 %2918, %v2728_v51  }
 0x154   : > { %v3443_v55 = vpop.permute.xlu0 %666  ;;  %1007 = vperm.xlu1 %2919, %v2729_v54   ;;  %1131 = vrot.lane.b32.xlu2 %v3312_v14, %s4887_s24  ;;  %v2738_v54 = vld [vmem:[%s4855_s2 + $0xe0] sm:$0xff] }
 0x156   : > { %v3447_v57 = vpop.permute.xlu1 %830  ;;  %v3449_v58 = vpop.permute.xlu2 %658 }
 0x15a   : > { %1179 = vperm.xlu0 %2918, %v2741_v59   ;;  %v2740_v59 = vld [vmem:[%s4855_s2 + $0xf0] sm:$0xff] }
 0x15c   : > { %v3457_v62 = vpop.permute.xlu0 %739  ;;  %1117 = vrot.lane.b32.xlu1 %v3224_v46, %s4887_s24  ;;  %1093 = vperm.xlu2 %2920, %v2735_v61  }
 0x15d   : > { %4941 = vst [vmem:[#allocation13_spill] sm:$0xff] %v3457_v62 }
 0x15e   : > { %v3461_v63 = vpop.permute.xlu1 %1048  ;;  %v3463_v2 = vpop.permute.xlu2 %747 }
 0x15f   : > { %4942 = vst [vmem:[#allocation14_spill] sm:$0xff] %v3461_v63 }
 0x160   : > { %4943 = vst [vmem:[#allocation15_spill] sm:$0xff] %v3463_v2 }
 0x162   : > { %1125 = vrot.lane.b32.xlu0 %v3232_v53, %s4887_s24 }
 0x164   : > { %v3467_v4 = vpop.permute.xlu0 %820  ;;  %1127 = vrot.lane.b32.xlu1 %v3260_v60, %s4887_s24  ;;  %1038 = vrot.lane.b32.xlu2 %v3276_v1, %s4939_s23 }
 0x165   : > { %4944 = vst [vmem:[#allocation16_spill] sm:$0xff] %v3467_v4 }
 0x166   : > { %v3473_v9 = vpop.permute.xlu1 %581  ;;  %v3475_v11 = vpop.permute.xlu2 %828 }
 0x167   : > { %4945 = vst [vmem:[#allocation17_spill] sm:$0xff] %v3475_v11  ;;  %v1337_v11 = vld [vmem:[%s4859_s6 + $0x10] sm:$0xff] }
 0x16a   : > { %1088 = vperm.xlu0 %2918, %v2734_v19  }
 0x16c   : > { %v3483_v24 = vpop.permute.xlu0 %824  ;;  %1255 = vperm.xlu1 %2919, %v2745_v21   ;;  %1202 = vrot.lane.b32.xlu2 %v3230_v52, %s4907_s28 }
 0x16d   : > { %4946 = vst [vmem:[#allocation18_spill] sm:$0xff] %v3483_v24 }
 0x16e   : > { %v3487_v34 = vpop.permute.xlu1 %662  ;;  %v3489_v35 = vpop.permute.xlu2 %589 }
 0x172   : > { %1198 = vrot.lane.b32.xlu0 %v3224_v46, %s4907_s28 }
 0x174   : > { %v3493_v39 = vpop.permute.xlu0 %969  ;;  %1200 = vrot.lane.b32.xlu1 %v3276_v1, %s4907_s28  ;;  %1212 = vrot.lane.b32.xlu2 %v3312_v14, %s4907_s28 }
 0x175   : > { %4947 = vst [vmem:[#allocation19_spill] sm:$0xff] %v3493_v39  ;;  %v2743_v39 = vld [vmem:[%s4855_s2 + $0x100] sm:$0xff] }
 0x176   : > { %v3499_v40 = vpop.permute.xlu1 %751  ;;  %v3501_v51 = vpop.permute.xlu2 %670 }
 0x17a   : > { %1208 = vrot.lane.b32.xlu0 %v3260_v60, %s4907_s28 }
 0x17c   : > { %v3511_v61 = vpop.permute.xlu0 %1042  ;;  %1164 = vperm.xlu1 %2919, %v2738_v54   ;;  %1174 = vperm.xlu2 %2920, %v2740_v59  }
 0x17d   : > { %4948 = vst [vmem:[#allocation20_spill] sm:$0xff] %v3511_v61  ;;  %v1282_v61 = vld [vmem:[%s4856_s3 + $0x18] sm:$0xff] }
 0x17e   : > { %v3513_v19 = vpop.permute.xlu1 %961  ;;  %v3515_v21 = vpop.permute.xlu2 %743 }
 0x17f   : > { %4949 = vst [vmem:[#allocation21_spill] sm:$0xff] %v3513_v19  ;;  %v1279_v19 = vld [vmem:[%s4856_s3] sm:$0xff] }
 0x182   : > { %1245 = vperm.xlu0 %2918, %v2743_v39  }
 0x184   : > { %v3523_v4 = vpop.permute.xlu0 %865  ;;  %1250 = vperm.xlu1 %2919, %v2744_v16   ;;  %1119 = vrot.lane.b32.xlu2 %v3276_v1, %s4887_s24  ;;  %v2733_v16 = vld [vmem:[%s4855_s2 + $0xc0] sm:$0xff]  ;;  %s2991_s24 = smov 48  }
 0x185   : > { %4950 = vst [vmem:[#allocation22_spill] sm:$0xff] %v3523_v4 }
 0x186   : > { %v3527_v54 = vpop.permute.xlu1 %870  ;;  %v3529_v59 = vpop.permute.xlu2 %832 }
 0x187   : > { %4951 = vst [vmem:[#allocation23_spill] sm:$0xff] %v3527_v54 }
 0x188   : > { %4952 = vst [vmem:[#allocation24_spill] sm:$0xff] %v3529_v59 }
 0x18a   : > { %1300 = vperm.xlu0 %2918, %v1282_v61   ;;  %v1338_v61 = vld [vmem:[%s4859_s6 + $0x18] sm:$0xff] }
 0x18c   : > { %v3540_v39 = vpop.permute.xlu0 %1017  ;;  %1285 = vperm.xlu1 %2919, %v1279_v19   ;;  %1083 = vperm.xlu2 %2920, %v2733_v16  }
 0x18d   : > { %4953 = vst [vmem:[#allocation25_spill] sm:$0xff] %v3540_v39 }
 0x18e   : > { %v3542_v54 = vpop.permute.xlu1 %955  ;;  %v3544_v4 = vpop.permute.xlu2 %1050 }
 0x18f   : > { %4954 = vst [vmem:[#allocation26_spill] sm:$0xff] %v3542_v54  ;;  %v1336_v54 = vld [vmem:[%s4859_s6 + $0x8] sm:$0xff] }
 0x190   : > { %4955 = vst [vmem:[#allocation27_spill] sm:$0xff] %v3544_v4 }
 0x192   : > { %1351 = vperm.xlu0 %2918, %v1337_v11   ;;  %v1429_v11 = vld [vmem:[%s4861_s8] sm:$0xff] }
 0x194   : > { %v3555_v39 = vpop.permute.xlu0 %963  ;;  %1356 = vperm.xlu1 %2919, %v1338_v61   ;;  %1260 = vperm.xlu2 %2920, %v2746_v17  }
 0x195   : > { %4956 = vst [vmem:[#allocation28_spill] sm:$0xff] %v3555_v39  ;;  %v1432_v39 = vld [vmem:[%s4861_s8 + $0x18] sm:$0xff] }
 0x196   : > { %v3557_v19 = vpop.permute.xlu1 %965  ;;  %v3559_v16 = vpop.permute.xlu2 %1012 }
 0x197   : > { %4957 = vst [vmem:[#allocation29_spill] sm:$0xff] %v3557_v19  ;;  %v1431_v19 = vld [vmem:[%s4861_s8 + $0x10] sm:$0xff] }
 0x198   : > { %4958 = vst [vmem:[#allocation30_spill] sm:$0xff] %v3559_v16 }
 0x19a   : > { %1346 = vperm.xlu0 %2918, %v1336_v54   ;;  %v2739_v54 = vld [vmem:[%s4855_s2 + $0xe8] sm:$0xff] }
 0x19c   : > { %v3567_v4 = vpop.permute.xlu0 %1123  ;;  %1435 = vperm.xlu1 %2919, %v1429_v11   ;;  %1206 = vrot.lane.b32.xlu2 %v3232_v53, %s4907_s28  ;;  %s2992_s28 = smov 47  }
 0x19d   : > { %4959 = vst [vmem:[#allocation31_spill] sm:$0xff] %v3567_v4 }
 0x19e   : > { %v3571_v17 = vpop.permute.xlu1 %1129  ;;  %v3573_v61 = vpop.permute.xlu2 %957 }
 0x19f   : > { %4960 = vst [vmem:[#allocation32_spill] sm:$0xff] %v3571_v17 }
 0x1a0   : > { %4961 = vst [vmem:[#allocation33_spill] sm:$0xff] %v3573_v61  ;;  %v1281_v61 = vld [vmem:[%s4856_s3 + $0x10] sm:$0xff] }
 0x1a2   : > { %1445 = vperm.xlu0 %2918, %v1431_v19  }
 0x1a4   : > { %v3584_v11 = vpop.permute.xlu0 %921  ;;  %1450 = vperm.xlu1 %2919, %v1432_v39   ;;  %1169 = vperm.xlu2 %2920, %v2739_v54   ;;  %v1280_v39 = vld [vmem:[%s4856_s3 + $0x8] sm:$0xff] }
 0x1a5   : > { %4962 = vst [vmem:[#allocation34_spill] sm:$0xff] %v3584_v11 }
 0x1a6   : > { %v3586_v4 = vpop.permute.xlu1 %926  ;;  %v3588_v17 = vpop.permute.xlu2 %1121 }
 0x1a7   : > { %4963 = vst [vmem:[#allocation35_spill] sm:$0xff] %v3586_v4  ;;  %v4909_v4 = vlaneseq }
 0x1a8   : > { %4964 = vst [vmem:[#allocation36_spill] sm:$0xff] %v3588_v17 }
 0x1a9   : > { %v3609_v63 = vand.u32 127, %v4909_v4  ;;  %v606_v4 = vld [vmem:[%s4857_s4] sm:$0x3] }
 0x1aa   : > { %v3642_v15 = vperm.slane %v606_v4, 0 }
 0x1ab   : > { %vm672_vm1 = vcmp.lt.s32.totalorder %v3609_v63, 16  ;;  %vm593_vm2 = vcmp.lt.s32.totalorder %v3609_v63, 17  ;;  %vm753_vm3 = vcmp.lt.s32.totalorder %v3609_v63, 15  ;;  %vm834_vm4 = vcmp.lt.s32.totalorder %v3609_v63, 1 }
 0x1ac   : > { %v3593_v16 = vpop.permute.xlu0 %1098  ;;  %1295 = vperm.xlu2 %2920, %v1281_v61   ;;  %v1335_v61 = vld [vmem:[%s4859_s6] sm:$0xff]  ;;  %v677_v13 = vsel %vm672_vm1, %v3359_v27, %v3369_v29  ;;  %v598_v3 = vsel %vm593_vm2, %v3346_v23, %v3332_v18  ;;  %vm971_vm5 = vcmp.lt.s32.totalorder %v3609_v63, 127  ;;  %vm1052_vm6 = vcmp.lt.s32.totalorder %v3609_v63, 113 }
 0x1ad   : > { %4965 = vst [vmem:[#allocation37_spill] sm:$0xff] %v3593_v16  ;;  %vm1133_vm7 = vcmp.lt.s32.totalorder %v3609_v63, 112  ;;  %vm1214_vm8 = vcmp.lt.s32.totalorder %v3609_v63, 111 }
 0x1ae   : > { %v3595_v19 = vpop.permute.xlu1 %1036  ;;  %v3597_v47 = vpop.permute.xlu2 %1131 }
 0x1af   : > { %4966 = vst [vmem:[#allocation38_spill] sm:$0xff] %v3595_v19  ;;  %v2712_v19 = vld [vmem:[%s4857_s4 + $0x2] sm:$0x3] }
 0x1b0   : > { %4967 = vst [vmem:[#allocation39_spill] sm:$0xff] %v3597_v47  ;;  %v3631_v16 = vperm.slane %v2712_v19, 1 }
 0x1b4   : > { %v3602_v54 = vpop.permute.xlu0 %1044  ;;  %1290 = vperm.xlu2 %2920, %v1280_v39   ;;  %v2727_v39 = vld [vmem:[%s4857_s4 + $0x8] sm:$0x3] }
 0x1b5   : > { %4968 = vst [vmem:[#allocation40_spill] sm:$0xff] %v3602_v54  ;;  %v3627_v54 = vperm.slane %v2712_v19, 0  ;;  %v907_v47 = vperm.slane %v2727_v39, 0  ;;  %v673_v19 = vsel %vm672_vm1, %v3369_v29, %v3359_v27  ;;  %v1430_v27 = vld [vmem:[%s4861_s8 + $0x8] sm:$0xff] }
 0x1b6   : > { %v3604_v17 = vpop.permute.xlu1 %1046  ;;  %v3606_v11 = vpop.permute.xlu2 %1093  ;;  %v694_v29 = vmul.f32 %v3631_v16, %v673_v19 }
 0x1b7   : > { %4969 = vst [vmem:[#allocation41_spill] sm:$0xff] %v3604_v17  ;;  %v3682_v59 = vmul.f32 %v907_v47, %v3224_v46  ;;  %v917_v24 = vmul.f32 %v907_v47, %v3288_v6 }
 0x1b8   : > { %4970 = vst [vmem:[#allocation42_spill] sm:$0xff] %v3606_v11 }
 0x1bc   : > { %v3621_v17 = vpop.permute.xlu0 %1204  ;;  %1341 = vperm.xlu2 %2920, %v1335_v61   ;;  %v908_v61 = vperm.slane %v2727_v39, 1  ;;  %v594_v39 = vsel %vm593_vm2, %v3332_v18, %v3346_v23  ;;  %v915_v18 = vmul.f32 %v907_v47, %v3230_v52  ;;  %v612_v23 = vmul.f32 %v3642_v15, %v598_v3  ;;  %v2722_v52 = vld [vmem:[%s4857_s4 + $0x6] sm:$0x3] }
 0x1bd   : > { %4971 = vst [vmem:[#allocation43_spill] sm:$0xff] %v3621_v17  ;;  %v2717_v17 = vld [vmem:[%s4857_s4 + $0x4] sm:$0x3] }
 0x1be   : > { %v3629_v11 = vpop.permute.xlu1 %1210  ;;  %v3640_v5 = vpop.permute.xlu2 %1038  ;;  %v3660_v62 = vperm.slane %v2717_v17, 0  ;;  %v3662_v2 = vperm.slane %v2717_v17, 1  ;;  %v3679_v17 = vmul.f32 %v908_v61, %v3232_v53  ;;  %v918_v8 = vmul.f32 %v908_v61, %v3312_v14 }
 0x1bf   : > { %4972 = vst [vmem:[#allocation44_spill] sm:$0xff] %v3629_v11  ;;  %v3649_v11 = vperm.slane %v606_v4, 1  ;;  %v754_v4 = vsel %vm753_vm3, %v3371_v30, %v3381_v32  ;;  %v916_v25 = vmul.f32 %v908_v61, %v3246_v56  ;;  %v3702_v56 = vmul.f32 %v3357_v26, %v917_v24 }
 0x1c0   : > { %4973 = vst [vmem:[#allocation45_spill] sm:$0xff] %v3640_v5  ;;  %v693_v5 = vmul.f32 %v3627_v54, %v677_v13  ;;  %v758_v13 = vsel %vm753_vm3, %v3381_v32, %v3371_v30  ;;  %v775_v3 = vmul.f32 %v3662_v2, %v754_v4  ;;  %v3697_v32 = vmul.f32 %v907_v47, %v3276_v1 }
 0x1c1   : > { %v613_v30 = vmul.f32 %v3649_v11, %v594_v39  ;;  %v774_v46 = vmul.f32 %v3660_v62, %v758_v13  ;;  %v3705_v14 = vmul.f32 %v3357_v26, %v918_v8  ;;  %v722_v39 = vmul.f32 %v3302_v10, %v694_v29 }
 0x1c2   : > { %v721_v53 = vmul.f32 %v3302_v10, %v693_v5  ;;  %v3714_v4 = vmul.f32 %v3363_v28, %v915_v18  ;;  %v640_v1 = vmul.f32 %v3274_v0, %v612_v23  ;;  %v3718_v47 = vperm.slane %v2722_v52, 0 }
 0x1c3   : > { %v641_v24 = vmul.f32 %v3274_v0, %v613_v30  ;;  %v3721_v8 = vperm.slane %v2722_v52, 1  ;;  %v679_v10 = vsel %vm672_vm1, %v3421_v45, %v3391_v36  ;;  %v803_v29 = vmul.f32 %v3342_v22, %v775_v3  ;;  %v2732_v0 = vld [vmem:[%s4857_s4 + $0xa] sm:$0x3] }
 0x1c4   : > { %v3684_v19 = vpop.permute.xlu0 %1002  ;;  %1440 = vperm.xlu2 %2920, %v1430_v27   ;;  %v3709_v27 = vmul.f32 %v908_v61, %v3260_v60  ;;  %v600_v60 = vsel %vm593_vm2, %v3409_v42, %v3375_v31  ;;  %v729_v26 = vadd.f32 %v721_v53, %v640_v1  ;;  %v802_v61 = vmul.f32 %v3342_v22, %v774_v46  ;;  %v2737_v46 = vld [vmem:[%s4857_s4 + $0xc] sm:$0x3] }
 0x1c5   : > { %v675_v13 = vsel %vm672_vm1, %v3391_v36, %v3421_v45  ;;  %v730_v18 = vadd.f32 %v722_v39, %v641_v24  ;;  %v835_v23 = vsel %vm834_vm4, %v3383_v33, %v3395_v37  ;;  %v839_v22 = vsel %vm834_vm4, %v3395_v37, %v3383_v33 }
 0x1c6   : > { %v3699_v6 = vpop.permute.xlu1 %1007  ;;  %v3711_v5 = vpop.permute.xlu2 %1202  ;;  %v596_v30 = vsel %vm593_vm2, %v3375_v31, %v3409_v42  ;;  %v616_v52 = vmul.f32 %v3642_v15, %v600_v60  ;;  %v697_v36 = vmul.f32 %v3627_v54, %v679_v10  ;;  %v756_v45 = vsel %vm753_vm3, %v3433_v49, %v3405_v41 }
 0x1c7   : > { %v760_v53 = vsel %vm753_vm3, %v3405_v41, %v3433_v49  ;;  %v3765_v37 = vmul.f32 %v3363_v28, %v916_v25  ;;  %v3768_v31 = vperm.slane %v2732_v0, 0  ;;  %v698_v42 = vmul.f32 %v3631_v16, %v675_v13 }
 0x1c8   : > { %v617_v3 = vmul.f32 %v3649_v11, %v596_v30  ;;  %v3775_v39 = vperm.slane %v2732_v0, 1  ;;  %v3777_v41 = vadd.f32 %v802_v61, %v729_v26  ;;  %v3779_v49 = vadd.f32 %v803_v29, %v730_v18 }
 0x1c9   : > { %v3784_v28 = vmul.f32 %v3718_v47, %v839_v22  ;;  %v3787_v1 = vmul.f32 %v3721_v8, %v835_v23  ;;  %v778_v24 = vmul.f32 %v3660_v62, %v760_v53  ;;  %v779_v60 = vmul.f32 %v3662_v2, %v756_v45 }
 0x1ca   : > { %v644_v0 = vmul.f32 %v3290_v7, %v616_v52  ;;  %v725_v26 = vmul.f32 %v3304_v12, %v697_v36  ;;  %v3795_v61 = vperm.slane %v2737_v46, 0  ;;  %v3797_v29 = vperm.slane %v2737_v46, 1 }
 0x1cb   : > { %v974_v13 = vsel %vm971_vm5, %v3415_v44, %v3411_v43  ;;  %v978_v18 = vsel %vm971_vm5, %v3411_v43, %v3415_v44  ;;  %v726_v23 = vmul.f32 %v3304_v12, %v698_v42  ;;  %v841_v22 = vsel %vm834_vm4, %v3447_v57, %v3397_v38 }
 0x1cc   : > { %v3762_v33 = vpop.permute.xlu0 %1179  ;;  %v645_v30 = vmul.f32 %v3290_v7, %v617_v3  ;;  %v595_v52 = vsel %vm593_vm2, %v3435_v50, %v3427_v48  ;;  %v837_v36 = vsel %vm834_vm4, %v3397_v38, %v3447_v57  ;;  %v678_v12 = vsel %vm672_vm1, %v3443_v55, %v3449_v58 }
 0x1cd   : > { %v806_v43 = vmul.f32 %v3337_v20, %v778_v24  ;;  %v807_v44 = vmul.f32 %v3337_v20, %v779_v60  ;;  %v599_v7 = vsel %vm593_vm2, %v3427_v48, %v3435_v50  ;;  %v674_v45 = vsel %vm672_vm1, %v3449_v58, %v3443_v55 }
 0x1ce   : > { %v3781_v25 = vpop.permute.xlu1 %1117  ;;  %v3791_v10 = vpop.permute.xlu2 %1212  ;;  %v3836_v38 = vmul.f32 %v3768_v31, %v974_v13  ;;  %v3839_v57 = vmul.f32 %v3775_v39, %v978_v18  ;;  %v733_v53 = vadd.f32 %v725_v26, %v644_v0  ;;  %v859_v42 = vmul.f32 %v3718_v47, %v841_v22 }
 0x1cf   : > { %v734_v46 = vadd.f32 %v726_v23, %v645_v30  ;;  %v860_v3 = vmul.f32 %v3721_v8, %v837_v36  ;;  %v695_v48 = vmul.f32 %v3627_v54, %v678_v12  ;;  %v680_v50 = vsel %vm672_vm1, %v3501_v51, %v3487_v34  ;;  %v4975_v30 = vld [vmem:[#allocation11_spill] sm:$0xff] }
 0x1d0   : > { %v614_v55 = vmul.f32 %v3642_v15, %v599_v7  ;;  %v615_v58 = vmul.f32 %v3649_v11, %v595_v52  ;;  %v696_v24 = vmul.f32 %v3631_v16, %v674_v45  ;;  %v676_v60 = vsel %vm672_vm1, %v3487_v34, %v3501_v51  ;;  %v4977_v45 = vld [vmem:[#allocation18_spill] sm:$0xff] }
 0x1d1   : > { %v814_v26 = vadd.f32 %v806_v43, %v733_v53  ;;  %v815_v13 = vadd.f32 %v807_v44, %v734_v46  ;;  %v601_v18 = vsel %vm593_vm2, %v3489_v35, %v3473_v9  ;;  %v761_v23 = vsel %vm753_vm3, %v3499_v40, %v3515_v21  ;;  %v4976_v43 = vld [vmem:[#allocation6_spill] sm:$0xff]  ;;  %v4978_v53 = vld [vmem:[#allocation24_spill] sm:$0xff]  ;;  %v4980_v46 = vld [vmem:[#allocation13_spill] sm:$0xff] }
 0x1d2   : > { %v887_v52 = vmul.f32 %v4975_v30, %v859_v42  ;;  %v597_v34 = vsel %vm593_vm2, %v3473_v9, %v3489_v35  ;;  %v699_v51 = vmul.f32 %v3627_v54, %v680_v50  ;;  %v757_v36 = vsel %vm753_vm3, %v3515_v21, %v3499_v40  ;;  %v4979_v21 = vld [vmem:[#allocation15_spill] sm:$0xff]  ;;  %v4981_v50 = vld [vmem:[#allocation4_spill] sm:$0xff] }
 0x1d3   : > { %v888_v12 = vmul.f32 %v4975_v30, %v860_v3  ;;  %v723_v44 = vmul.f32 %v4976_v43, %v695_v48  ;;  %v700_v7 = vmul.f32 %v3631_v16, %v676_v60  ;;  %v842_v42 = vsel %vm834_vm4, %v4978_v53, %v4977_v45 }
 0x1d4   : > { %v3842_v20 = vpop.permute.xlu0 %1125  ;;  %v724_v9 = vmul.f32 %v4976_v43, %v696_v24  ;;  %v618_v35 = vmul.f32 %v3642_v15, %v601_v18  ;;  %v780_v54 = vmul.f32 %v3660_v62, %v761_v23  ;;  %v838_v40 = vsel %vm834_vm4, %v4977_v45, %v4978_v53  ;;  %v4982_v18 = vld [vmem:[#allocation8_spill] sm:$0xff] }
 0x1d5   : > { %v755_v16 = vsel %vm753_vm3, %v4980_v46, %v4979_v21  ;;  %v759_v3 = vsel %vm753_vm3, %v4979_v21, %v4980_v46  ;;  %v619_v48 = vmul.f32 %v3649_v11, %v597_v34  ;;  %v781_v15 = vmul.f32 %v3662_v2, %v757_v36  ;;  %v4984_v36 = vld [vmem:[#allocation5_spill] sm:$0xff] }
 0x1d6   : > { %v3858_v0 = vpop.permute.xlu1 %1127  ;;  %v3868_v22 = vpop.permute.xlu2 %1174  ;;  %v642_v24 = vmul.f32 %v4981_v50, %v614_v55  ;;  %v895_v60 = vadd.f32 %v887_v52, %v814_v26  ;;  %v727_v23 = vmul.f32 %v4982_v18, %v699_v51  ;;  %v861_v30 = vmul.f32 %v3718_v47, %v842_v42  ;;  %v4985_v26 = vld [vmem:[#allocation7_spill] sm:$0xff] }
 0x1d7   : > { %4974 = vst [vmem:[#allocation46_spill] sm:$0xff] %v3858_v0  ;;  %v643_v45 = vmul.f32 %v4981_v50, %v615_v58  ;;  %v896_v53 = vadd.f32 %v888_v12, %v815_v13  ;;  %v728_v0 = vmul.f32 %v4982_v18, %v700_v7  ;;  %v862_v21 = vmul.f32 %v3721_v8, %v838_v40  ;;  %v4986_v13 = vld [vmem:[#allocation14_spill] sm:$0xff]  ;;  %v4987_v12 = vld [vmem:[#allocation12_spill] sm:$0xff]  ;;  %v4991_v50 = vld [vmem:[#allocation9_spill] sm:$0xff] }
 0x1d8   : > { %v776_v11 = vmul.f32 %v3660_v62, %v759_v3  ;;  %v777_v34 = vmul.f32 %v3662_v2, %v755_v16  ;;  %v646_v55 = vmul.f32 %v4984_v36, %v618_v35  ;;  %v808_v52 = vmul.f32 %v4985_v26, %v780_v54  ;;  %v4988_v40 = vld [vmem:[#allocation10_spill] sm:$0xff] }
 0x1d9   : > { %v731_v51 = vadd.f32 %v723_v44, %v642_v24  ;;  %v732_v46 = vadd.f32 %v724_v9, %v643_v45  ;;  %v647_v42 = vmul.f32 %v4984_v36, %v619_v48  ;;  %v1055_v7 = vsel %vm1052_vm6, %v4987_v12, %v4986_v13  ;;  %v4989_v44 = vld [vmem:[#allocation17_spill] sm:$0xff]  ;;  %v4990_v9 = vld [vmem:[#allocation16_spill] sm:$0xff] }
 0x1da   : > { %v735_v62 = vadd.f32 %v727_v23, %v646_v55  ;;  %v889_v2 = vmul.f32 %v4988_v40, %v861_v30  ;;  %v951_v35 = vadd.f32 %v3714_v4, %v895_v60  ;;  %v836_v54 = vsel %vm834_vm4, %v4990_v9, %v4989_v44  ;;  %v4992_v23 = vld [vmem:[#allocation19_spill] sm:$0xff]  ;;  %v4993_v30 = vld [vmem:[#allocation21_spill] sm:$0xff] }
 0x1db   : > { %v840_v3 = vsel %vm834_vm4, %v4989_v44, %v4990_v9  ;;  %v736_v48 = vadd.f32 %v728_v0, %v647_v42  ;;  %v1059_v4 = vsel %vm1052_vm6, %v4986_v13, %v4987_v12  ;;  %v804_v24 = vmul.f32 %v4991_v50, %v776_v11  ;;  %v4994_v0 = vld [vmem:[#allocation22_spill] sm:$0xff]  ;;  %v4995_v12 = vld [vmem:[#allocation23_spill] sm:$0xff] }
 0x1dc   : > { %v3907_v43 = vpop.permute.xlu0 %1088  ;;  %v805_v60 = vmul.f32 %v4991_v50, %v777_v34  ;;  %v816_v18 = vadd.f32 %v808_v52, %v735_v62  ;;  %v975_v45 = vsel %vm971_vm5, %v4993_v30, %v4992_v23  ;;  %v883_v55 = vmul.f32 %v4994_v0, %v3784_v28 }
 0x1dd   : > { %4983 = vst [vmem:[#allocation11_spill] sm:$0xff] %v3907_v43  ;;  %v809_v43 = vmul.f32 %v4985_v26, %v781_v15  ;;  %v890_v15 = vmul.f32 %v4988_v40, %v862_v21  ;;  %v884_v21 = vmul.f32 %v4994_v0, %v3787_v1  ;;  %v857_v26 = vmul.f32 %v3718_v47, %v840_v3 }
 0x1de   : > { %v3918_v58 = vpop.permute.xlu2 %1119  ;;  %v3926_v16 = vpop.permute.xlu1 %1255  ;;  %v858_v42 = vmul.f32 %v3721_v8, %v836_v54  ;;  %v979_v11 = vsel %vm971_vm5, %v4992_v23, %v4993_v30  ;;  %v897_v34 = vadd.f32 %v889_v2, %v816_v18  ;;  %v3963_v28 = vmul.f32 %v3797_v29, %v1059_v4  ;;  %v2742_v2 = vld [vmem:[%s4857_s4 + $0xe] sm:$0x3] }
 0x1df   : > { %v817_v36 = vadd.f32 %v809_v43, %v736_v48  ;;  %v3960_v43 = vmul.f32 %v3795_v61, %v1055_v7  ;;  %v952_v1 = vadd.f32 %v3765_v37, %v896_v53  ;;  %v998_v47 = vmul.f32 %v3768_v31, %v975_v45  ;;  %v4996_v53 = vld [vmem:[#allocation25_spill] sm:$0xff]  ;;  %v4997_v48 = vld [vmem:[#allocation27_spill] sm:$0xff]  ;;  %v5000_v45 = vld [vmem:[#allocation28_spill] sm:$0xff] }
 0x1e0   : > { %v812_v8 = vadd.f32 %v804_v24, %v731_v51  ;;  %v885_v62 = vmul.f32 %v4995_v12, %v857_v26  ;;  %v886_v40 = vmul.f32 %v4995_v12, %v858_v42  ;;  %v999_v7 = vmul.f32 %v3775_v39, %v979_v11  ;;  %v5002_v42 = vld [vmem:[#allocation29_spill] sm:$0xff] }
 0x1e1   : > { %v898_v13 = vadd.f32 %v890_v15, %v817_v36  ;;  %v891_v44 = vadd.f32 %v883_v55, %v3777_v41  ;;  %v892_v9 = vadd.f32 %v884_v21, %v3779_v49  ;;  %v813_v54 = vadd.f32 %v805_v60, %v732_v46  ;;  %v4998_v15 = vld [vmem:[#allocation20_spill] sm:$0xff]  ;;  %v4999_v60 = vld [vmem:[#allocation30_spill] sm:$0xff]  ;;  %v5003_v11 = vld [vmem:[#allocation33_spill] sm:$0xff] }
 0x1e2   : > { %v953_v37 = vadd.f32 %v3702_v56, %v897_v34  ;;  %v1026_v51 = vmul.f32 %v4996_v53, %v998_v47  ;;  %v1056_v4 = vsel %vm1052_vm6, %v4998_v15, %v4997_v48  ;;  %v1027_v41 = vmul.f32 %v4996_v53, %v999_v7  ;;  %v5001_v36 = vld [vmem:[#allocation26_spill] sm:$0xff] }
 0x1e3   : > { %v954_v50 = vadd.f32 %v3705_v14, %v898_v13  ;;  %v1060_v49 = vsel %vm1052_vm6, %v4997_v48, %v4998_v15  ;;  %v3990_v46 = vperm.slane %v2742_v2, 0  ;;  %v893_v56 = vadd.f32 %v885_v62, %v812_v8  ;;  %v5004_v13 = vld [vmem:[#allocation34_spill] sm:$0xff]  ;;  %v5005_v62 = vld [vmem:[#allocation35_spill] sm:$0xff]  ;;  %v5006_v48 = vld [vmem:[#allocation32_spill] sm:$0xff] }
 0x1e4   : > { %v3957_v52 = vpop.permute.xlu0 %1198  ;;  %v894_v24 = vadd.f32 %v886_v40, %v813_v54  ;;  %v1024_v18 = vmul.f32 %v4999_v60, %v3836_v38  ;;  %v3994_v23 = vperm.slane %v2742_v2, 1  ;;  %v1079_v14 = vmul.f32 %v3795_v61, %v1056_v4  ;;  %v2747_v53 = vld [vmem:[%s4857_s4 + $0x10] sm:$0x3] }
 0x1e5   : > { %v972_v0 = vsel %vm971_vm5, %v5001_v36, %v5000_v45  ;;  %v976_v55 = vsel %vm971_vm5, %v5000_v45, %v5001_v36  ;;  %v1025_v21 = vmul.f32 %v4999_v60, %v3839_v57  ;;  %v1034_v38 = vadd.f32 %v1026_v51, %v953_v37 }
 0x1e6   : > { %v3975_v3 = vpop.permute.xlu2 %1083  ;;  %v3996_v30 = vpop.permute.xlu1 %1200  ;;  %v1080_v26 = vmul.f32 %v3797_v29, %v1060_v49  ;;  %v973_v34 = vsel %vm971_vm5, %v5003_v11, %v5002_v42  ;;  %v939_v47 = vmul.f32 %v5004_v13, %v3682_v59  ;;  %v1035_v8 = vadd.f32 %v1027_v41, %v954_v50  ;;  %v5008_v50 = vld [vmem:[#allocation37_spill] sm:$0xff] }
 0x1e7   : > { %v977_v12 = vsel %vm971_vm5, %v5002_v42, %v5003_v11  ;;  %v940_v57 = vmul.f32 %v5004_v13, %v3679_v17  ;;  %v941_v40 = vmul.f32 %v5005_v62, %v3697_v32  ;;  %v1032_v7 = vadd.f32 %v1024_v18, %v951_v35  ;;  %v5007_v17 = vld [vmem:[#allocation36_spill] sm:$0xff] }
 0x1e8   : > { %v942_v54 = vmul.f32 %v5005_v62, %v3709_v27  ;;  %v992_v59 = vmul.f32 %v3768_v31, %v972_v0  ;;  %v993_v37 = vmul.f32 %v3775_v39, %v976_v55  ;;  %v1033_v51 = vadd.f32 %v1025_v21, %v952_v1  ;;  %v5010_v21 = vld [vmem:[#allocation31_spill] sm:$0xff]  ;;  %v5012_v11 = vld [vmem:[#allocation40_spill] sm:$0xff]  ;;  %v5015_v62 = vld [vmem:[#allocation45_spill] sm:$0xff] }
 0x1e9   : > { %v1136_v32 = vsel %vm1133_vm7, %v5007_v17, %v5006_v48  ;;  %v1140_v35 = vsel %vm1133_vm7, %v5006_v48, %v5007_v17  ;;  %v994_v27 = vmul.f32 %v3768_v31, %v973_v34  ;;  %v947_v4 = vadd.f32 %v939_v47, %v891_v44  ;;  %v5009_v44 = vld [vmem:[#allocation39_spill] sm:$0xff]  ;;  %v5013_v34 = vld [vmem:[#allocation38_spill] sm:$0xff] }
 0x1ea   : > { %v1107_v41 = vmul.f32 %v5008_v50, %v1079_v14  ;;  %v1108_v49 = vmul.f32 %v5008_v50, %v1080_v26  ;;  %v995_v1 = vmul.f32 %v3775_v39, %v977_v12  ;;  %v948_v60 = vadd.f32 %v940_v57, %v892_v9  ;;  %v5011_v9 = vld [vmem:[#allocation42_spill] sm:$0xff]  ;;  %v5014_v57 = vld [vmem:[#allocation41_spill] sm:$0xff] }
 0x1eb   : > { %v949_v18 = vadd.f32 %v941_v40, %v893_v56  ;;  %v4048_v45 = vperm.slane %v2747_v53, 0  ;;  %v950_v36 = vadd.f32 %v942_v54, %v894_v24  ;;  %v4050_v0 = vperm.slane %v2747_v53, 1 }
 0x1ec   : > { %v4024_v2 = vpop.permute.xlu0 %1208  ;;  %v1158_v31 = vmul.f32 %v3990_v46, %v1136_v32  ;;  %v1159_v55 = vmul.f32 %v3994_v23, %v1140_v35  ;;  %v1137_v14 = vsel %vm1133_vm7, %v5010_v21, %v5009_v44  ;;  %v1141_v39 = vsel %vm1133_vm7, %v5009_v44, %v5010_v21 }
 0x1ed   : > { %v1105_v56 = vmul.f32 %v5011_v9, %v3960_v43  ;;  %v1106_v24 = vmul.f32 %v5011_v9, %v3963_v28  ;;  %v1115_v26 = vadd.f32 %v1107_v41, %v1034_v38  ;;  %v1116_v42 = vadd.f32 %v1108_v49, %v1035_v8 }
 0x1ee   : > { %v4042_v15 = vpop.permute.xlu2 %1260  ;;  %v1053_v13 = vsel %vm1052_vm6, %v5013_v34, %v5012_v11  ;;  %v1057_v47 = vsel %vm1052_vm6, %v5012_v11, %v5013_v34  ;;  %v1165_v12 = vpop.permute.xlu1 %1164  ;;  %v1054_v43 = vsel %vm1052_vm6, %v5015_v62, %v5014_v57  ;;  %v1058_v28 = vsel %vm1052_vm6, %v5014_v57, %v5015_v62 }
 0x1ef   : > { %v1020_v38 = vmul.f32 %v3684_v19, %v992_v59  ;;  %v1021_v8 = vmul.f32 %v3684_v19, %v993_v37  ;;  %v1022_v40 = vmul.f32 %v3699_v6, %v994_v27  ;;  %v1023_v54 = vmul.f32 %v3699_v6, %v995_v1  ;;  %v5016_v59 = vld [vmem:[#allocation43_spill] sm:$0xff] }
 0x1f0   : > { %v1160_v53 = vmul.f32 %v3990_v46, %v1137_v14  ;;  %v1161_v48 = vmul.f32 %v3994_v23, %v1141_v39  ;;  %v1113_v17 = vadd.f32 %v1105_v56, %v1032_v7  ;;  %v1114_v32 = vadd.f32 %v1106_v24, %v1033_v51  ;;  %v5017_v39 = vld [vmem:[#allocation44_spill] sm:$0xff] }
 0x1f1   : > { %v1073_v35 = vmul.f32 %v3795_v61, %v1053_v13  ;;  %v1074_v50 = vmul.f32 %v3797_v29, %v1057_v47  ;;  %v1218_v19 = vsel %vm1214_vm8, %v5016_v59, %v3791_v10  ;;  %v1222_v6 = vsel %vm1214_vm8, %v3791_v10, %v5016_v59 }
 0x1f2   : > { %v1075_v37 = vmul.f32 %v3795_v61, %v1054_v43  ;;  %v1076_v7 = vmul.f32 %v3797_v29, %v1058_v28  ;;  %v1028_v51 = vadd.f32 %v1020_v38, %v947_v4  ;;  %v1029_v27 = vadd.f32 %v1021_v8, %v948_v60  ;;  %v5018_v38 = vld [vmem:[#allocation46_spill] sm:$0xff] }
 0x1f3   : > { %v1188_v1 = vmul.f32 %v3762_v33, %v1160_v53  ;;  %v1189_v44 = vmul.f32 %v3762_v33, %v1161_v48  ;;  %v1030_v21 = vadd.f32 %v1022_v40, %v949_v18  ;;  %v1031_v14 = vadd.f32 %v1023_v54, %v950_v36  ;;  %v5019_v53 = vld [vmem:[#allocation11_spill] sm:$0xff] }
 0x1f4   : > { %v1246_v41 = vpop.permute.xlu0 %1245  ;;  %v1217_v9 = vsel %vm1214_vm8, %v3711_v5, %v5017_v39  ;;  %v1221_v10 = vsel %vm1214_vm8, %v5017_v39, %v3711_v5  ;;  %v1241_v61 = vmul.f32 %v4048_v45, %v1218_v19  ;;  %v1242_v29 = vmul.f32 %v4050_v0, %v1222_v6 }
 0x1f5   : > { %v1134_v33 = vsel %vm1133_vm7, %v3781_v25, %v3842_v20  ;;  %v1138_v4 = vsel %vm1133_vm7, %v3842_v20, %v3781_v25  ;;  %v1186_v60 = vmul.f32 %v3868_v22, %v1158_v31  ;;  %v1187_v18 = vmul.f32 %v3868_v22, %v1159_v55 }
 0x1f6   : > { %v1207_v49 = vpop.permute.xlu2 %1206  ;;  %v1196_v56 = vadd.f32 %v1188_v1, %v1115_v26  ;;  %v1197_v24 = vadd.f32 %v1189_v44, %v1116_v42  ;;  %v1239_v11 = vmul.f32 %v4048_v45, %v1217_v9  ;;  %v1240_v34 = vmul.f32 %v4050_v0, %v1221_v10  ;;  %v1251_v55 = vpop.permute.xlu1 %1250 }
 0x1f7   : > { %v1215_v5 = vsel %vm1214_vm8, %v3957_v52, %v1207_v49  ;;  %v1219_v36 = vsel %vm1214_vm8, %v1207_v49, %v3957_v52  ;;  %v1154_v25 = vmul.f32 %v3990_v46, %v1134_v33  ;;  %v1155_v20 = vmul.f32 %v3994_v23, %v1138_v4 }
 0x1f8   : > { %v1269_v22 = vmul.f32 %v4042_v15, %v1241_v61  ;;  %v1270_v31 = vmul.f32 %v4042_v15, %v1242_v29  ;;  %v1101_v13 = vmul.f32 %v3975_v3, %v1073_v35  ;;  %v1102_v47 = vmul.f32 %v3975_v3, %v1074_v50 }
 0x1f9   : > { %v1235_v52 = vmul.f32 %v4048_v45, %v1215_v5  ;;  %v1236_v26 = vmul.f32 %v4050_v0, %v1219_v36  ;;  %v1194_v57 = vadd.f32 %v1186_v60, %v1113_v17  ;;  %v1195_v62 = vadd.f32 %v1187_v18, %v1114_v32 }
 0x1fa   : > { %v1267_v43 = vmul.f32 %v3926_v16, %v1239_v11  ;;  %v1268_v28 = vmul.f32 %v3926_v16, %v1240_v34  ;;  %v1135_v15 = vsel %vm1133_vm7, %v3918_v58, %v5018_v38  ;;  %v1139_v3 = vsel %vm1133_vm7, %v5018_v38, %v3918_v58 }
 0x1fb   : > { %v1182_v8 = vmul.f32 %v1165_v12, %v1154_v25  ;;  %v1183_v40 = vmul.f32 %v1165_v12, %v1155_v20  ;;  %v1103_v48 = vmul.f32 %v5019_v53, %v1075_v37  ;;  %v1104_v17 = vmul.f32 %v5019_v53, %v1076_v7  ;;  %v2835_v53 = vld [vmem:[%s4858_s5 + $0x8] sm:$0xff] }
 0x1fc   : > { %v1301_v54 = vpop.permute.xlu0 %1300  ;;  %v1277_v32 = vadd.f32 %v1269_v22, %v1196_v56  ;;  %v1278_v35 = vadd.f32 %v1270_v31, %v1197_v24  ;;  %v1109_v16 = vadd.f32 %v1101_v13, %v1028_v51  ;;  %v1110_v50 = vadd.f32 %v1102_v47, %v1029_v27 }
 0x1fd   : > { %v1263_v49 = vmul.f32 %v1246_v41, %v1235_v52  ;;  %v1264_v59 = vmul.f32 %v1246_v41, %v1236_v26  ;;  %v1156_v19 = vmul.f32 %v3990_v46, %v1135_v15  ;;  %v1157_v6 = vmul.f32 %v3994_v23, %v1139_v3 }
 0x1fe   : > { %v1170_v42 = vpop.permute.xlu2 %1169  ;;  %v1309_v1 = vadd.f32 %v1301_v54, %v1277_v32  ;;  %v1310_v44 = vadd.f32 %v1301_v54, %v1278_v35  ;;  %v1190_v58 = vadd.f32 %v1182_v8, %v1109_v16  ;;  %v1191_v39 = vadd.f32 %v1183_v40, %v1110_v50  ;;  %v1286_v4 = vpop.permute.xlu1 %1285  ;;  %v2834_v54 = vld [vmem:[%s4858_s5] sm:$0xff] }
 0x1ff   : > { %v1275_v12 = vadd.f32 %v1267_v43, %v1194_v57  ;;  %v1276_v9 = vadd.f32 %v1268_v28, %v1195_v62  ;;  %v1216_v37 = vsel %vm1214_vm8, %v3996_v30, %v4024_v2  ;;  %v1220_v41 = vsel %vm1214_vm8, %v4024_v2, %v3996_v30 }
 0x200   : > { %v1184_v7 = vmul.f32 %v1170_v42, %v1156_v19  ;;  %v1185_v46 = vmul.f32 %v1170_v42, %v1157_v6  ;;  %v1111_v51 = vadd.f32 %v1103_v48, %v1030_v21  ;;  %v1112_v23 = vadd.f32 %v1104_v17, %v1031_v14 }
 0x201   : > { %v1271_v27 = vadd.f32 %v1263_v49, %v1190_v58  ;;  %v1272_v10 = vadd.f32 %v1264_v59, %v1191_v39  ;;  %v1317_v29 = vmax.f32 %v1309_v1, 0.0  ;;  %v1318_v33 = vmax.f32 %v1310_v44, 0.0 }
 0x202   : > { %v1237_v5 = vmul.f32 %v4048_v45, %v1216_v37  ;;  %v1238_v36 = vmul.f32 %v4050_v0, %v1220_v41  ;;  %v1192_v56 = vadd.f32 %v1184_v7, %v1111_v51  ;;  %v1193_v24 = vadd.f32 %v1185_v46, %v1112_v23 }
 0x203   : > { %v1303_v21 = vadd.f32 %v1286_v4, %v1271_v27  ;;  %v1304_v14 = vadd.f32 %v1286_v4, %v1272_v10  ;;  %v1325_v25 = vmin.f32 %v1317_v29, 6.0  ;;  %v1326_v20 = vmin.f32 %v1318_v33, 6.0 }
 0x204   : > { %v1265_v2 = vmul.f32 %v1251_v55, %v1237_v5  ;;  %v1266_v34 = vmul.f32 %v1251_v55, %v1238_v36  ;;  %v1352_v16 = vpop.permute.xlu0 %1351 }
 0x205   : > { %v1311_v45 = vmax.f32 %v1303_v21, 0.0  ;;  %v1312_v57 = vmax.f32 %v1304_v14, 0.0 }
 0x206   : > { %v1296_v61 = vpop.permute.xlu2 %1295  ;;  %v1273_v13 = vadd.f32 %v1265_v2, %v1192_v56  ;;  %v1274_v47 = vadd.f32 %v1266_v34, %v1193_v24  ;;  %v1357_v59 = vpop.permute.xlu1 %1356  ;;  %v2836_v56 = vld [vmem:[%s4860_s7] sm:$0xff]  ;;  %v2837_v24 = vld [vmem:[%s4860_s7 + $0x8] sm:$0xff] }
 0x207   : > { %v1307_v60 = vadd.f32 %v1296_v61, %v1275_v12  ;;  %v1308_v18 = vadd.f32 %v1296_v61, %v1276_v9  ;;  %v1319_v55 = vmin.f32 %v1311_v45, 6.0  ;;  %v1320_v38 = vmin.f32 %v1312_v57, 6.0 }
 0x209   : > { %v1315_v11 = vmax.f32 %v1307_v60, 0.0  ;;  %v1316_v30 = vmax.f32 %v1308_v18, 0.0 }
 0x20b   : > { %v1323_v22 = vmin.f32 %v1315_v11, 6.0  ;;  %v1324_v31 = vmin.f32 %v1316_v30, 6.0 }
 0x20c   : > { %v1347_v19 = vpop.permute.xlu0 %1346 }
 0x20d   : > { %v1333_v52 = vpack.c.bf16 %v1325_v25, %v1323_v22  ;;  %v1334_v26 = vpack.c.bf16 %v1326_v20, %v1324_v31 }
 0x20e   : > { %v1291_v42 = vpop.permute.xlu2 %1290  ;;  %v1436_v11 = vpop.permute.xlu1 %1435 }
 0x20f   : > { %v1305_v0 = vadd.f32 %v1291_v42, %v1273_v13  ;;  %v1306_v62 = vadd.f32 %v1291_v42, %v1274_v47  ;;  %1381 = vmatpush.bf16.msrb.mxu2 %v1333_v52  ;;  %1400 = vmatpush.bf16.msrb.mxu3 %v1334_v26 }
 0x211   : > { %v1313_v43 = vmax.f32 %v1305_v0, 0.0  ;;  %v1314_v28 = vmax.f32 %v1306_v62, 0.0 }
 0x213   : > { %v1321_v15 = vmin.f32 %v1313_v43, 6.0  ;;  %v1322_v3 = vmin.f32 %v1314_v28, 6.0 }
 0x214   : > { %v1446_v26 = vpop.permute.xlu0 %1445 }
 0x215   : > { %v1331_v8 = vpack.c.bf16 %v1321_v15, %v1319_v55  ;;  %v1332_v40 = vpack.c.bf16 %v1322_v3, %v1320_v38 }
 0x216   : > { %v1342_v39 = vpop.permute.xlu2 %1341  ;;  %v1451_v28 = vpop.permute.xlu1 %1450 }
 0x217   : > { %1382 = vmatpush.bf16.msrb.mxu2 %v1331_v8  ;;  %1401 = vmatpush.bf16.msrb.mxu3 %v1332_v40 }
 0x21a   : > { %2756 = vmatmul.msk.bf16.vlgmr.msrb.gmra.mxu2 %vm522_vm0, %v2834_v54  ;;  %2758 = vmatmul.msk.bf16.vlgmr.msrb.gmra.mxu3 %vm522_vm0, %v2834_v54 }
 0x21e   : > { %v1441_v25 = vpop.permute.xlu2 %1440 }
 0x22a   : > { %2757 = vmatmul.msk.bf16.gmra.mxu2 %vm522_vm0, %v2835_v53  ;;  %2759 = vmatmul.msk.bf16.gmra.mxu3 %vm522_vm0, %v2835_v53  ;;  %v2986_v53 = vmov 256.0  }
 0x22b   : > { %2921 = vrcp.f32 %v2986_v53 }
 0x29d   : > { %v1384_v48 = vpop.f32.mrf.mxu2  ;;  %v1403_v17 = vpop.f32.mrf.mxu3 }
 0x29e   : > { %v1385_v7 = vadd.f32 %v1384_v48, %v1342_v39  ;;  %v1404_v46 = vadd.f32 %v1403_v17, %v1342_v39  ;;  %v2922_v48 = vpop.eup %2921 }
 0x29f   : > { %v1528_v17 = vmul.f32 256.0, %v2922_v48  ;;  %vm1532_vm9 = vweird.f32 %v2922_v48 }
 0x2a0   : > { %v1413_v60 = vmax.f32 %v1385_v7, 0.0  ;;  %v1414_v18 = vmax.f32 %v1404_v46, 0.0 }
 0x2a5   : > { %v1386_v32 = vpop.f32.mrf.mxu2  ;;  %v1405_v35 = vpop.f32.mrf.mxu3 }
 0x2a6   : > { %v1387_v12 = vadd.f32 %v1386_v32, %v1347_v19  ;;  %v1406_v9 = vadd.f32 %v1405_v35, %v1347_v19  ;;  %v1529_v35 = vsub.f32 1.0, %v1528_v17  ;;  %v1512_v17 = vld [vmem:[%s4863_s10 + $0x8] sm:$0xff] }
 0x2a8   : > { %v1415_v61 = vmax.f32 %v1387_v12, 0.0  ;;  %v1416_v29 = vmax.f32 %v1406_v9, 0.0  ;;  %v1507_v12 = vld [vmem:[%s4862_s9] sm:$0xff] }
 0x2aa   : > { %v1425_v5 = vpack.c.bf16 %v1415_v61, %v1413_v60  ;;  %v1426_v36 = vpack.c.bf16 %v1416_v29, %v1414_v18  ;;  %v1510_v61 = vld [vmem:[%s4862_s9 + $0x18] sm:$0xff] }
 0x2ad   : > { %v1389_v50 = vpop.f32.mrf.mxu2  ;;  %v1408_v49 = vpop.f32.mrf.mxu3 }
 0x2ae   : > { %v1390_v6 = vadd.f32 %v1389_v50, %v1352_v16  ;;  %v1409_v1 = vadd.f32 %v1408_v49, %v1352_v16  ;;  %v1530_v16 = vmul.f32 %v2922_v48, %v1529_v35 }
 0x2b0   : > { %v1417_v51 = vmax.f32 %v1390_v6, 0.0  ;;  %v1418_v23 = vmax.f32 %v1409_v1, 0.0  ;;  %v1531_v49 = vadd.f32 %v2922_v48, %v1530_v16 }
 0x2b2   : > { %v1533_v19 = vsel %vm1532_vm9, %v2922_v48, %v1531_v49  ;;  %v1513_v48 = vld [vmem:[%s4863_s10 + $0x10] sm:$0xff] }
 0x2b5   : > { %v1391_v44 = vpop.f32.mrf.mxu2  ;;  %v1410_v58 = vpop.f32.mrf.mxu3 }
 0x2b6   : > { %v1392_v37 = vadd.f32 %v1391_v44, %v1357_v59  ;;  %v1411_v41 = vadd.f32 %v1410_v58, %v1357_v59  ;;  %v1508_v58 = vld [vmem:[%s4862_s9 + $0x8] sm:$0xff] }
 0x2b8   : > { %v1419_v27 = vmax.f32 %v1392_v37, 0.0  ;;  %v1420_v10 = vmax.f32 %v1411_v41, 0.0  ;;  %v1509_v37 = vld [vmem:[%s4862_s9 + $0x10] sm:$0xff] }
 0x2ba   : > { %v1427_v33 = vpack.c.bf16 %v1419_v27, %v1417_v51  ;;  %v1428_v4 = vpack.c.bf16 %v1420_v10, %v1418_v23 }
 0x2bc   : > { %1475 = vmatpush.bf16.msrb.mxu0 %v1427_v33  ;;  %1494 = vmatpush.bf16.msrb.mxu1 %v1428_v4 }
 0x2c0   : > { %1476 = vmatpush.bf16.msrb.mxu0 %v1425_v5  ;;  %1495 = vmatpush.bf16.msrb.mxu1 %v1426_v36 }
 0x2c3   : > { %2768 = vmatmul.msk.bf16.vlgmr.msrb.gmra.mxu0 %vm522_vm0, %v2836_v56  ;;  %2770 = vmatmul.msk.bf16.vlgmr.msrb.gmra.mxu1 %vm522_vm0, %v2836_v56 }
 0x2d3   : > { %2769 = vmatmul.msk.bf16.gmra.mxu0 %vm522_vm0, %v2837_v24  ;;  %2771 = vmatmul.msk.bf16.gmra.mxu1 %vm522_vm0, %v2837_v24 }
 0x340   : > { %v1478_v30 = vpop.f32.mrf.mxu0  ;;  %v1497_v2 = vpop.f32.mrf.mxu1 }
 0x341   : > { %v4182_v34 = vadd.f32 %v1478_v30, %v1436_v11  ;;  %v4184_v21 = vadd.f32 %v1497_v2, %v1436_v11 }
 0x343   : > { %v1515_v14 = vadd.f32 %v4184_v21, %v4182_v34  ;;  %v1538_v52 = vmax.f32 %v4182_v34, %v4184_v21 }
 0x345   : > { %1516 = vadd.xlane.f32.xlu2 %v1515_v14 }
 0x348   : > { %v1480_v20 = vpop.f32.mrf.mxu0  ;;  %v1499_v22 = vpop.f32.mrf.mxu1 }
 0x349   : > { %v4188_v31 = vadd.f32 %v1480_v20, %v1441_v25  ;;  %v4190_v13 = vadd.f32 %v1499_v22, %v1441_v25 }
 0x34b   : > { %v1518_v47 = vadd.f32 %v4190_v13, %v4188_v31  ;;  %v1541_v43 = vmax.f32 %v4188_v31, %v4190_v13 }
 0x34d   : > { %1519 = vadd.xlane.f32.xlu0 %v1518_v47  ;;  %1539 = vmax.xlane.f32.xlu2 %v1538_v52 }
 0x350   : > { %v1483_v42 = vpop.f32.mrf.mxu0  ;;  %v1502_v45 = vpop.f32.mrf.mxu1 }
 0x351   : > { %v4196_v57 = vadd.f32 %v1483_v42, %v1446_v26  ;;  %v4198_v0 = vadd.f32 %v1502_v45, %v1446_v26 }
 0x353   : > { %v1521_v62 = vadd.f32 %v4198_v0, %v4196_v57  ;;  %v1544_v8 = vmax.f32 %v4196_v57, %v4198_v0 }
 0x355   : > { %1522 = vadd.xlane.f32.xlu1 %v1521_v62  ;;  %1542 = vmax.xlane.f32.xlu2 %v1541_v43 }
 0x358   : > { %v1485_v55 = vpop.f32.mrf.mxu0  ;;  %v1504_v38 = vpop.f32.mrf.mxu1 }
 0x359   : > { %v4204_v15 = vadd.f32 %v1485_v55, %v1451_v28  ;;  %v4206_v3 = vadd.f32 %v1504_v38, %v1451_v28 }
 0x35b   : > { %v1524_v40 = vadd.f32 %v4206_v3, %v4204_v15  ;;  %v1547_v54 = vmax.f32 %v4204_v15, %v4206_v3 }
 0x35d   : > { %1545 = vmax.xlane.f32.xlu1 %v1544_v8  ;;  %1525 = vadd.xlane.f32.xlu0 %v1524_v40 }
 0x35e   : > { %1548 = vmax.xlane.f32.xlu2 %v1547_v54 }
 0x3b8   : > { %v1517_v32 = vpop.xlane.xlu2 %1516 }
 0x3b9   : > { %v1534_v1 = vmul.f32 %v1533_v19, %v1517_v32  ;;  %v1511_v32 = vld [vmem:[%s4863_s10] sm:$0xff] }
 0x3bb   : > { %v1550_v46 = vmul.f32 %v1534_v1, %v1507_v12 }
 0x3bd   : > { %v1555_v29 = vsel %vm1554_vm10, %v1550_v46, 0.0 }
 0x3c0   : > { %v1540_v50 = vpop.xlane.xlu2 %1539  ;;  %v1520_v59 = vpop.xlane.xlu0 %1519 }
 0x3c1   : > { %v1535_v6 = vmul.f32 %v1533_v19, %v1520_v59  ;;  %v1569_v51 = vmul.f32 %v1540_v50, %v1507_v12 }
 0x3c3   : > { %v1551_v41 = vmul.f32 %v1535_v6, %v1508_v58  ;;  %v1573_v60 = vsel %vm1554_vm10, %v1569_v51, 0.0 }
 0x3c5   : > { %v1556_v27 = vsel %vm1554_vm10, %v1551_v41, 0.0 }
 0x3c6   : > { %v1557_v24 = vadd.f32 %v1556_v27, %v1555_v29 }
 0x3c8   : > { %v1523_v44 = vpop.xlane.xlu1 %1522  ;;  %v1543_v39 = vpop.xlane.xlu2 %1542 }
 0x3c9   : > { %v1536_v9 = vmul.f32 %v1533_v19, %v1523_v44  ;;  %v1570_v7 = vmul.f32 %v1543_v39, %v1508_v58  ;;  %v1514_v58 = vld [vmem:[%s4863_s10 + $0x18] sm:$0xff] }
 0x3cb   : > { %v1552_v23 = vmul.f32 %v1536_v9, %v1509_v37  ;;  %v1574_v10 = vsel %vm1554_vm10, %v1570_v7, 0.0 }
 0x3cc   : > { %v1575_v11 = vadd.f32 %v1574_v10, %v1573_v60 }
 0x3cd   : > { %v1558_v18 = vsel %vm1554_vm10, %v1552_v23, 0.0 }
 0x3ce   : > { %v1559_v25 = vadd.f32 %v1558_v18, %v1557_v24 }
 0x3d0   : > { %v1546_v33 = vpop.xlane.xlu1 %1545  ;;  %v1526_v4 = vpop.xlane.xlu0 %1525 }
 0x3d1   : > { %v1571_v5 = vmul.f32 %v1546_v33, %v1509_v37  ;;  %v1537_v36 = vmul.f32 %v1533_v19, %v1526_v4  ;;  %v1549_v56 = vpop.xlane.xlu2 %1548 }
 0x3d2   : > { %v1572_v30 = vmul.f32 %v1549_v56, %v1510_v61 }
 0x3d3   : > { %v1576_v2 = vsel %vm1554_vm10, %v1571_v5, 0.0  ;;  %v1553_v14 = vmul.f32 %v1537_v36, %v1510_v61 }
 0x3d4   : > { %v1577_v20 = vadd.f32 %v1576_v2, %v1575_v11  ;;  %v1578_v47 = vsel %vm1554_vm10, %v1572_v30, 0.0 }
 0x3d5   : > { %v1560_v22 = vsel %vm1554_vm10, %v1553_v14, 0.0 }
 0x3d6   : > { %v1561_v52 = vadd.f32 %v1560_v22, %v1559_v25  ;;  %v1579_v26 = vadd.f32 %v1578_v47, %v1577_v20 }
 0x3d8   : > { %v1562_v42 = vrot.slane %v1561_v52, 4  ;;  %v1580_v45 = vrot.slane %v1579_v26, 4 }
 0x3da   : > { %v1563_v62 = vadd.f32 %v1562_v42, %v1561_v52  ;;  %v1581_v43 = vadd.f32 %v1580_v45, %v1579_v26 }
 0x3dc   : > { %v1564_v28 = vrot.slane %v1563_v62, 2  ;;  %v1582_v55 = vrot.slane %v1581_v43, 2 }
 0x3de   : > { %v1565_v38 = vadd.f32 %v1564_v28, %v1563_v62  ;;  %v1583_v8 = vadd.f32 %v1582_v55, %v1581_v43 }
 0x3e0   : > { %v1566_v40 = vrot.slane %v1565_v38, 1  ;;  %v1584_v54 = vrot.slane %v1583_v8, 1 }
 0x3e2   : > { %v1585_v53 = vadd.f32 %v1584_v54, %v1583_v8  ;;  %v1567_v16 = vadd.f32 %v1566_v40, %v1565_v38 }
 0x3e4   : > { %v1586_v35 = vmax.f32 %v1585_v53, 0.0  ;;  %v1568_v44 = vmax.f32 %v1567_v16, 0.0 }
 0x3e6   : > { %v1605_v50 = vmul.f32 %v1586_v35, %v1513_v48  ;;  %v1604_v49 = vmul.f32 %v1586_v35, %v1512_v17  ;;  %v1603_v59 = vmul.f32 %v1586_v35, %v1511_v32  ;;  %v1587_v39 = vmul.f32 %v1568_v44, %v1511_v32 }
 0x3e7   : > { %v1589_v12 = vmul.f32 %v1568_v44, %v1513_v48  ;;  %v1606_v9 = vmul.f32 %v1586_v35, %v1514_v58  ;;  %v1590_v46 = vmul.f32 %v1568_v44, %v1514_v58  ;;  %v1588_v51 = vmul.f32 %v1568_v44, %v1512_v17 }
 0x3e8   : > { %v1613_v19 = vsel %vm1554_vm10, %v1605_v50, 0.0  ;;  %v1610_v6 = vsel %vm1554_vm10, %v1604_v49, 0.0  ;;  %v1607_v1 = vsel %vm1554_vm10, %v1603_v59, 0.0  ;;  %v1591_v37 = vsel %vm1554_vm10, %v1587_v39, 0.0 }
 0x3e9   : > { %1614 = vadd.xlane.f32.xlu0 %v1613_v19  ;;  %1611 = vadd.xlane.f32.xlu2 %v1610_v6  ;;  %v1597_v41 = vsel %vm1554_vm10, %v1589_v12, 0.0  ;;  %v1616_v7 = vsel %vm1554_vm10, %v1606_v9, 0.0  ;;  %v1600_v23 = vsel %vm1554_vm10, %v1590_v46, 0.0  ;;  %v1594_v27 = vsel %vm1554_vm10, %v1588_v51, 0.0 }
 0x3ea   : > { %1608 = vadd.xlane.f32.xlu1 %v1607_v1  ;;  %v2987_v6 = vmov 32.0  }
 0x3f1   : > { %1592 = vadd.xlane.f32.xlu0 %v1591_v37  ;;  %1598 = vadd.xlane.f32.xlu2 %v1597_v41 }
 0x3f2   : > { %1617 = vadd.xlane.f32.xlu1 %v1616_v7 }
 0x3f9   : > { %1601 = vadd.xlane.f32.xlu0 %v1600_v23 }
 0x3fa   : > { %1595 = vadd.xlane.f32.xlu1 %v1594_v27 }
 0x45c   : > { %v1615_v10 = vpop.xlane.xlu0 %1614  ;;  %v1612_v61 = vpop.xlane.xlu2 %1611 }
 0x45d   : > { %v1609_v29 = vpop.xlane.xlu1 %1608 }
 0x464   : > { %v1593_v33 = vpop.xlane.xlu0 %1592  ;;  %v1599_v4 = vpop.xlane.xlu2 %1598 }
 0x465   : > { %v1619_v60 = vadd.f32 %v1609_v29, %v1593_v33  ;;  %v1621_v18 = vadd.f32 %v1615_v10, %v1599_v4  ;;  %v1618_v5 = vpop.xlane.xlu1 %1617 }
 0x467   : > { %v2772_v36 = vmul.f32 -1.442695, %v1619_v60  ;;  %v2774_v56 = vmul.f32 -1.442695, %v1621_v18 }
 0x469   : > { %2923 = vpow2.f32 %v2772_v36 }
 0x46a   : > { %2925 = vpow2.f32 %v2774_v56 }
 0x46c   : > { %v1602_v24 = vpop.xlane.xlu0 %1601 }
 0x46d   : > { %v1622_v11 = vadd.f32 %v1618_v5, %v1602_v24  ;;  %v1596_v30 = vpop.xlane.xlu1 %1595 }
 0x46e   : > { %v1620_v2 = vadd.f32 %v1612_v61, %v1596_v30 }
 0x46f   : > { %v2924_v14 = vpop.eup %2923  ;;  %v2775_v25 = vmul.f32 -1.442695, %v1622_v11 }
 0x470   : > { %v2926_v20 = vpop.eup %2925  ;;  %v1635_v22 = vadd.f32 1.0, %v2924_v14  ;;  %v2773_v52 = vmul.f32 -1.442695, %v1620_v2 }
 0x471   : > { %v1637_v47 = vadd.f32 1.0, %v2926_v20  ;;  %2927 = vpow2.f32 %v2775_v25 }
 0x472   : > { %2929 = vrcp.f32 %v1635_v22  ;;  %v1648_v17 = vand.u32 2147483647, %v1635_v22  ;;  %v1650_v35 = vand.u32 2147483648, %v1635_v22  ;;  %vm1644_vm13 = vweird.f32 %v1635_v22 }
 0x473   : > { %2931 = vrcp.f32 %v1637_v47  ;;  %v1678_v49 = vand.u32 2147483647, %v1637_v47  ;;  %v1680_v59 = vand.u32 2147483648, %v1637_v47  ;;  %vm1674_vm0 = vweird.f32 %v1637_v47 }
 0x474   : > { %2933 = vpow2.f32 %v2773_v52  ;;  %vm4258_vm15 = vcmp.eq.f32.partialorder %v1648_v17, 8.507059e+37  ;;  %v1651_v46 = vor.u32 1.1754944e-38, %v1650_v35 }
 0x475   : > { %v1681_v23 = vor.u32 1.1754944e-38, %v1680_v59 }
 0x477   : > { %v2928_v26 = vpop.eup %2927 }
 0x478   : > { %v2930_v42 = vpop.eup %2929  ;;  %v1638_v45 = vadd.f32 1.0, %v2928_v26 }
 0x479   : > { %v2932_v62 = vpop.eup %2931  ;;  %v1640_v43 = vmul.f32 %v2930_v42, %v1635_v22  ;;  %vm1645_vm11 = vweird.f32 %v2930_v42 }
 0x47a   : > { %v1670_v28 = vmul.f32 %v2932_v62, %v1637_v47  ;;  %2935 = vrcp.f32 %v1638_v45  ;;  %v2934_v55 = vpop.eup %2933  ;;  %vm1675_vm12 = vweird.f32 %v2932_v62  ;;  %vm4254_vm14 = vmor %vm1644_vm13, %vm1645_vm11  ;;  %v1693_v39 = vand.u32 2147483647, %v1638_v45 }
 0x47b   : > { %v1641_v38 = vsub.f32 1.0, %v1640_v43  ;;  %v1636_v40 = vadd.f32 1.0, %v2934_v55  ;;  %v1695_v12 = vand.u32 2147483648, %v1638_v45  ;;  %vm4264_vm9 = vmor %vm1674_vm0, %vm1675_vm12  ;;  %vm1679_vm11 = vcmp.eq.f32.partialorder %v1678_v49, 8.507059e+37 }
 0x47c   : > { %v1671_v8 = vsub.f32 1.0, %v1670_v28  ;;  %vm1689_vm13 = vweird.f32 %v1638_v45 }
 0x47d   : > { %v1642_v54 = vmul.f32 %v2930_v42, %v1641_v38  ;;  %2937 = vrcp.f32 %v1636_v40  ;;  %v1665_v61 = vand.u32 2147483648, %v1636_v40  ;;  %v1696_v33 = vor.u32 1.1754944e-38, %v1695_v12 }
 0x47e   : > { %v1672_v53 = vmul.f32 %v2932_v62, %v1671_v8  ;;  %2939 = vrcp.f32 %v2987_v6  ;;  %v1663_v4 = vand.u32 2147483647, %v1636_v40  ;;  %v5026_v12 = vlaneseq }
 0x47f   : > { %v1643_v32 = vadd.f32 %v2930_v42, %v1642_v54  ;;  %v1666_v11 = vor.u32 1.1754944e-38, %v1665_v61 }
 0x480   : > { %v2936_v48 = vpop.eup %2935  ;;  %v1673_v50 = vadd.f32 %v2932_v62, %v1672_v53 }
 0x481   : > { %v1685_v16 = vmul.f32 %v2936_v48, %v1638_v45  ;;  %v1647_v9 = vsel %vm4254_vm14, %v2930_v42, %v1643_v32  ;;  %vm1690_vm10 = vweird.f32 %v2936_v48  ;;  %vm1694_vm14 = vcmp.eq.f32.partialorder %v1693_v39, 8.507059e+37 }
 0x482   : > { %v1677_v51 = vsel %vm4264_vm9, %v2932_v62, %v1673_v50  ;;  %v1652_v29 = vsel %vm4258_vm15, %v1651_v46, %v1647_v9  ;;  %vm1691_vm12 = vmor %vm1689_vm13, %vm1690_vm10  ;;  %vm1659_vm9 = vweird.f32 %v1636_v40  ;;  %vm1664_vm10 = vcmp.eq.f32.partialorder %v1663_v4, 8.507059e+37 }
 0x483   : > { %v1686_v19 = vsub.f32 1.0, %v1685_v16  ;;  %v2938_v1 = vpop.eup %2937  ;;  %v1682_v18 = vsel %vm1679_vm11, %v1681_v23, %v1677_v51  ;;  %v4273_v30 = vmul.f32 %v1652_v29, %v4182_v34  ;;  %v4276_v2 = vmul.f32 %v1652_v29, %v4184_v21 }
 0x484   : > { %v1655_v7 = vmul.f32 %v2938_v1, %v1636_v40  ;;  %v2940_v60 = vpop.eup %2939  ;;  %vm1660_vm0 = vweird.f32 %v2938_v1  ;;  %v4279_v14 = vmul.f32 %v1682_v18, %v4196_v57  ;;  %v4282_v25 = vmul.f32 %v1682_v18, %v4198_v0 }
 0x485   : > { %v1687_v41 = vmul.f32 %v2936_v48, %v1686_v19  ;;  %vm1661_vm15 = vmor %vm1659_vm9, %vm1660_vm0  ;;  %vm1730_vm11 = vweird.f32 %v2940_v60  ;;  %v1753_v9 = vshrl.u32 %v5026_v12, 7  ;;  %vm1777_vm0 = vcmp.lt.s32.totalorder %v3609_v63, 50 }
 0x486   : > { %v1656_v10 = vsub.f32 1.0, %v1655_v7  ;;  %v1734_v57 = vmax.f32 %v4273_v30, %v4279_v14  ;;  %v1743_v0 = vmax.f32 %v4276_v2, %v4282_v25  ;;  %vm1793_vm9 = vcmp.lt.s32.totalorder %v3609_v63, 49 }
 0x487   : > { %v1688_v27 = vadd.f32 %v2936_v48, %v1687_v41  ;;  %vm1754_vm13 = vcmp.eq.s32.totalorder %v1753_v9, 0 }
 0x488   : > { %v1657_v36 = vmul.f32 %v2938_v1, %v1656_v10 }
 0x489   : > { %v1692_v5 = vsel %vm1691_vm12, %v2936_v48, %v1688_v27  ;;  %vm1761_vm12 = vcmp.lt.s32.totalorder %v3609_v63, 51 }
 0x48a   : > { %v1697_v56 = vsel %vm1694_vm14, %v1696_v33, %v1692_v5  ;;  %v1658_v24 = vadd.f32 %v2938_v1, %v1657_v36  ;;  %vm1768_vm14 = vcmask 1041408  }
 0x48b   : > { %v4285_v20 = vmul.f32 %v1697_v56, %v4204_v15  ;;  %v4288_v22 = vmul.f32 %v1697_v56, %v4206_v3  ;;  %v1726_v15 = vmul.f32 32.0, %v2940_v60 }
 0x48c   : > { %v1662_v47 = vsel %vm1661_vm15, %v2938_v1, %v1658_v24  ;;  %vm1809_vm15 = vcmp.lt.s32.totalorder %v3609_v63, 48 }
 0x48d   : > { %v1667_v34 = vsel %vm1664_vm10, %v1666_v11, %v1662_v47  ;;  %v1727_v28 = vsub.f32 1.0, %v1726_v15  ;;  %vm1825_vm10 = vcmp.lt.s32.totalorder %v3609_v63, 47 }
 0x48e   : > { %v4291_v52 = vmul.f32 %v1667_v34, %v4188_v31  ;;  %v4294_v21 = vmul.f32 %v1667_v34, %v4190_v13 }
 0x48f   : > { %v1728_v32 = vmul.f32 %v2940_v60, %v1727_v28 }
 0x490   : > { %v1707_v3 = vadd.f32 %v4291_v52, %v4273_v30  ;;  %v1716_v26 = vadd.f32 %v4294_v21, %v4276_v2  ;;  %v1735_v31 = vmax.f32 %v4291_v52, %v4285_v20  ;;  %v1744_v13 = vmax.f32 %v4294_v21, %v4288_v22 }
 0x491   : > { %v1729_v44 = vadd.f32 %v2940_v60, %v1728_v32 }
 0x492   : > { %v1708_v42 = vadd.f32 %v1707_v3, %v4279_v14  ;;  %v1717_v45 = vadd.f32 %v1716_v26, %v4282_v25  ;;  %v1736_v62 = vmax.f32 %v1734_v57, %v1735_v31  ;;  %v1745_v43 = vmax.f32 %v1743_v0, %v1744_v13 }
 0x493   : > { %v1731_v51 = vsel %vm1730_vm11, %v2940_v60, %v1729_v44  ;;  %vm1841_vm11 = vcmp.lt.s32.totalorder %v3609_v63, 46 }
 0x494   : > { %v1709_v55 = vadd.f32 %v1708_v42, %v4285_v20  ;;  %v1718_v38 = vadd.f32 %v1717_v45, %v4288_v22  ;;  %v1737_v8 = vrot.slane %v1736_v62, 4  ;;  %v1746_v40 = vrot.slane %v1745_v43, 4 }
 0x496   : > { %v1710_v54 = vrot.slane %v1709_v55, 4  ;;  %v1719_v53 = vrot.slane %v1718_v38, 4  ;;  %v1738_v48 = vmax.f32 %v1736_v62, %v1737_v8  ;;  %v1747_v17 = vmax.f32 %v1745_v43, %v1746_v40  ;;  %v1764_v62 = vld [vmem:[%s4864_s11] sm:$0xf]  ;;  %v2776_v43 = vld [vmem:[%s4864_s11 + $0x4] sm:$0xf] }
 0x497   : > { %v2777_v8 = vld [vmem:[%s4864_s11 + $0x8] sm:$0xf] }
 0x498   : > { %v1711_v35 = vadd.f32 %v1710_v54, %v1709_v55  ;;  %v1720_v16 = vadd.f32 %v1719_v53, %v1718_v38  ;;  %v1739_v50 = vrot.slane %v1738_v48, 2  ;;  %v1748_v49 = vrot.slane %v1747_v17, 2 }
 0x49a   : > { %v1712_v59 = vrot.slane %v1711_v35, 2  ;;  %v1721_v19 = vrot.slane %v1720_v16, 2  ;;  %v1740_v6 = vmax.f32 %v1738_v48, %v1739_v50  ;;  %v1749_v1 = vmax.f32 %v1747_v17, %v1748_v49 }
 0x49c   : > { %v1713_v58 = vadd.f32 %v1712_v59, %v1711_v35  ;;  %v1722_v39 = vadd.f32 %v1721_v19, %v1720_v16  ;;  %v1741_v7 = vrot.slane %v1740_v6, 1  ;;  %v1750_v46 = vrot.slane %v1749_v1, 1  ;;  %v2778_v19 = vld [vmem:[%s4864_s11 + $0xc] sm:$0xf] }
 0x49e   : > { %v1714_v37 = vrot.slane %v1713_v58, 1  ;;  %v1723_v41 = vrot.slane %v1722_v39, 1  ;;  %v1742_v29 = vmax.f32 %v1740_v6, %v1741_v7  ;;  %v1751_v33 = vmax.f32 %v1749_v1, %v1750_v46 }
 0x4a0   : > { %v1715_v23 = vadd.f32 %v1714_v37, %v1713_v58  ;;  %v1724_v27 = vadd.f32 %v1723_v41, %v1722_v39 }
 0x4a2   : > { %v1732_v10 = vmul.f32 %v1731_v51, %v1715_v23  ;;  %v1733_v61 = vmul.f32 %v1731_v51, %v1724_v27  ;;  %v2779_v51 = vld [vmem:[%s4864_s11 + $0x10] sm:$0xf] }
 0x4a4   : > { %v4313_v4 = vsel %vm1754_vm13, %v1732_v10, %v1742_v29  ;;  %v4315_v18 = vsel %vm1754_vm13, %v1733_v61, %v1751_v33  ;;  %v2780_v61 = vld [vmem:[%s4864_s11 + $0x14] sm:$0xf]  ;;  %vm1857_vm13 = vcmp.lt.s32.totalorder %v3609_v63, 45 }
 0x4a5   : > { %1759 = vrot.lane.b32.xlu0 %v4315_v18, %s2988_s18  ;;  %1773 = vrot.lane.b32.xlu1 %v4313_v4, %s2989_s22 }
 0x4a6   : > { %1757 = vrot.lane.b32.xlu2 %v4313_v4, %s2988_s18  ;;  %s2996_s18 = smov 34  }
 0x4ad   : > { %1775 = vrot.lane.b32.xlu0 %v4315_v18, %s2989_s22  ;;  %1791 = vrot.lane.b32.xlu1 %v4315_v18, %s2990_s25  ;;  %s2997_s22 = smov 33  }
 0x4ae   : > { %1789 = vrot.lane.b32.xlu2 %v4313_v4, %s2990_s25  ;;  %s2998_s25 = smov 32  }
 0x4b5   : > { %1805 = vrot.lane.b32.xlu0 %v4313_v4, %s2991_s24  ;;  %1821 = vrot.lane.b32.xlu1 %v4313_v4, %s2992_s28 }
 0x4b6   : > { %1807 = vrot.lane.b32.xlu2 %v4315_v18, %s2991_s24  ;;  %s2999_s24 = smov 31  }
 0x4bd   : > { %1823 = vrot.lane.b32.xlu0 %v4315_v18, %s2992_s28  ;;  %1839 = vrot.lane.b32.xlu1 %v4315_v18, %s2993_s30  ;;  %s3000_s28 = smov 30  }
 0x4be   : > { %1837 = vrot.lane.b32.xlu2 %v4313_v4, %s2993_s30  ;;  %s3001_s30 = smov 29  }
 0x4c5   : > { %1853 = vrot.lane.b32.xlu0 %v4313_v4, %s2994_s21  ;;  %1869 = vrot.lane.b32.xlu1 %v4313_v4, %s2995_s17 }
 0x4c6   : > { %1855 = vrot.lane.b32.xlu2 %v4315_v18, %s2994_s21  ;;  %s3002_s21 = smov 19  }
 0x4cd   : > { %1871 = vrot.lane.b32.xlu0 %v4315_v18, %s2995_s17  ;;  %1887 = vrot.lane.b32.xlu1 %v4315_v18, %s2996_s18  ;;  %s3003_s17 = smov 18  }
 0x4ce   : > { %1885 = vrot.lane.b32.xlu2 %v4313_v4, %s2996_s18  ;;  %s5027_s18 = smov 17  }
 0x4d5   : > { %1901 = vrot.lane.b32.xlu0 %v4313_v4, %s2997_s22  ;;  %1917 = vrot.lane.b32.xlu1 %v4313_v4, %s2998_s25 }
 0x4d6   : > { %1903 = vrot.lane.b32.xlu2 %v4315_v18, %s2997_s22  ;;  %s5028_s22 = smov 16  }
 0x4dd   : > { %1919 = vrot.lane.b32.xlu0 %v4315_v18, %s2998_s25  ;;  %1935 = vrot.lane.b32.xlu1 %v4315_v18, %s2999_s24  ;;  %s5029_s25 = smov 15  }
 0x4de   : > { %1933 = vrot.lane.b32.xlu2 %v4313_v4, %s2999_s24  ;;  %s3004_s24 = smov 14  }
 0x4e5   : > { %1949 = vrot.lane.b32.xlu0 %v4313_v4, %s3000_s28  ;;  %1965 = vrot.lane.b32.xlu1 %v4313_v4, %s3001_s30 }
 0x4e6   : > { %1951 = vrot.lane.b32.xlu2 %v4315_v18, %s3000_s28  ;;  %s3005_s28 = smov 13  }
 0x4ed   : > { %1967 = vrot.lane.b32.xlu0 %v4315_v18, %s3001_s30  ;;  %1983 = vrot.lane.b32.xlu1 %v4315_v18, %s3002_s21  ;;  %s3006_s30 = smov 3  }
 0x4ee   : > { %1981 = vrot.lane.b32.xlu2 %v4313_v4, %s3002_s21  ;;  %s3007_s21 = smov 2  }
 0x4f5   : > { %1997 = vrot.lane.b32.xlu0 %v4313_v4, %s3003_s17  ;;  %2013 = vrot.lane.b32.xlu1 %v4313_v4, %s5027_s18 }
 0x4f6   : > { %1999 = vrot.lane.b32.xlu2 %v4315_v18, %s3003_s17  ;;  %s3025_s17 = smov 79  }
 0x4fd   : > { %2015 = vrot.lane.b32.xlu0 %v4315_v18, %s5027_s18  ;;  %2030 = vrot.lane.b32.xlu1 %v4315_v18, %s5028_s22  ;;  %s3009_s18 = smov 125  }
 0x4fe   : > { %2028 = vrot.lane.b32.xlu2 %v4313_v4, %s5028_s22  ;;  %s3019_s22 = smov 94  }
 0x500   : > { %v1758_v60 = vpop.permute.xlu2 %1757 }
 0x505   : > { %2043 = vrot.lane.b32.xlu0 %v4313_v4, %s5029_s25  ;;  %2058 = vrot.lane.b32.xlu1 %v4313_v4, %s3004_s24 }
 0x506   : > { %2045 = vrot.lane.b32.xlu2 %v4315_v18, %s5029_s25  ;;  %s3016_s25 = smov 97  }
 0x508   : > { %v1790_v5 = vpop.permute.xlu2 %1789 }
 0x50d   : > { %2060 = vrot.lane.b32.xlu0 %v4315_v18, %s3004_s24  ;;  %2076 = vrot.lane.b32.xlu1 %v4315_v18, %s3005_s28  ;;  %s5032_s24 = smov 111  }
 0x50e   : > { %2074 = vrot.lane.b32.xlu2 %v4313_v4, %s3005_s28  ;;  %s5030_s28 = smov 127  }
 0x510   : > { %v1808_v36 = vpop.permute.xlu2 %1807 }
 0x515   : > { %2090 = vrot.lane.b32.xlu0 %v4313_v4, %s3006_s30  ;;  %2106 = vrot.lane.b32.xlu1 %v4313_v4, %s3007_s21 }
 0x516   : > { %2092 = vrot.lane.b32.xlu2 %v4315_v18, %s3006_s30  ;;  %s3008_s30 = smov 126  }
 0x517   : > { %v1760_v56 = vpop.permute.xlu0 %1759  ;;  %v1774_v24 = vpop.permute.xlu1 %1773 }
 0x518   : > { %v1762_v11 = vsel %vm1761_vm12, %v1758_v60, %v1760_v56  ;;  %v1763_v47 = vsel %vm1761_vm12, %v1760_v56, %v1758_v60  ;;  %v1838_v34 = vpop.permute.xlu2 %1837  ;;  %vm1873_vm12 = vcmp.lt.s32.totalorder %v3609_v63, 35 }
 0x519   : > { %v1767_v57 = vrot.slane %v1762_v11, 6 }
 0x51b   : > { %v1769_v0 = vsel %vm1768_vm14, %v1763_v47, %v1767_v57  ;;  %v2781_v57 = vld [vmem:[%s4864_s11 + $0x18] sm:$0xf] }
 0x51c   : > { %v1771_v54 = vmul.f32 %v1769_v0, %v1764_v62 }
 0x51d   : > { %2108 = vrot.lane.b32.xlu0 %v4315_v18, %s3007_s21  ;;  %2124 = vrot.lane.b32.xlu1 %v4315_v18, %s4938_s14  ;;  %s3012_s21 = smov 110  }
 0x51e   : > { %2122 = vrot.lane.b32.xlu2 %v4313_v4, %s4938_s14  ;;  %s3013_s14 = smov 109  }
 0x51f   : > { %v1776_v15 = vpop.permute.xlu0 %1775  ;;  %v1792_v3 = vpop.permute.xlu1 %1791 }
 0x520   : > { %v1778_v26 = vsel %vm1777_vm0, %v1774_v24, %v1776_v15  ;;  %v1779_v31 = vsel %vm1777_vm0, %v1776_v15, %v1774_v24  ;;  %v1794_v13 = vsel %vm1793_vm9, %v1790_v5, %v1792_v3  ;;  %v1795_v42 = vsel %vm1793_vm9, %v1792_v3, %v1790_v5  ;;  %v1856_v45 = vpop.permute.xlu2 %1855 }
 0x521   : > { %v1784_v28 = vrot.slane %v1778_v26, 6  ;;  %v1800_v55 = vrot.slane %v1794_v13, 6  ;;  %vm1889_vm0 = vcmp.lt.s32.totalorder %v3609_v63, 34  ;;  %vm1905_vm9 = vcmp.lt.s32.totalorder %v3609_v63, 33 }
 0x523   : > { %v1785_v38 = vsel %vm1768_vm14, %v1779_v31, %v1784_v28  ;;  %v1801_v40 = vsel %vm1768_vm14, %v1795_v42, %v1800_v55  ;;  %v2782_v55 = vld [vmem:[%s4864_s11 + $0x1c] sm:$0xf] }
 0x524   : > { %v1787_v53 = vmul.f32 %v2776_v43, %v1785_v38  ;;  %v1803_v17 = vmul.f32 %v2777_v8, %v1801_v40 }
 0x525   : > { %2146 = vrot.lane.b32.xlu0 %v4313_v4, %s5030_s28  ;;  %2161 = vrot.lane.b32.xlu1 %v4313_v4, %s3008_s30 }
 0x526   : > { %v1788_v48 = vadd.f32 %v1787_v53, %v1771_v54  ;;  %2148 = vrot.lane.b32.xlu2 %v4315_v18, %s5030_s28  ;;  %s3010_s28 = smov 115   ;;  %v2783_v54 = vld [vmem:[%s4864_s11 + $0x20] sm:$0xf] }
 0x527   : > { %v1806_v32 = vpop.permute.xlu0 %1805  ;;  %v1822_v35 = vpop.permute.xlu1 %1821 }
 0x528   : > { %v1804_v16 = vadd.f32 %v1803_v17, %v1788_v48  ;;  %v1810_v50 = vsel %vm1809_vm15, %v1806_v32, %v1808_v36  ;;  %v1811_v49 = vsel %vm1809_vm15, %v1808_v36, %v1806_v32  ;;  %v1886_v59 = vpop.permute.xlu2 %1885  ;;  %vm1921_vm15 = vcmp.lt.s32.totalorder %v3609_v63, 32 }
 0x529   : > { %v1816_v6 = vrot.slane %v1810_v50, 6 }
 0x52b   : > { %v1817_v1 = vsel %vm1768_vm14, %v1811_v49, %v1816_v6  ;;  %v2784_v6 = vld [vmem:[%s4864_s11 + $0x24] sm:$0xf] }
 0x52c   : > { %v1819_v44 = vmul.f32 %v2778_v19, %v1817_v1 }
 0x52d   : > { %2163 = vrot.lane.b32.xlu0 %v4315_v18, %s3008_s30  ;;  %2179 = vrot.lane.b32.xlu1 %v4315_v18, %s3009_s18  ;;  %s3011_s30 = smov 114  }
 0x52e   : > { %v1820_v58 = vadd.f32 %v1819_v44, %v1804_v16  ;;  %2177 = vrot.lane.b32.xlu2 %v4313_v4, %s3009_s18  ;;  %s3022_s18 = smov 82  }
 0x52f   : > { %v1824_v39 = vpop.permute.xlu0 %1823  ;;  %v1840_v12 = vpop.permute.xlu1 %1839 }
 0x530   : > { %v1826_v9 = vsel %vm1825_vm10, %v1822_v35, %v1824_v39  ;;  %v1827_v37 = vsel %vm1825_vm10, %v1824_v39, %v1822_v35  ;;  %v1842_v41 = vsel %vm1841_vm11, %v1838_v34, %v1840_v12  ;;  %v1843_v7 = vsel %vm1841_vm11, %v1840_v12, %v1838_v34  ;;  %v1904_v46 = vpop.permute.xlu2 %1903 }
 0x531   : > { %v1832_v23 = vrot.slane %v1826_v9, 6  ;;  %v1848_v27 = vrot.slane %v1842_v41, 6  ;;  %vm1937_vm10 = vcmp.lt.s32.totalorder %v3609_v63, 31  ;;  %vm1953_vm11 = vcmp.lt.s32.totalorder %v3609_v63, 30 }
 0x533   : > { %v1833_v10 = vsel %vm1768_vm14, %v1827_v37, %v1832_v23  ;;  %v1849_v29 = vsel %vm1768_vm14, %v1843_v7, %v1848_v27  ;;  %v2785_v23 = vld [vmem:[%s4864_s11 + $0x28] sm:$0xf] }
 0x534   : > { %v1835_v33 = vmul.f32 %v2779_v51, %v1833_v10  ;;  %v1851_v5 = vmul.f32 %v2780_v61, %v1849_v29  ;;  %v2786_v29 = vld [vmem:[%s4864_s11 + $0x2c] sm:$0xf] }
 0x535   : > { %2193 = vrot.lane.b32.xlu0 %v4313_v4, %s3010_s28  ;;  %2209 = vrot.lane.b32.xlu1 %v4313_v4, %s3011_s30 }
 0x536   : > { %v1836_v60 = vadd.f32 %v1835_v33, %v1820_v58  ;;  %2195 = vrot.lane.b32.xlu2 %v4315_v18, %s3010_s28  ;;  %s3018_s28 = smov 95  }
 0x537   : > { %v1854_v36 = vpop.permute.xlu0 %1853  ;;  %v1870_v56 = vpop.permute.xlu1 %1869 }
 0x538   : > { %v1852_v24 = vadd.f32 %v1851_v5, %v1836_v60  ;;  %v1858_v11 = vsel %vm1857_vm13, %v1854_v36, %v1856_v45  ;;  %v1859_v47 = vsel %vm1857_vm13, %v1856_v45, %v1854_v36  ;;  %v1934_v34 = vpop.permute.xlu2 %1933  ;;  %vm1969_vm13 = vcmp.lt.s32.totalorder %v3609_v63, 29 }
 0x539   : > { %v1864_v0 = vrot.slane %v1858_v11, 6 }
 0x53b   : > { %v1865_v15 = vsel %vm1768_vm14, %v1859_v47, %v1864_v0  ;;  %v2787_v0 = vld [vmem:[%s4864_s11 + $0x30] sm:$0xf] }
 0x53c   : > { %v1867_v3 = vmul.f32 %v2781_v57, %v1865_v15 }
 0x53d   : > { %2211 = vrot.lane.b32.xlu0 %v4315_v18, %s3011_s30  ;;  %2227 = vrot.lane.b32.xlu1 %v4315_v18, %s4939_s23  ;;  %s3015_s30 = smov 98  }
 0x53e   : > { %v1868_v26 = vadd.f32 %v1867_v3, %v1852_v24  ;;  %2225 = vrot.lane.b32.xlu2 %v4313_v4, %s4939_s23  ;;  %s5031_s23 = smov 112  }
 0x53f   : > { %v1872_v31 = vpop.permute.xlu0 %1871  ;;  %v1888_v13 = vpop.permute.xlu1 %1887 }
 0x540   : > { %v1874_v42 = vsel %vm1873_vm12, %v1870_v56, %v1872_v31  ;;  %v1875_v45 = vsel %vm1873_vm12, %v1872_v31, %v1870_v56  ;;  %v1890_v62 = vsel %vm1889_vm0, %v1886_v59, %v1888_v13  ;;  %v1891_v43 = vsel %vm1889_vm0, %v1888_v13, %v1886_v59  ;;  %v1952_v28 = vpop.permute.xlu2 %1951 }
 0x541   : > { %v1880_v38 = vrot.slane %v1874_v42, 6  ;;  %v1896_v8 = vrot.slane %v1890_v62, 6  ;;  %vm1985_vm12 = vcmp.lt.s32.totalorder %v3609_v63, 19  ;;  %vm2001_vm0 = vcmp.lt.s32.totalorder %v3609_v63, 18 }
 0x543   : > { %v1881_v40 = vsel %vm1768_vm14, %v1875_v45, %v1880_v38  ;;  %v1897_v53 = vsel %vm1768_vm14, %v1891_v43, %v1896_v8  ;;  %v2788_v38 = vld [vmem:[%s4864_s11 + $0x34] sm:$0xf] }
 0x544   : > { %v1883_v48 = vmul.f32 %v2782_v55, %v1881_v40  ;;  %v1899_v32 = vmul.f32 %v2783_v54, %v1897_v53  ;;  %v2789_v53 = vld [vmem:[%s4864_s11 + $0x38] sm:$0xf] }
 0x545   : > { %2240 = vrot.lane.b32.xlu0 %v4313_v4, %s5031_s23  ;;  %2255 = vrot.lane.b32.xlu1 %v4313_v4, %s5032_s24 }
 0x546   : > { %v1884_v17 = vadd.f32 %v1883_v48, %v1868_v26  ;;  %2242 = vrot.lane.b32.xlu2 %v4315_v18, %s5031_s23  ;;  %s3014_s23 = smov 99  }
 0x547   : > { %v1902_v35 = vpop.permute.xlu0 %1901  ;;  %v1918_v16 = vpop.permute.xlu1 %1917 }
 0x548   : > { %v1900_v50 = vadd.f32 %v1899_v32, %v1884_v17  ;;  %v1906_v49 = vsel %vm1905_vm9, %v1902_v35, %v1904_v46  ;;  %v1907_v59 = vsel %vm1905_vm9, %v1904_v46, %v1902_v35  ;;  %v1982_v19 = vpop.permute.xlu2 %1981  ;;  %vm2110_vm9 = vcmp.lt.s32.totalorder %v3609_v63, 2 }
 0x549   : > { %v1912_v1 = vrot.slane %v1906_v49, 6 }
 0x54b   : > { %v1913_v44 = vsel %vm1768_vm14, %v1907_v59, %v1912_v1  ;;  %v2790_v1 = vld [vmem:[%s4864_s11 + $0x3c] sm:$0xf] }
 0x54c   : > { %v1915_v58 = vmul.f32 %v2784_v6, %v1913_v44 }
 0x54d   : > { %2257 = vrot.lane.b32.xlu0 %v4315_v18, %s5032_s24  ;;  %2272 = vrot.lane.b32.xlu1 %v4315_v18, %s3012_s21  ;;  %s3021_s24 = smov 83  }
 0x54e   : > { %v1916_v39 = vadd.f32 %v1915_v58, %v1900_v50  ;;  %2270 = vrot.lane.b32.xlu2 %v4313_v4, %s3012_s21 }
 0x54f   : > { %v1920_v12 = vpop.permute.xlu0 %1919  ;;  %v1936_v9 = vpop.permute.xlu1 %1935 }
 0x550   : > { %v1922_v37 = vsel %vm1921_vm15, %v1918_v16, %v1920_v12  ;;  %v1923_v41 = vsel %vm1921_vm15, %v1920_v12, %v1918_v16  ;;  %v1938_v7 = vsel %vm1937_vm10, %v1934_v34, %v1936_v9  ;;  %v1939_v46 = vsel %vm1937_vm10, %v1936_v9, %v1934_v34  ;;  %v2000_v51 = vpop.permute.xlu2 %1999 }
 0x551   : > { %v1928_v27 = vrot.slane %v1922_v37, 6  ;;  %v1944_v10 = vrot.slane %v1938_v7, 6  ;;  %vm2197_vm15 = vcmp.lt.s32.totalorder %v3609_v63, 115  ;;  %vm2213_vm10 = vcmp.lt.s32.totalorder %v3609_v63, 114 }
 0x553   : > { %v1929_v61 = vsel %vm1768_vm14, %v1923_v41, %v1928_v27  ;;  %v1945_v33 = vsel %vm1768_vm14, %v1939_v46, %v1944_v10  ;;  %v2791_v27 = vld [vmem:[%s4864_s11 + $0x40] sm:$0xf] }
 0x554   : > { %v1931_v60 = vmul.f32 %v2785_v23, %v1929_v61  ;;  %v1947_v36 = vmul.f32 %v2786_v29, %v1945_v33  ;;  %v2792_v33 = vld [vmem:[%s4864_s11 + $0x44] sm:$0xf] }
 0x555   : > { %2286 = vrot.lane.b32.xlu0 %v4313_v4, %s3013_s14  ;;  %2302 = vrot.lane.b32.xlu1 %v4313_v4, %s3014_s23 }
 0x556   : > { %v1932_v5 = vadd.f32 %v1931_v60, %v1916_v39  ;;  %2288 = vrot.lane.b32.xlu2 %v4315_v18, %s3013_s14  ;;  %s3017_s14 = smov 96  }
 0x557   : > { %v1950_v56 = vpop.permute.xlu0 %1949  ;;  %v1966_v24 = vpop.permute.xlu1 %1965 }
 0x558   : > { %v1948_v11 = vadd.f32 %v1947_v36, %v1932_v5  ;;  %v1954_v47 = vsel %vm1953_vm11, %v1950_v56, %v1952_v28  ;;  %v1955_v34 = vsel %vm1953_vm11, %v1952_v28, %v1950_v56  ;;  %v2029_v57 = vpop.permute.xlu2 %2028  ;;  %vm2274_vm11 = vcmp.lt.s32.totalorder %v3609_v63, 110 }
 0x559   : > { %v1960_v15 = vrot.slane %v1954_v47, 6 }
 0x55b   : > { %v1961_v3 = vsel %vm1768_vm14, %v1955_v34, %v1960_v15  ;;  %v2793_v15 = vld [vmem:[%s4864_s11 + $0x48] sm:$0xf] }
 0x55c   : > { %v1963_v26 = vmul.f32 %v2787_v0, %v1961_v3 }
 0x55d   : > { %2304 = vrot.lane.b32.xlu0 %v4315_v18, %s3014_s23  ;;  %2320 = vrot.lane.b32.xlu1 %v4315_v18, %s3015_s30  ;;  %s3024_s23 = smov 80  }
 0x55e   : > { %v1964_v31 = vadd.f32 %v1963_v26, %v1948_v11  ;;  %2318 = vrot.lane.b32.xlu2 %v4313_v4, %s3015_s30 }
 0x55f   : > { %v1968_v13 = vpop.permute.xlu0 %1967  ;;  %v1984_v42 = vpop.permute.xlu1 %1983 }
 0x560   : > { %v1970_v45 = vsel %vm1969_vm13, %v1966_v24, %v1968_v13  ;;  %v1971_v62 = vsel %vm1969_vm13, %v1968_v13, %v1966_v24  ;;  %v1986_v43 = vsel %vm1985_vm12, %v1982_v19, %v1984_v42  ;;  %v1987_v28 = vsel %vm1985_vm12, %v1984_v42, %v1982_v19  ;;  %v2046_v55 = vpop.permute.xlu2 %2045 }
 0x561   : > { %v1976_v8 = vrot.slane %v1970_v45, 6  ;;  %v1992_v40 = vrot.slane %v1986_v43, 6  ;;  %vm2290_vm13 = vcmp.lt.s32.totalorder %v3609_v63, 109  ;;  %vm2306_vm12 = vcmp.lt.s32.totalorder %v3609_v63, 99 }
 0x563   : > { %v1977_v54 = vsel %vm1768_vm14, %v1971_v62, %v1976_v8  ;;  %v1993_v48 = vsel %vm1768_vm14, %v1987_v28, %v1992_v40  ;;  %v2794_v8 = vld [vmem:[%s4864_s11 + $0x4c] sm:$0xf] }
 0x564   : > { %v1979_v17 = vmul.f32 %v2788_v38, %v1977_v54  ;;  %v1995_v35 = vmul.f32 %v2789_v53, %v1993_v48  ;;  %v2795_v48 = vld [vmem:[%s4864_s11 + $0x50] sm:$0xf] }
 0x565   : > { %2334 = vrot.lane.b32.xlu0 %v4313_v4, %s3016_s25  ;;  %2350 = vrot.lane.b32.xlu1 %v4313_v4, %s3017_s14 }
 0x566   : > { %v1980_v32 = vadd.f32 %v1979_v17, %v1964_v31  ;;  %2336 = vrot.lane.b32.xlu2 %v4315_v18, %s3016_s25  ;;  %s3020_s25 = smov 93  }
 0x567   : > { %v1998_v16 = vpop.permute.xlu0 %1997  ;;  %v2014_v50 = vpop.permute.xlu1 %2013 }
 0x568   : > { %v1996_v49 = vadd.f32 %v1995_v35, %v1980_v32  ;;  %v2002_v59 = vsel %vm2001_vm0, %v1998_v16, %v2000_v51  ;;  %v2003_v19 = vsel %vm2001_vm0, %v2000_v51, %v1998_v16  ;;  %v2075_v6 = vpop.permute.xlu2 %2074  ;;  %vm2370_vm0 = vcmp.lt.s32.totalorder %v3609_v63, 95 }
 0x569   : > { %v2008_v44 = vrot.slane %v2002_v59, 6 }
 0x56b   : > { %v2009_v58 = vsel %vm1768_vm14, %v2003_v19, %v2008_v44  ;;  %v2796_v44 = vld [vmem:[%s4864_s11 + $0x54] sm:$0xf] }
 0x56c   : > { %v2011_v39 = vmul.f32 %v2790_v1, %v2009_v58 }
 0x56d   : > { %2352 = vrot.lane.b32.xlu0 %v4315_v18, %s3017_s14  ;;  %2368 = vrot.lane.b32.xlu1 %v4315_v18, %s3018_s28 }
 0x56e   : > { %v2012_v12 = vadd.f32 %v2011_v39, %v1996_v49  ;;  %2366 = vrot.lane.b32.xlu2 %v4313_v4, %s3018_s28 }
 0x56f   : > { %v2016_v9 = vpop.permute.xlu0 %2015  ;;  %v2031_v37 = vpop.permute.xlu1 %2030 }
 0x570   : > { %v2017_v41 = vsel %vm593_vm2, %v2014_v50, %v2016_v9  ;;  %v2018_v7 = vsel %vm593_vm2, %v2016_v9, %v2014_v50  ;;  %v2032_v46 = vsel %vm672_vm1, %v2029_v57, %v2031_v37  ;;  %v2033_v51 = vsel %vm672_vm1, %v2031_v37, %v2029_v57  ;;  %v2093_v23 = vpop.permute.xlu2 %2092 }
 0x571   : > { %v2023_v10 = vrot.slane %v2017_v41, 6  ;;  %v2038_v61 = vrot.slane %v2032_v46, 6  ;;  %vm2062_vm1 = vcmp.lt.s32.totalorder %v3609_v63, 14  ;;  %vm2078_vm2 = vcmp.lt.s32.totalorder %v3609_v63, 13 }
 0x573   : > { %v2024_v29 = vsel %vm1768_vm14, %v2018_v7, %v2023_v10  ;;  %v2039_v60 = vsel %vm1768_vm14, %v2033_v51, %v2038_v61  ;;  %v2797_v10 = vld [vmem:[%s4864_s11 + $0x58] sm:$0xf] }
 0x574   : > { %v2026_v5 = vmul.f32 %v2791_v27, %v2024_v29  ;;  %v2041_v56 = vmul.f32 %v2792_v33, %v2039_v60  ;;  %v2798_v60 = vld [vmem:[%s4864_s11 + $0x5c] sm:$0xf] }
 0x575   : > { %2382 = vrot.lane.b32.xlu0 %v4313_v4, %s3019_s22  ;;  %2398 = vrot.lane.b32.xlu1 %v4313_v4, %s3020_s25 }
 0x576   : > { %v2027_v36 = vadd.f32 %v2026_v5, %v2012_v12  ;;  %2384 = vrot.lane.b32.xlu2 %v4315_v18, %s3019_s22  ;;  %s3023_s22 = smov 81  }
 0x577   : > { %v2044_v24 = vpop.permute.xlu0 %2043  ;;  %v2059_v11 = vpop.permute.xlu1 %2058 }
 0x578   : > { %v2042_v47 = vadd.f32 %v2041_v56, %v2027_v36  ;;  %v2047_v34 = vsel %vm753_vm3, %v2044_v24, %v2046_v55  ;;  %v2048_v57 = vsel %vm753_vm3, %v2046_v55, %v2044_v24  ;;  %v2123_v0 = vpop.permute.xlu2 %2122  ;;  %vm2094_vm3 = vcmp.lt.s32.totalorder %v3609_v63, 3 }
 0x579   : > { %v2053_v3 = vrot.slane %v2047_v34, 6  ;;  %v2141_v36 = vrot.slane %v4315_v18, 6 }
 0x57b   : > { %v2054_v26 = vsel %vm1768_vm14, %v2048_v57, %v2053_v3  ;;  %v2142_v57 = vsel %vm1768_vm14, %v4313_v4, %v2141_v36 }
 0x57c   : > { %v2056_v31 = vmul.f32 %v2793_v15, %v2054_v26 }
 0x57d   : > { %2400 = vrot.lane.b32.xlu0 %v4315_v18, %s3020_s25  ;;  %2416 = vrot.lane.b32.xlu1 %v4315_v18, %s3021_s24  ;;  %s468_s25 = scalar_lea.vmem [#allocation3], %s3147_s19 }
 0x57e   : > { %v2057_v13 = vadd.f32 %v2056_v31, %v2042_v47  ;;  %2414 = vrot.lane.b32.xlu2 %v4313_v4, %s3021_s24  ;;  %v2799_v47 = vld [vmem:[%s4864_s11 + $0x60] sm:$0xf]  ;;  %s3027_s24 = smov 77  }
 0x57f   : > { %v2061_v42 = vpop.permute.xlu0 %2060  ;;  %v2077_v45 = vpop.permute.xlu1 %2076 }
 0x580   : > { %v2063_v62 = vsel %vm2062_vm1, %v2059_v11, %v2061_v42  ;;  %v2064_v43 = vsel %vm2062_vm1, %v2061_v42, %v2059_v11  ;;  %v2079_v28 = vsel %vm2078_vm2, %v2075_v6, %v2077_v45  ;;  %v2080_v55 = vsel %vm2078_vm2, %v2077_v45, %v2075_v6  ;;  %v2149_v38 = vpop.permute.xlu2 %2148 }
 0x581   : > { %v2069_v40 = vrot.slane %v2063_v62, 6  ;;  %v2085_v54 = vrot.slane %v2079_v28, 6  ;;  %v2144_v45 = vmul.f32 %v2799_v47, %v2142_v57  ;;  %vm2386_vm1 = vcmp.lt.s32.totalorder %v3609_v63, 94 }
 0x582   : > { %vm2402_vm2 = vcmp.lt.s32.totalorder %v3609_v63, 93 }
 0x583   : > { %v2070_v53 = vsel %vm1768_vm14, %v2064_v43, %v2069_v40  ;;  %v2086_v17 = vsel %vm1768_vm14, %v2080_v55, %v2085_v54 }
 0x584   : > { %v2072_v32 = vmul.f32 %v2794_v8, %v2070_v53  ;;  %v2088_v16 = vmul.f32 %v2795_v48, %v2086_v17 }
 0x585   : > { %2430 = vrot.lane.b32.xlu0 %v4313_v4, %s3022_s18  ;;  %2446 = vrot.lane.b32.xlu1 %v4313_v4, %s3023_s22 }
 0x586   : > { %v2073_v35 = vadd.f32 %v2072_v32, %v2057_v13  ;;  %2432 = vrot.lane.b32.xlu2 %v4315_v18, %s3022_s18  ;;  %s3026_s18 = smov 78   ;;  %v2800_v13 = vld [vmem:[%s4864_s11 + $0x64] sm:$0xf]  ;;  %v2801_v32 = vld [vmem:[%s4864_s11 + $0x68] sm:$0xf] }
 0x587   : > { %v2091_v50 = vpop.permute.xlu0 %2090  ;;  %v2107_v49 = vpop.permute.xlu1 %2106 }
 0x588   : > { %v2089_v59 = vadd.f32 %v2088_v16, %v2073_v35  ;;  %v2095_v19 = vsel %vm2094_vm3, %v2091_v50, %v2093_v23  ;;  %v2096_v6 = vsel %vm2094_vm3, %v2093_v23, %v2091_v50  ;;  %v2178_v1 = vpop.permute.xlu2 %2177  ;;  %v2802_v50 = vld [vmem:[%s4864_s11 + $0x6c] sm:$0xf]  ;;  %vm2418_vm3 = vcmp.lt.s32.totalorder %v3609_v63, 83 }
 0x589   : > { %v2101_v58 = vrot.slane %v2095_v19, 6 }
 0x58b   : > { %v2102_v39 = vsel %vm1768_vm14, %v2096_v6, %v2101_v58 }
 0x58c   : > { %v2104_v12 = vmul.f32 %v2796_v44, %v2102_v39 }
 0x58d   : > { %2448 = vrot.lane.b32.xlu0 %v4315_v18, %s3023_s22  ;;  %2464 = vrot.lane.b32.xlu1 %v4315_v18, %s3024_s23 }
 0x58e   : > { %v2105_v9 = vadd.f32 %v2104_v12, %v2089_v59  ;;  %2462 = vrot.lane.b32.xlu2 %v4313_v4, %s3024_s23  ;;  %v2803_v12 = vld [vmem:[%s4864_s11 + $0x70] sm:$0xf] }
 0x58f   : > { %v2109_v37 = vpop.permute.xlu0 %2108  ;;  %v2125_v41 = vpop.permute.xlu1 %2124 }
 0x590   : > { %v2111_v7 = vsel %vm2110_vm9, %v2107_v49, %v2109_v37  ;;  %v2112_v46 = vsel %vm2110_vm9, %v2109_v37, %v2107_v49  ;;  %v2126_v51 = vsel %vm834_vm4, %v2123_v0, %v2125_v41  ;;  %v2127_v23 = vsel %vm834_vm4, %v2125_v41, %v2123_v0  ;;  %v2196_v27 = vpop.permute.xlu2 %2195 }
 0x591   : > { %v2117_v61 = vrot.slane %v2111_v7, 6  ;;  %v2132_v29 = vrot.slane %v2126_v51, 6  ;;  %vm2165_vm4 = vcmp.lt.s32.totalorder %v3609_v63, 126  ;;  %vm2434_vm9 = vcmp.lt.s32.totalorder %v3609_v63, 82 }
 0x593   : > { %v2118_v33 = vsel %vm1768_vm14, %v2112_v46, %v2117_v61  ;;  %v2133_v5 = vsel %vm1768_vm14, %v2127_v23, %v2132_v29 }
 0x594   : > { %v2120_v56 = vmul.f32 %v2797_v10, %v2118_v33  ;;  %v2135_v11 = vmul.f32 %v2798_v60, %v2133_v5 }
 0x595   : > { %2478 = vrot.lane.b32.xlu0 %v4313_v4, %s3025_s17  ;;  %2494 = vrot.lane.b32.xlu1 %v4313_v4, %s3026_s18 }
 0x596   : > { %v2121_v24 = vadd.f32 %v2120_v56, %v2105_v9  ;;  %2480 = vrot.lane.b32.xlu2 %v4315_v18, %s3025_s17 }
 0x597   : > { %v2147_v34 = vpop.permute.xlu0 %2146  ;;  %v2162_v0 = vpop.permute.xlu1 %2161 }
 0x598   : > { %v2136_v15 = vadd.f32 %v2135_v11, %v2121_v24  ;;  %v2150_v3 = vsel %vm971_vm5, %v2147_v34, %v2149_v38  ;;  %v2151_v26 = vsel %vm971_vm5, %v2149_v38, %v2147_v34  ;;  %v4568_v31 = vpop.permute.xlu2 %2225  ;;  %vm2181_vm5 = vcmp.lt.s32.totalorder %v3609_v63, 125 }
 0x599   : > { %v2156_v42 = vrot.slane %v2151_v26, 6 }
 0x59a   : > { %v2145_v43 = vadd.f32 %v2144_v45, %v2136_v15 }
 0x59b   : > { %v2157_v62 = vsel %vm1768_vm14, %v2150_v3, %v2156_v42 }
 0x59c   : > { %v2159_v28 = vmul.f32 %v2800_v13, %v2157_v62 }
 0x59d   : > { %2496 = vrot.lane.b32.xlu0 %v4315_v18, %s3026_s18  ;;  %2512 = vrot.lane.b32.xlu1 %v4315_v18, %s3027_s24 }
 0x59e   : > { %v2160_v55 = vadd.f32 %v2159_v28, %v2145_v43  ;;  %2510 = vrot.lane.b32.xlu2 %v4313_v4, %s3027_s24 }
 0x59f   : > { %v2164_v38 = vpop.permute.xlu0 %2163  ;;  %v2180_v8 = vpop.permute.xlu1 %2179 }
 0x5a0   : > { %v2166_v40 = vsel %vm2165_vm4, %v2162_v0, %v2164_v38  ;;  %v2167_v54 = vsel %vm2165_vm4, %v2164_v38, %v2162_v0  ;;  %v2182_v53 = vsel %vm2181_vm5, %v2178_v1, %v2180_v8  ;;  %v2183_v48 = vsel %vm2181_vm5, %v2180_v8, %v2178_v1  ;;  %v2243_v17 = vpop.permute.xlu2 %2242 }
 0x5a1   : > { %v2172_v35 = vrot.slane %v2167_v54, 6  ;;  %v2188_v18 = vrot.slane %v2183_v48, 6  ;;  %vm2450_vm4 = vcmp.lt.s32.totalorder %v3609_v63, 81  ;;  %vm2466_vm5 = vcmp.lt.s32.totalorder %v3609_v63, 80 }
 0x5a3   : > { %v2173_v16 = vsel %vm1768_vm14, %v2166_v40, %v2172_v35  ;;  %v2189_v4 = vsel %vm1768_vm14, %v2182_v53, %v2188_v18  ;;  %v2805_v35 = vld [vmem:[%s4864_s11 + $0x78] sm:$0xf] }
 0x5a4   : > { %v2175_v49 = vmul.f32 %v2801_v32, %v2173_v16  ;;  %v2191_v19 = vmul.f32 %v2802_v50, %v2189_v4  ;;  %v2806_v16 = vld [vmem:[%s4864_s11 + $0x7c] sm:$0xf] }
 0x5a6   : > { %v2176_v59 = vadd.f32 %v2175_v49, %v2160_v55 }
 0x5a7   : > { %v2194_v6 = vpop.permute.xlu0 %2193  ;;  %v2210_v1 = vpop.permute.xlu1 %2209 }
 0x5a8   : > { %v2192_v44 = vadd.f32 %v2191_v19, %v2176_v59  ;;  %v2198_v58 = vsel %vm2197_vm15, %v2194_v6, %v2196_v27  ;;  %v2199_v39 = vsel %vm2197_vm15, %v2196_v27, %v2194_v6  ;;  %v4591_v37 = vpop.permute.xlu2 %2270  ;;  %v2804_v27 = vld [vmem:[%s4864_s11 + $0x74] sm:$0xf]  ;;  %v2807_v59 = vld [vmem:[%s4864_s11 + $0x80] sm:$0xf]  ;;  %vm2482_vm15 = vcmp.lt.s32.totalorder %v3609_v63, 79 }
 0x5a9   : > { %v2204_v9 = vrot.slane %v2199_v39, 6 }
 0x5ab   : > { %v2205_v41 = vsel %vm1768_vm14, %v2198_v58, %v2204_v9 }
 0x5ac   : > { %v2207_v7 = vmul.f32 %v2803_v12, %v2205_v41 }
 0x5ae   : > { %v2208_v46 = vadd.f32 %v2207_v7, %v2192_v44 }
 0x5af   : > { %v2212_v51 = vpop.permute.xlu0 %2211  ;;  %v2228_v23 = vpop.permute.xlu1 %2227 }
 0x5b0   : > { %v2215_v10 = vsel %vm2213_vm10, %v2212_v51, %v2210_v1  ;;  %v2214_v29 = vsel %vm2213_vm10, %v2210_v1, %v2212_v51  ;;  %v2289_v5 = vpop.permute.xlu2 %2288  ;;  %v2230_v43 = vsel %vm1052_vm6, %v2228_v23, %v4568_v31  ;;  %v2229_v48 = vsel %vm1052_vm6, %v4568_v31, %v2228_v23 }
 0x5b1   : > { %v2220_v61 = vrot.slane %v2215_v10, 6  ;;  %v2235_v40 = vrot.slane %v2230_v43, 6  ;;  %vm2322_vm6 = vcmp.lt.s32.totalorder %v3609_v63, 98  ;;  %vm2498_vm10 = vcmp.lt.s32.totalorder %v3609_v63, 78 }
 0x5b3   : > { %v2221_v33 = vsel %vm1768_vm14, %v2214_v29, %v2220_v61  ;;  %v2236_v18 = vsel %vm1768_vm14, %v2229_v48, %v2235_v40  ;;  %v2809_v29 = vld [vmem:[%s4864_s11 + $0x88] sm:$0xf] }
 0x5b4   : > { %v2223_v60 = vmul.f32 %v2804_v27, %v2221_v33  ;;  %v2238_v44 = vmul.f32 %v2805_v35, %v2236_v18  ;;  %v2808_v27 = vld [vmem:[%s4864_s11 + $0x84] sm:$0xf]  ;;  %v2811_v18 = vld [vmem:[%s4864_s11 + $0x90] sm:$0xf] }
 0x5b6   : > { %v2224_v36 = vadd.f32 %v2223_v60, %v2208_v46 }
 0x5b7   : > { %v2241_v56 = vpop.permute.xlu0 %2240  ;;  %v2256_v24 = vpop.permute.xlu1 %2255 }
 0x5b8   : > { %v4599_v11 = vpop.permute.xlu2 %2318  ;;  %v2245_v28 = vsel %vm1133_vm7, %v2243_v17, %v2241_v56  ;;  %v2244_v32 = vsel %vm1133_vm7, %v2241_v56, %v2243_v17  ;;  %v2239_v41 = vadd.f32 %v2238_v44, %v2224_v36  ;;  %vm2338_vm7 = vcmp.lt.s32.totalorder %v3609_v63, 97  ;;  %v2810_v56 = vld [vmem:[%s4864_s11 + $0x8c] sm:$0xf] }
 0x5b9   : > { %v2250_v54 = vrot.slane %v2245_v28, 6 }
 0x5bb   : > { %v2251_v50 = vsel %vm1768_vm14, %v2244_v32, %v2250_v54 }
 0x5bc   : > { %v2253_v58 = vmul.f32 %v2806_v16, %v2251_v50  ;;  %v2812_v50 = vld [vmem:[%s4864_s11 + $0x94] sm:$0xf] }
 0x5be   : > { %v2254_v51 = vadd.f32 %v2253_v58, %v2239_v41 }
 0x5bf   : > { %v2258_v47 = vpop.permute.xlu0 %2257  ;;  %v2273_v34 = vpop.permute.xlu1 %2272 }
 0x5c0   : > { %v4601_v15 = vpop.permute.xlu2 %2336  ;;  %v2260_v8 = vsel %vm1214_vm8, %v2258_v47, %v2256_v24  ;;  %v2259_v31 = vsel %vm1214_vm8, %v2256_v24, %v2258_v47  ;;  %v2276_v17 = vsel %vm2274_vm11, %v2273_v34, %v4591_v37  ;;  %v2275_v23 = vsel %vm2274_vm11, %v4591_v37, %v2273_v34 }
 0x5c1   : > { %v2265_v53 = vrot.slane %v2260_v8, 6  ;;  %v2281_v12 = vrot.slane %v2276_v17, 6  ;;  %vm2354_vm8 = vcmp.lt.s32.totalorder %v3609_v63, 96  ;;  %v2813_v17 = vld [vmem:[%s4864_s11 + $0x98] sm:$0xf]  ;;  %vm2514_vm11 = vcmp.lt.s32.totalorder %v3609_v63, 77 }
 0x5c2   : > { %v2823_v63 = vld [vmem:[%s4864_s11 + $0xc0] sm:$0xf] }
 0x5c3   : > { %v2266_v19 = vsel %vm1768_vm14, %v2259_v31, %v2265_v53  ;;  %v2282_v61 = vsel %vm1768_vm14, %v2275_v23, %v2281_v12 }
 0x5c4   : > { %v2268_v7 = vmul.f32 %v2807_v59, %v2266_v19 }
 0x5c6   : > { %v2269_v60 = vadd.f32 %v2268_v7, %v2254_v51 }
 0x5c7   : > { %v2287_v57 = vpop.permute.xlu0 %2286  ;;  %v2303_v0 = vpop.permute.xlu1 %2302 }
 0x5c8   : > { %v4605_v13 = vpop.permute.xlu2 %2366  ;;  %v2292_v4 = vsel %vm2290_vm13, %v2289_v5, %v2287_v57  ;;  %v2291_v10 = vsel %vm2290_vm13, %v2287_v57, %v2289_v5  ;;  %v2284_v57 = vmul.f32 %v2808_v27, %v2282_v61  ;;  %v2815_v61 = vld [vmem:[%s4864_s11 + $0xa0] sm:$0xf] }
 0x5c9   : > { %v2297_v9 = vrot.slane %v2292_v4, 6 }
 0x5ca   : > { %v2285_v40 = vadd.f32 %v2284_v57, %v2269_v60 }
 0x5cb   : > { %v2298_v33 = vsel %vm1768_vm14, %v2291_v10, %v2297_v9  ;;  %v2814_v10 = vld [vmem:[%s4864_s11 + $0x9c] sm:$0xf] }
 0x5cf   : > { %v2305_v3 = vpop.permute.xlu0 %2304  ;;  %v4603_v26 = vpop.permute.xlu1 %2320 }
 0x5d0   : > { %v4611_v62 = vpop.permute.xlu2 %2384  ;;  %v2308_v39 = vsel %vm2306_vm12, %v2305_v3, %v2303_v0  ;;  %v2307_v37 = vsel %vm2306_vm12, %v2303_v0, %v2305_v3  ;;  %v2324_v5 = vsel %vm2322_vm6, %v4603_v26, %v4599_v11  ;;  %v2300_v0 = vmul.f32 %v2809_v29, %v2298_v33  ;;  %v2816_v33 = vld [vmem:[%s4864_s11 + $0xa4] sm:$0xf] }
 0x5d1   : > { %v2313_v46 = vrot.slane %v2308_v39, 6  ;;  %v2329_v28 = vrot.slane %v2324_v5, 6  ;;  %v2323_v32 = vsel %vm2322_vm6, %v4599_v11, %v4603_v26 }
 0x5d2   : > { %v2301_v48 = vadd.f32 %v2300_v0, %v2285_v40 }
 0x5d3   : > { %v2314_v24 = vsel %vm1768_vm14, %v2307_v37, %v2313_v46  ;;  %v2330_v16 = vsel %vm1768_vm14, %v2323_v32, %v2329_v28  ;;  %v2818_v32 = vld [vmem:[%s4864_s11 + $0xac] sm:$0xf] }
 0x5d4   : > { %v2316_v54 = vmul.f32 %v2810_v56, %v2314_v24  ;;  %v2332_v44 = vmul.f32 %v2811_v18, %v2330_v16  ;;  %v2819_v18 = vld [vmem:[%s4864_s11 + $0xb0] sm:$0xf] }
 0x5d6   : > { %v2317_v11 = vadd.f32 %v2316_v54, %v2301_v48 }
 0x5d7   : > { %v4607_v42 = vpop.permute.xlu0 %2334  ;;  %v4609_v45 = vpop.permute.xlu1 %2350 }
 0x5d8   : > { %v4647_v49 = vpop.permute.xlu2 %2414  ;;  %v2340_v36 = vsel %vm2338_vm7, %v4601_v15, %v4607_v42  ;;  %v2339_v35 = vsel %vm2338_vm7, %v4607_v42, %v4601_v15  ;;  %v2333_v12 = vadd.f32 %v2332_v44, %v2317_v11 }
 0x5d9   : > { %v2345_v8 = vrot.slane %v2340_v36, 6 }
 0x5db   : > { %v2346_v31 = vsel %vm1768_vm14, %v2339_v35, %v2345_v8 }
 0x5df   : > { %v4618_v55 = vpop.permute.xlu0 %2352  ;;  %v4620_v38 = vpop.permute.xlu1 %2368 }
 0x5e0   : > { %v2356_v3 = vsel %vm2354_vm8, %v4618_v55, %v4609_v45  ;;  %v4695_v43 = vpop.permute.xlu2 %2432  ;;  %v2355_v15 = vsel %vm2354_vm8, %v4609_v45, %v4618_v55  ;;  %v2372_v26 = vsel %vm2370_vm0, %v4620_v38, %v4605_v13  ;;  %v2348_v45 = vmul.f32 %v2812_v50, %v2346_v31 }
 0x5e1   : > { %v2361_v53 = vrot.slane %v2356_v3, 6  ;;  %v2377_v58 = vrot.slane %v2372_v26, 6  ;;  %v2371_v51 = vsel %vm2370_vm0, %v4605_v13, %v4620_v38 }
 0x5e2   : > { %v2349_v46 = vadd.f32 %v2348_v45, %v2333_v12 }
 0x5e3   : > { %v2362_v4 = vsel %vm1768_vm14, %v2355_v15, %v2361_v53  ;;  %v2378_v27 = vsel %vm1768_vm14, %v2371_v51, %v2377_v58  ;;  %v2817_v53 = vld [vmem:[%s4864_s11 + $0xa8] sm:$0xf] }
 0x5e4   : > { %v2364_v9 = vmul.f32 %v2813_v17, %v2362_v4  ;;  %v2380_v36 = vmul.f32 %v2814_v10, %v2378_v27 }
 0x5e6   : > { %v2365_v13 = vadd.f32 %v2364_v9, %v2349_v46 }
 0x5e7   : > { %v4653_v6 = vpop.permute.xlu0 %2382  ;;  %v4655_v1 = vpop.permute.xlu1 %2398 }
 0x5e8   : > { %v2388_v42 = vsel %vm2386_vm1, %v4611_v62, %v4653_v6  ;;  %v2463_v41 = vpop.permute.xlu2 %2462  ;;  %v2387_v23 = vsel %vm2386_vm1, %v4653_v6, %v4611_v62  ;;  %v2381_v57 = vadd.f32 %v2380_v36, %v2365_v13 }
 0x5e9   : > { %v2393_v39 = vrot.slane %v2388_v42, 6 }
 0x5eb   : > { %v2394_v29 = vsel %vm1768_vm14, %v2387_v23, %v2393_v39  ;;  %v2821_v39 = vld [vmem:[%s4864_s11 + $0xb8] sm:$0xf] }
 0x5ec   : > { %v2396_v56 = vmul.f32 %v2815_v61, %v2394_v29  ;;  %v2822_v61 = vld [vmem:[%s4864_s11 + $0xbc] sm:$0xf] }
 0x5ee   : > { %v2397_v28 = vadd.f32 %v2396_v56, %v2381_v57 }
 0x5ef   : > { %v2401_v47 = vpop.permute.xlu0 %2400  ;;  %v4689_v34 = vpop.permute.xlu1 %2416 }
 0x5f0   : > { %v2404_v55 = vsel %vm2402_vm2, %v2401_v47, %v4655_v1  ;;  %v2403_v38 = vsel %vm2402_vm2, %v4655_v1, %v2401_v47  ;;  %v2420_v62 = vsel %vm2418_vm3, %v4689_v34, %v4647_v49  ;;  %v2419_v8 = vsel %vm2418_vm3, %v4647_v49, %v4689_v34  ;;  %v2481_v40 = vpop.permute.xlu2 %2480 }
 0x5f1   : > { %v2409_v7 = vrot.slane %v2404_v55, 6  ;;  %v2425_v24 = vrot.slane %v2420_v62, 6  ;;  %v2820_v55 = vld [vmem:[%s4864_s11 + $0xb4] sm:$0xf] }
 0x5f3   : > { %v2410_v60 = vsel %vm1768_vm14, %v2403_v38, %v2409_v7  ;;  %v2426_v48 = vsel %vm1768_vm14, %v2419_v8, %v2425_v24 }
 0x5f4   : > { %v2412_v0 = vmul.f32 %v2816_v33, %v2410_v60  ;;  %v2428_v11 = vmul.f32 %v2817_v53, %v2426_v48 }
 0x5f6   : > { %v2413_v49 = vadd.f32 %v2412_v0, %v2397_v28 }
 0x5f7   : > { %v2431_v59 = vpop.permute.xlu0 %2430  ;;  %v2447_v19 = vpop.permute.xlu1 %2446 }
 0x5f8   : > { %v2436_v6 = vsel %vm2434_vm9, %v4695_v43, %v2431_v59  ;;  %v2435_v54 = vsel %vm2434_vm9, %v2431_v59, %v4695_v43  ;;  %v2429_v4 = vadd.f32 %v2428_v11, %v2413_v49  ;;  %v2511_v9 = vpop.permute.xlu2 %2510 }
 0x5f9   : > { %v2441_v47 = vrot.slane %v2436_v6, 6 }
 0x5fb   : > { %v2442_v35 = vsel %vm1768_vm14, %v2435_v54, %v2441_v47 }
 0x5fc   : > { %v2444_v15 = vmul.f32 %v2818_v32, %v2442_v35 }
 0x5ff   : > { %v2449_v37 = vpop.permute.xlu0 %2448  ;;  %v2465_v5 = vpop.permute.xlu1 %2464 }
 0x600   : > { %v2452_v1 = vsel %vm2450_vm4, %v2449_v37, %v2447_v19  ;;  %v2451_v34 = vsel %vm2450_vm4, %v2447_v19, %v2449_v37  ;;  %v2468_v43 = vsel %vm2466_vm5, %v2465_v5, %v2463_v41  ;;  %v2445_v19 = vadd.f32 %v2444_v15, %v2429_v4 }
 0x601   : > { %v2457_v3 = vrot.slane %v2452_v1, 6  ;;  %v2473_v42 = vrot.slane %v2468_v43, 6  ;;  %v2467_v44 = vsel %vm2466_vm5, %v2463_v41, %v2465_v5 }
 0x603   : > { %v2458_v16 = vsel %vm1768_vm14, %v2451_v34, %v2457_v3  ;;  %v2474_v58 = vsel %vm1768_vm14, %v2467_v44, %v2473_v42 }
 0x604   : > { %v2460_v59 = vmul.f32 %v2819_v18, %v2458_v16  ;;  %v2476_v51 = vmul.f32 %v2820_v55, %v2474_v58 }
 0x606   : > { %v2461_v41 = vadd.f32 %v2460_v59, %v2445_v19  ;;  %v2945_v19 = vld [vmem:[%s3150_s20] sm:$0xff] }
 0x607   : > { %v2479_v50 = vpop.permute.xlu0 %2478  ;;  %v2495_v31 = vpop.permute.xlu1 %2494 }
 0x608   : > { %v2484_v26 = vsel %vm2482_vm15, %v2481_v40, %v2479_v50  ;;  %v2483_v45 = vsel %vm2482_vm15, %v2479_v50, %v2481_v40  ;;  %v2477_v38 = vadd.f32 %v2476_v51, %v2461_v41 }
 0x609   : > { %v2489_v17 = vrot.slane %v2484_v26, 6 }
 0x60b   : > { %v2490_v12 = vsel %vm1768_vm14, %v2483_v45, %v2489_v17 }
 0x60c   : > { %v2492_v23 = vmul.f32 %v2821_v39, %v2490_v12 }
 0x60e   : > { %v2493_v37 = vadd.f32 %v2492_v23, %v2477_v38 }
 0x60f   : > { %v2497_v7 = vpop.permute.xlu0 %2496  ;;  %v2513_v46 = vpop.permute.xlu1 %2512 }
 0x610   : > { %v2500_v10 = vsel %vm2498_vm10, %v2497_v7, %v2495_v31  ;;  %v2516_v27 = vsel %vm2514_vm11, %v2513_v46, %v2511_v9  ;;  %v2499_v62 = vsel %vm2498_vm10, %v2495_v31, %v2497_v7  ;;  %v2515_v6 = vsel %vm2514_vm11, %v2511_v9, %v2513_v46  ;;  %v2951_v9 = vld [vmem:[%s3150_s20 + $0x30] sm:$0xff] }
 0x611   : > { %v2505_v29 = vrot.slane %v2500_v10, 6  ;;  %v2521_v13 = vrot.slane %v2516_v27, 6 }
 0x613   : > { %v2506_v33 = vsel %vm1768_vm14, %v2499_v62, %v2505_v29  ;;  %v2522_v60 = vsel %vm1768_vm14, %v2515_v6, %v2521_v13 }
 0x614   : > { %v2508_v5 = vmul.f32 %v2822_v61, %v2506_v33  ;;  %v2524_v56 = vmul.f32 %v2823_v63, %v2522_v60 }
 0x616   : > { %v2509_v36 = vadd.f32 %v2508_v5, %v2493_v37 }
 0x618   : > { %v2525_v1 = vadd.f32 %v2524_v56, %v2509_v36 }
 0x61a   : > { %v2824_v24 = vrot.slane %v2525_v1, 9 }
 0x61c   : > { %v2530_v47 = vadd.f32 %v2824_v24, %v2525_v1 }
 0x61e   : > { %v2825_v57 = vmul.f32 -1.442695, %v2530_v47 }
 0x620   : > { %2941 = vpow2.f32 %v2825_v57 }
 0x626   : > { %v2942_v0 = vpop.eup %2941 }
 0x627   : > { %v2534_v3 = vadd.f32 1.0, %v2942_v0 }
 0x629   : > { %2943 = vrcp.f32 %v2534_v3  ;;  %v2546_v54 = vand.u32 2147483648, %v2534_v3  ;;  %v2544_v48 = vand.u32 2147483647, %v2534_v3  ;;  %vm2540_vm14 = vweird.f32 %v2534_v3 }
 0x62b   : > { %v2547_v35 = vor.u32 1.1754944e-38, %v2546_v54  ;;  %vm2545_vm6 = vcmp.eq.f32.partialorder %v2544_v48, 8.507059e+37 }
 0x62f   : > { %v2944_v28 = vpop.eup %2943 }
 0x630   : > { %v2536_v8 = vmul.f32 %v2944_v28, %v2534_v3  ;;  %vm2541_vm13 = vweird.f32 %v2944_v28 }
 0x631   : > { %vm2542_vm12 = vmor %vm2540_vm14, %vm2541_vm13 }
 0x632   : > { %v2537_v40 = vsub.f32 1.0, %v2536_v8 }
 0x634   : > { %v2538_v53 = vmul.f32 %v2944_v28, %v2537_v40 }
 0x636   : > { %v2539_v32 = vadd.f32 %v2944_v28, %v2538_v53 }
 0x638   : > { %v2543_v49 = vsel %vm2542_vm12, %v2944_v28, %v2539_v32 }
 0x639   : > { %v2548_v34 = vsel %vm2545_vm6, %v2547_v35, %v2543_v49 }
 0x63a   : > { %v2551_v43 = vperm.slane %v2548_v34, 0  ;;  %v2552_v18 = vperm.slane %v2548_v34, 2 }
 0x63c   : > { %v2555_v16 = vperm.slane %v2551_v43, 0  ;;  %v2556_v50 = vperm.slane %v2552_v18, 0 }
 0x63e   : > { %v2557_v31 = vmul.f32 %v2555_v16, %v4273_v30  ;;  %v2558_v11 = vmul.f32 %v2556_v50, %v4276_v2  ;;  %v2559_v15 = vmul.f32 %v2555_v16, %v4291_v52  ;;  %v2560_v26 = vmul.f32 %v2556_v50, %v4294_v21  ;;  %v2946_v30 = vld [vmem:[%s3150_s20 + $0x8] sm:$0xff]  ;;  %v2947_v2 = vld [vmem:[%s3150_s20 + $0x10] sm:$0xff]  ;;  %v2948_v52 = vld [vmem:[%s3150_s20 + $0x18] sm:$0xff] }
 0x63f   : > { %v2561_v42 = vmul.f32 %v2555_v16, %v4279_v14  ;;  %v2562_v17 = vmul.f32 %v2556_v50, %v4282_v25  ;;  %v2563_v4 = vmul.f32 %v2555_v16, %v4285_v20  ;;  %v2564_v59 = vmul.f32 %v2556_v50, %v4288_v22  ;;  %v2949_v21 = vld [vmem:[%s3150_s20 + $0x20] sm:$0xff]  ;;  %v2950_v14 = vld [vmem:[%s3150_s20 + $0x28] sm:$0xff]  ;;  %v2952_v22 = vld [vmem:[%s3150_s20 + $0x38] sm:$0xff]  ;;  %s5033_s20 = sadd.s32 (%p3128_p5), 4294967295, %s2975_s27  }
 0x640   : > { %v2565_v44 = vadd.f32 %v2945_v19, %v2557_v31  ;;  %v2566_v45 = vadd.f32 %v2946_v30, %v2558_v11  ;;  %v2567_v55 = vadd.f32 %v2947_v2, %v2559_v15  ;;  %v2568_v58 = vadd.f32 %v2948_v52, %v2560_v26  ;;  %s2838_s14 = sshll.u32 (%p3128_p5), %s5033_s20, 4 }
 0x641   : > { %v2569_v39 = vadd.f32 %v2949_v21, %v2561_v42  ;;  %v2570_v12 = vadd.f32 %v2950_v14, %v2562_v17  ;;  %v2571_v25 = vadd.f32 %v2951_v9, %v2563_v4  ;;  %v2572_v46 = vadd.f32 %v2952_v22, %v2564_v59  ;;  %s2598_s24 = scalar_lea.vmem (%p3128_p5), %s4866_s13, %s2838_s14 }
 0x642   : > { %v2573_v41 = vmax.f32 %v2565_v44, 0.0  ;;  %v2574_v20 = vmax.f32 %v2566_v45, 0.0  ;;  %v2575_v7 = vmax.f32 %v2567_v55, 0.0  ;;  %v2576_v51 = vmax.f32 %v2568_v58, 0.0 }
 0x643   : > { %v2577_v23 = vmax.f32 %v2569_v39, 0.0  ;;  %v2578_v10 = vmax.f32 %v2570_v12, 0.0  ;;  %v2579_v27 = vmax.f32 %v2571_v25, 0.0  ;;  %v2580_v61 = vmax.f32 %v2572_v46, 0.0 }
 0x644   : > { %2581 = vst [vmem:[%s468_s25] sm:$0xff] %v2573_v41 }
 0x645   : > { %2582 = vst [vmem:[%s468_s25 + $0x8] sm:$0xff] %v2574_v20 }
 0x646   : > { %2583 = vst [vmem:[%s468_s25 + $0x10] sm:$0xff] %v2575_v7 }
 0x647   : > { %2584 = vst [vmem:[%s468_s25 + $0x18] sm:$0xff] %v2576_v51  ;;  %2595 = sbr.rel (!%p3128_p5) target bundleno = 1620 (0x654), region = 99 }
 0x648   : > { %2585 = vst [vmem:[%s468_s25 + $0x20] sm:$0xff] %v2577_v23 }
 0x649   : > { %2586 = vst [vmem:[%s468_s25 + $0x28] sm:$0xff] %v2578_v10 }
 0x64a   : > { %2587 = vst [vmem:[%s468_s25 + $0x30] sm:$0xff] %v2579_v27 }
 0x64b   : > { %2588 = vst [vmem:[%s468_s25 + $0x38] sm:$0xff] %v2580_v61  ;;  %v2611_v29 = vld [vmem:[%s468_s25] sm:$0xff] (%p3128_p5) }
 0x64c   : > { %v2613_v13 = vld [vmem:[%s468_s25 + $0x8] sm:$0xff]  ;;  %2612 = vst [vmem:[%s2598_s24] sm:$0xff] %v2611_v29 }
 0x64d   : > { %v2615_v38 = vld [vmem:[%s468_s25 + $0x10] sm:$0xff]  ;;  %2614 = vst [vmem:[%s2598_s24 + $0x8] sm:$0xff] %v2613_v13 }
 0x64e   : > { %v2617_v62 = vld [vmem:[%s468_s25 + $0x18] sm:$0xff]  ;;  %2616 = vst [vmem:[%s2598_s24 + $0x20] sm:$0xff] %v2615_v38 }
 0x64f   : > { %v2619_v6 = vld [vmem:[%s468_s25 + $0x20] sm:$0xff]  ;;  %2618 = vst [vmem:[%s2598_s24 + $0x28] sm:$0xff] %v2617_v62 }
 0x650   : > { %v2621_v33 = vld [vmem:[%s468_s25 + $0x28] sm:$0xff]  ;;  %2620 = vst [vmem:[%s2598_s24 + $0x40] sm:$0xff] %v2619_v6 }
 0x651   : > { %v2623_v63 = vld [vmem:[%s468_s25 + $0x30] sm:$0xff]  ;;  %2622 = vst [vmem:[%s2598_s24 + $0x48] sm:$0xff] %v2621_v33 }
 0x652   : > { %v2625_v60 = vld [vmem:[%s468_s25 + $0x38] sm:$0xff]  ;;  %2624 = vst [vmem:[%s2598_s24 + $0x60] sm:$0xff] %v2623_v63 }
 0x653   : > { %2626 = vst [vmem:[%s2598_s24 + $0x68] sm:$0xff] %v2625_v60 }
 0x654 PF: > { %p20_p10 = scmp.ge.s32.totalorder %s3115_s29, 4   ;;  %s5034_s25 = smov %s2971_s26 }
 0x655   : > { %s5035_s26 = smov %s3126_s15  ;;  %s5036_s27 = smov %s3115_s29 }
 0x656   :  { %22 = sbr.rel (!%p20_p10) target bundleno = 2 (0x2), region = 217 }

</bundles_post_ra>
